<compile_context>
chip_gen: v7x
topology: tpu7x:2x2x1
jax: 0.10.0
libtpu: 0.0.40
codegen_flags: <defaults>
</compile_context>

<pallas_src>
import functools

import jax
import jax.numpy as jnp
import numpy as np
from jax import lax
from jax.experimental import pallas as pl
from jax.experimental.pallas import tpu as pltpu

_LANE = 128


def _round_up(x, m):
    return (x + m - 1) // m * m


def _pick_depth_block(do, cap):
    """Prefer an exact divisor of the output depth near `cap`; otherwise use `cap`
    (the kernel then masks the single garbage output depth plane)."""
    cap = max(1, min(do, cap))
    lo = max(1, cap // 2)
    for d in range(cap, lo - 1, -1):
        if do % d == 0:
            return d
    return cap


def _fill_padded(buf, v, *, D, H, W):
    """buf: (DP, H+4, WP) f32 VMEM ref.  v: (D, H, W) f32 value.

    Builds zero(1)+reflect(1) padding so that buf[2+d, 2+h, 2+w] = v[d, h, w],
    buf plane 0 / planes >= D+3, row 0 / H+3 and col 0 / W+3 are zero.  Lane
    columns >= W+4 are never read by the stencil and are left untouched.
    """
    DP = buf.shape[0]
    H4 = H + 4
    WP = buf.shape[-1]
    f32 = jnp.float32

    # ---- halo-only zeroing (review: do not zero the whole buffer) ----
    buf[0:1, :, :] = jnp.zeros((1, H4, WP), f32)                     # leading zero plane
    buf[D + 3:DP, :, :] = jnp.zeros((DP - (D + 3), H4, WP), f32)     # trailing zero plane(s)
    buf[1:D + 3, 0:1, :] = jnp.zeros((D + 2, 1, WP), f32)            # top zero row
    buf[1:D + 3, H + 3:H4, :] = jnp.zeros((D + 2, 1, WP), f32)       # bottom zero row
    buf[1:D + 3, :, 0:1] = jnp.zeros((D + 2, H4, 1), f32)            # left zero col
    buf[1:D + 3, :, W + 3:W + 4] = jnp.zeros((D + 2, H4, 1), f32)    # right zero col

    # ---- interior + reflect(1) padding ----
    buf[2:D + 2, 2:H + 2, 2:W + 2] = v
    # reflect in W (F.pad reflect: col 1 = v[..,1], col W+2 = v[..,W-2])
    buf[2:D + 2, 2:H + 2, 1:2] = v[:, :, 1:2]
    buf[2:D + 2, 2:H + 2, W + 2:W + 3] = v[:, :, W - 2:W - 1]
    # reflect in H (row 1 = row 3 of the already W-padded buffer, etc.)
    buf[2:D + 2, 1:2, 1:W + 3] = buf[2:D + 2, 3:4, 1:W + 3]
    buf[2:D + 2, H + 2:H + 3, 1:W + 3] = buf[2:D + 2, H:H + 1, 1:W + 3]
    # reflect in D (plane 1 = plane 3 of the H/W-padded buffer, etc.)
    buf[1:2, 1:H + 3, 1:W + 3] = buf[3:4, 1:H + 3, 1:W + 3]
    buf[D + 2:D + 3, 1:H + 3, 1:W + 3] = buf[D:D + 1, 1:H + 3, 1:W + 3]


def _boundary_kernel(p_hbm, t_hbm, out_ref, zp_buf, zt_buf, p_stage, t_stage, sem,
                     *, D, H, W, TD, DO, need_dmask):
    """Grid = (N, S).  p_hbm/t_hbm: full (N,D,H,W) HBM refs.  out_ref: (1,1,1) per-batch SSD.

    zp_buf/zt_buf: (DP, H+4, WP) f32 padded volumes, built once per batch element at
    slab 0 and reused by every depth slab.  p_stage/t_stage: DMA staging buffers.
    """
    n = pl.program_id(0)          # batch element ("parallel")
    s = pl.program_id(1)          # depth-slab index ("arbitrary", reduction)
    HO = H + 2                    # output rows per plane
    WO = W + 2                    # output cols per plane (exact -> no lane mask needed)

    # ---------- slab 0: fetch this batch element, build padded volumes, init output ----------
    @pl.when(s == 0)
    def _build():
        cp = pltpu.make_async_copy(p_hbm.at[n], p_stage, sem.at[0])
        ct = pltpu.make_async_copy(t_hbm.at[n], t_stage, sem.at[1])
        cp.start()
        ct.start()
        cp.wait()
        _fill_padded(zp_buf, p_stage[...], D=D, H=H, W=W)
        ct.wait()
        _fill_padded(zt_buf, t_stage[...].astype(jnp.float32), D=D, H=H, W=W)
        out_ref[...] = jnp.zeros_like(out_ref)

    # ---------- this depth slab: TD output planes starting at d0 ----------
    d0 = pl.multiple_of(s * TD, TD)

    def grad(buf):
        # Ref-level window loads (review: do not materialize the whole slab as a value).
        def tap(kh, kw):
            return buf[pl.ds(d0 + 1, TD), kh:kh + HO, kw:kw + WO]
        q00, q01, q02 = tap(0, 0), tap(0, 1), tap(0, 2)
        q10, q11, q12 = tap(1, 0), tap(1, 1), tap(1, 2)
        q20, q21, q22 = tap(2, 0), tap(2, 1), tap(2, 2)
        zlo = buf[pl.ds(d0, TD), 1:1 + HO, 1:1 + WO]        # kernel_z kd=0 (+1) tap
        zhi = buf[pl.ds(d0 + 2, TD), 1:1 + HO, 1:1 + WO]    # kernel_z kd=2 (-1) tap
        two = jnp.float32(2.0)
        # kernel_x = [[1,0,-1],[2,0,-2],[1,0,-1]]   (+-1 taps as add/sub, no mul)
        gx = (q00 - q02) + two * (q10 - q12) + (q20 - q22)
        # kernel_y = [[1,2,1],[0,0,0],[-1,-2,-1]]
        gy = (q00 + two * q01 + q02) - (q20 + two * q21 + q22)
        # kernel_z: +-1 center taps at kd=0/2 plus the cross of kd=1
        gz = (q01 + q10 + two * q11 + q12 + q21) + zlo - zhi
        return (jnp.abs(gx) + jnp.abs(gy) + jnp.abs(gz)) * jnp.float32(1.0 / 3.0)

    diff = grad(zp_buf) - grad(zt_buf)
    if need_dmask:
        # Only emitted when TD does not divide D+2: mask the single garbage output
        # depth (D+2, which sees the depth-reflect plane); depths beyond that read
        # only zero planes and already contribute 0.
        od = d0 + lax.broadcasted_iota(jnp.int32, diff.shape, 0)
        diff = jnp.where(od < DO, diff, 0.0)

    # ---------- accumulate per-batch SSD across depth slabs ----------
    out_ref[...] = out_ref[...] + jnp.sum(diff * diff).reshape(1, 1, 1)


def boundary_loss(pred, target, sigma=1.0, *, max_depth_block=8):
    """pred: (N, C, D, H, W) logits, target: (N, D, H, W) or (N,1,D,H,W) labels -> scalar."""
    del sigma  # unused in the reference forward pass as well

    assert pred.ndim == 5, "pred must be (N, C, D, H, W)"
    C = pred.shape[1]
    assert C in (1, 2), "BoundaryLoss foreground-channel semantics require C in {1, 2}"

    p = jax.nn.softmax(pred.astype(jnp.float32), axis=1)
    if C == 2:
        p = p[:, 1:2]
    if target.ndim == p.ndim - 1:
        target = target[:, None]
    # TODO(synk): trilinear resize branch not implemented; shapes must match.
    assert p.shape[-3:] == target.shape[-3:], "spatial shapes must match"

    p4 = p[:, 0]                                   # (N, D, H, W) f32 fg probability
    t4 = (target[:, 0] > 0).astype(jnp.int8)       # binarize in wrapper, int8 DMA bytes

    N, D, H, W = p4.shape
    assert D >= 2 and H >= 2 and W >= 2, "reflect(1) padding needs spatial dims >= 2"

    DO, HO = D + 2, H + 2                 # gradient-map spatial extent
    WP = _round_up(W + 4, _LANE)          # lane-dense padded row width
    TD = _pick_depth_block(DO, max_depth_block)
    S = -(-DO // TD)                      # ceil(DO / TD)
    DP = S * TD + 2                       # padded depth (covers last slab's halo)
    need_dmask = (S * TD != DO)

    kernel = functools.partial(_boundary_kernel, D=D, H=H, W=W, TD=TD, DO=DO,
                               need_dmask=need_dmask)

    # VMEM budget from the actual footprint (padded scratch + staging + slab temps).
    scratch_bytes = 2 * DP * (H + 4) * WP * 4
    stage_bytes = D * H * W * (4 + 1)
    temp_bytes = 12 * TD * HO * WP * 4
    footprint = scratch_bytes + stage_bytes + temp_bytes
    try:
        phys_vmem = pltpu.get_tpu_info().vmem_capacity_bytes
    except Exception:                      # conservative fallback (v7x per-TC VMEM)
        phys_vmem = 64 * 1024 * 1024
    vmem_limit = int(min(max(1.5 * footprint + (8 << 20), 32 << 20),
                         int(0.9 * phys_vmem)))

    ssd = pl.pallas_call(
        kernel,
        out_shape=jax.ShapeDtypeStruct((N, 1, 1), jnp.float32),
        grid_spec=pltpu.PrefetchScalarGridSpec(
            num_scalar_prefetch=0,
            grid=(N, S),
            in_specs=[
                pl.BlockSpec(memory_space=pl.ANY),   # softmax fg prob, stays in HBM
                pl.BlockSpec(memory_space=pl.ANY),   # binarized int8 target, stays in HBM
            ],
            out_specs=pl.BlockSpec((1, 1, 1), lambda n, s: (n, 0, 0)),
            scratch_shapes=[
                pltpu.VMEM((DP, H + 4, WP), jnp.float32),   # padded pred volume
                pltpu.VMEM((DP, H + 4, WP), jnp.float32),   # padded target volume
                pltpu.VMEM((D, H, W), jnp.float32),         # pred DMA staging
                pltpu.VMEM((D, H, W), jnp.int8),            # target DMA staging
                pltpu.SemaphoreType.DMA((2,)),
            ],
        ),
        compiler_params=pltpu.CompilerParams(
            dimension_semantics=("parallel", "arbitrary"),
            vmem_limit_bytes=vmem_limit,
        ),
    )(p4, t4)

    count = N * DO * HO * (W + 2)
    return jnp.sum(ssd) / jnp.float32(count)


# ----------------------------------------------------------------------------
# Pure-JAX reference mirroring the PyTorch forward (conv3d via lax.conv).
# ----------------------------------------------------------------------------
_KX = ((1.0, 0.0, -1.0), (2.0, 0.0, -2.0), (1.0, 0.0, -1.0))
_KY = ((1.0, 2.0, 1.0), (0.0, 0.0, 0.0), (-1.0, -2.0, -1.0))
_KZ = (((0.0, 0.0, 0.0), (0.0, 1.0, 0.0), (0.0, 0.0, 0.0)),
       ((0.0, 1.0, 0.0), (1.0, 2.0, 1.0), (0.0, 1.0, 0.0)),
       ((0.0, 0.0, 0.0), (0.0, -1.0, 0.0), (0.0, 0.0, 0.0)))


def _reference_loss(pred, target):
    p = jax.nn.softmax(pred.astype(jnp.float32), axis=1)
    if p.shape[1] == 2:
        p = p[:, 1:2]
    if target.ndim == p.ndim - 1:
        target = target[:, None]
    t = (target > 0).astype(jnp.float32)

    kx = jnp.asarray(_KX, jnp.float32)[None, None, None]   # (1,1,1,3,3)  OIDHW
    ky = jnp.asarray(_KY, jnp.float32)[None, None, None]
    kz = jnp.asarray(_KZ, jnp.float32)[None, None]         # (1,1,3,3,3)

    def grad(x):
        pad = jnp.pad(x, ((0, 0), (0, 0), (1, 1), (1, 1), (1, 1)), mode="reflect")
        dn = lax.conv_dimension_numbers(pad.shape, kx.shape, ("NCDHW", "OIDHW", "NCDHW"))
        conv = functools.partial(lax.conv_general_dilated, window_strides=(1, 1, 1),
                                 dimension_numbers=dn, precision=lax.Precision.HIGHEST)
        gx = jnp.abs(conv(pad, kx, padding=[(0, 0), (1, 1), (1, 1)]))
        gy = jnp.abs(conv(pad, ky, padding=[(0, 0), (1, 1), (1, 1)]))
        gz = jnp.abs(conv(pad, kz, padding=[(1, 1), (1, 1), (1, 1)]))
        return (gx + gy + gz) / 3.0

    gp, gt = grad(p), grad(t)
    return jnp.mean((gp - gt) ** 2)


if __name__ == "__main__":
    key = jax.random.PRNGKey(0)
    k1, k2 = jax.random.split(key)
    # Small shapes consistent with the module: binary-seg logits + label volume.
    pred = jax.random.normal(k1, (2, 2, 8, 8, 8), dtype=jnp.float32)
    target = jax.random.normal(k2, (2, 8, 8, 8), dtype=jnp.float32)  # >0 gives a mixed mask

    loss = jax.block_until_ready(boundary_loss(pred, target))
    ref = jax.block_until_ready(_reference_loss(pred, target))
    np.testing.assert_allclose(np.asarray(loss), np.asarray(ref), rtol=1e-4, atol=1e-5)
    print("KERNEL_OK")
</pallas_src>

<mosaic_0001>
module attributes {stable_mosaic.version = 11 : i64} {
  func.func @_boundary_kernel(%arg0: i32, %arg1: i32, %arg2: memref<2x8x8x8xf32, #tpu.memory_space<any>>, %arg3: memref<2x8x8x8xi8, #tpu.memory_space<any>>, %arg4: memref<1x1x1xf32, #tpu.memory_space<vmem>>, %arg5: memref<12x12x128xf32, #tpu.memory_space<vmem>>, %arg6: memref<12x12x128xf32, #tpu.memory_space<vmem>>, %arg7: memref<8x8x8xf32, #tpu.memory_space<vmem>>, %arg8: memref<8x8x8xi8, #tpu.memory_space<vmem>>, %arg9: memref<2x!tpu.dma_semaphore, #tpu.memory_space<semaphore_mem>>) attributes {dimension_semantics = [#tpu.dimension_semantics<parallel>, #tpu.dimension_semantics<arbitrary>], iteration_bounds = array<i64: 2, 2>, scalar_prefetch = 0 : i64, scratch_operands = 5 : i64, tpu.core_type = #tpu.core_type<tc>, window_params = [{}, {}, {transform_indices = @transform_2, window_bounds = array<i64: 1, 1, 1>}]} {
    %c0_i32 = arith.constant 0 : i32
    %0 = arith.cmpi eq, %arg1, %c0_i32 : i32
    %1 = arith.extui %0 : i1 to i32
    %c0_i32_0 = arith.constant 0 : i32
    %2 = arith.cmpi ne, %1, %c0_i32_0 : i32
    scf.if %2 {
      %c0_i32_76 = arith.constant 0 : i32
      %c0_i32_77 = arith.constant 0 : i32
      %c0_i32_78 = arith.constant 0 : i32
      %c0_i32_79 = arith.constant 0 : i32
      %141 = tpu.memref_slice %arg2[%arg0, %c0_i32_77, %c0_i32_78, %c0_i32_79] : memref<2x8x8x8xf32, #tpu.memory_space<any>> -> memref<1x8x8x8xf32, #tpu.memory_space<any>>
      %142 = tpu.memref_squeeze %141 : memref<1x8x8x8xf32, #tpu.memory_space<any>> -> memref<8x8x8xf32, #tpu.memory_space<any>>
      %143 = tpu.memref_slice %arg9[%c0_i32_76] : memref<2x!tpu.dma_semaphore, #tpu.memory_space<semaphore_mem>> -> memref<1x!tpu.dma_semaphore, #tpu.memory_space<semaphore_mem>>
      %144 = tpu.memref_squeeze %143 : memref<1x!tpu.dma_semaphore, #tpu.memory_space<semaphore_mem>> -> memref<!tpu.dma_semaphore, #tpu.memory_space<semaphore_mem>>
      tpu.enqueue_dma source(%142 : memref<8x8x8xf32, #tpu.memory_space<any>>) target(%arg7 : memref<8x8x8xf32, #tpu.memory_space<vmem>>) target_semaphore(%144 : memref<!tpu.dma_semaphore, #tpu.memory_space<semaphore_mem>>)
      %c1_i32_80 = arith.constant 1 : i32
      %c0_i32_81 = arith.constant 0 : i32
      %c0_i32_82 = arith.constant 0 : i32
      %c0_i32_83 = arith.constant 0 : i32
      %145 = tpu.memref_slice %arg3[%arg0, %c0_i32_81, %c0_i32_82, %c0_i32_83] : memref<2x8x8x8xi8, #tpu.memory_space<any>> -> memref<1x8x8x8xi8, #tpu.memory_space<any>>
      %146 = tpu.memref_squeeze %145 : memref<1x8x8x8xi8, #tpu.memory_space<any>> -> memref<8x8x8xi8, #tpu.memory_space<any>>
      %147 = tpu.memref_slice %arg9[%c1_i32_80] : memref<2x!tpu.dma_semaphore, #tpu.memory_space<semaphore_mem>> -> memref<1x!tpu.dma_semaphore, #tpu.memory_space<semaphore_mem>>
      %148 = tpu.memref_squeeze %147 : memref<1x!tpu.dma_semaphore, #tpu.memory_space<semaphore_mem>> -> memref<!tpu.dma_semaphore, #tpu.memory_space<semaphore_mem>>
      tpu.enqueue_dma source(%146 : memref<8x8x8xi8, #tpu.memory_space<any>>) target(%arg8 : memref<8x8x8xi8, #tpu.memory_space<vmem>>) target_semaphore(%148 : memref<!tpu.dma_semaphore, #tpu.memory_space<semaphore_mem>>)
      %c0_i32_84 = arith.constant 0 : i32
      %c0_i32_85 = arith.constant 0 : i32
      %c0_i32_86 = arith.constant 0 : i32
      %c0_i32_87 = arith.constant 0 : i32
      %149 = tpu.memref_slice %arg2[%arg0, %c0_i32_85, %c0_i32_86, %c0_i32_87] : memref<2x8x8x8xf32, #tpu.memory_space<any>> -> memref<1x8x8x8xf32, #tpu.memory_space<any>>
      %150 = tpu.memref_squeeze %149 : memref<1x8x8x8xf32, #tpu.memory_space<any>> -> memref<8x8x8xf32, #tpu.memory_space<any>>
      %151 = tpu.memref_slice %arg9[%c0_i32_84] : memref<2x!tpu.dma_semaphore, #tpu.memory_space<semaphore_mem>> -> memref<1x!tpu.dma_semaphore, #tpu.memory_space<semaphore_mem>>
      %152 = tpu.memref_squeeze %151 : memref<1x!tpu.dma_semaphore, #tpu.memory_space<semaphore_mem>> -> memref<!tpu.dma_semaphore, #tpu.memory_space<semaphore_mem>>
      tpu.wait_dma2 semaphore(%152 : memref<!tpu.dma_semaphore, #tpu.memory_space<semaphore_mem>>) src(%150 : memref<8x8x8xf32, #tpu.memory_space<any>>) dst(%arg7 : memref<8x8x8xf32, #tpu.memory_space<vmem>>)
      %c0_88 = arith.constant 0 : index
      %c0_89 = arith.constant 0 : index
      %c0_90 = arith.constant 0 : index
      %153 = vector.load %arg7[%c0_88, %c0_89, %c0_90] : memref<8x8x8xf32, #tpu.memory_space<vmem>>, vector<8x8x8xf32>
      %cst_91 = arith.constant 0.000000e+00 : f32
      %154 = vector.broadcast %cst_91 : f32 to vector<1x12x128xf32>
      %c0_92 = arith.constant 0 : index
      %c0_93 = arith.constant 0 : index
      %c0_94 = arith.constant 0 : index
      %155 = vector.load %arg5[%c0_92, %c0_93, %c0_94] : memref<12x12x128xf32, #tpu.memory_space<vmem>>, vector<1x12x128xf32>
      tpu.vector_store %arg5[%c0_92, %c0_93, %c0_94], %154 {strides = array<i32>} : memref<12x12x128xf32, #tpu.memory_space<vmem>>, vector<1x12x128xf32>,
      %cst_95 = arith.constant 0.000000e+00 : f32
      %156 = vector.broadcast %cst_95 : f32 to vector<1x12x128xf32>
      %c11 = arith.constant 11 : index
      %c0_96 = arith.constant 0 : index
      %c0_97 = arith.constant 0 : index
      %157 = vector.load %arg5[%c11, %c0_96, %c0_97] : memref<12x12x128xf32, #tpu.memory_space<vmem>>, vector<1x12x128xf32>
      tpu.vector_store %arg5[%c11, %c0_96, %c0_97], %156 {strides = array<i32>} : memref<12x12x128xf32, #tpu.memory_space<vmem>>, vector<1x12x128xf32>,
      %cst_98 = arith.constant 0.000000e+00 : f32
      %158 = vector.broadcast %cst_98 : f32 to vector<10x1x128xf32>
      %c1_99 = arith.constant 1 : index
      %c0_100 = arith.constant 0 : index
      %c0_101 = arith.constant 0 : index
      %159 = vector.load %arg5[%c1_99, %c0_100, %c0_101] : memref<12x12x128xf32, #tpu.memory_space<vmem>>, vector<10x1x128xf32>
      tpu.vector_store %arg5[%c1_99, %c0_100, %c0_101], %158 {strides = array<i32>} : memref<12x12x128xf32, #tpu.memory_space<vmem>>, vector<10x1x128xf32>,
      %cst_102 = arith.constant 0.000000e+00 : f32
      %160 = vector.broadcast %cst_102 : f32 to vector<10x1x128xf32>
      %c1_103 = arith.constant 1 : index
      %c11_104 = arith.constant 11 : index
      %c0_105 = arith.constant 0 : index
      %161 = vector.load %arg5[%c1_103, %c11_104, %c0_105] : memref<12x12x128xf32, #tpu.memory_space<vmem>>, vector<10x1x128xf32>
      tpu.vector_store %arg5[%c1_103, %c11_104, %c0_105], %160 {strides = array<i32>} : memref<12x12x128xf32, #tpu.memory_space<vmem>>, vector<10x1x128xf32>,
      %cst_106 = arith.constant 0.000000e+00 : f32
      %162 = vector.broadcast %cst_106 : f32 to vector<10x12x1xf32>
      %c1_107 = arith.constant 1 : index
      %c0_108 = arith.constant 0 : index
      %c0_109 = arith.constant 0 : index
      %163 = vector.load %arg5[%c1_107, %c0_108, %c0_109] : memref<12x12x128xf32, #tpu.memory_space<vmem>>, vector<10x12x1xf32>
      tpu.vector_store %arg5[%c1_107, %c0_108, %c0_109], %162 {strides = array<i32>} : memref<12x12x128xf32, #tpu.memory_space<vmem>>, vector<10x12x1xf32>,
      %cst_110 = arith.constant 0.000000e+00 : f32
      %164 = vector.broadcast %cst_110 : f32 to vector<10x12x1xf32>
      %c1_111 = arith.constant 1 : index
      %c0_112 = arith.constant 0 : index
      %c11_113 = arith.constant 11 : index
      %165 = vector.load %arg5[%c1_111, %c0_112, %c11_113] : memref<12x12x128xf32, #tpu.memory_space<vmem>>, vector<10x12x1xf32>
      tpu.vector_store %arg5[%c1_111, %c0_112, %c11_113], %164 {strides = array<i32>} : memref<12x12x128xf32, #tpu.memory_space<vmem>>, vector<10x12x1xf32>,
      %c2_114 = arith.constant 2 : index
      %c2_115 = arith.constant 2 : index
      %c2_116 = arith.constant 2 : index
      %166 = vector.load %arg5[%c2_114, %c2_115, %c2_116] : memref<12x12x128xf32, #tpu.memory_space<vmem>>, vector<8x8x8xf32>
      tpu.vector_store %arg5[%c2_114, %c2_115, %c2_116], %153 {strides = array<i32>} : memref<12x12x128xf32, #tpu.memory_space<vmem>>, vector<8x8x8xf32>,
      %167 = vector.extract_strided_slice %153 {offsets = [0, 0, 1], sizes = [8, 8, 1], strides = [1, 1, 1]} : vector<8x8x8xf32> to vector<8x8x1xf32>
      %c2_117 = arith.constant 2 : index
      %c2_118 = arith.constant 2 : index
      %c1_119 = arith.constant 1 : index
      %168 = vector.load %arg5[%c2_117, %c2_118, %c1_119] : memref<12x12x128xf32, #tpu.memory_space<vmem>>, vector<8x8x1xf32>
      tpu.vector_store %arg5[%c2_117, %c2_118, %c1_119], %167 {strides = array<i32>} : memref<12x12x128xf32, #tpu.memory_space<vmem>>, vector<8x8x1xf32>,
      %169 = vector.extract_strided_slice %153 {offsets = [0, 0, 6], sizes = [8, 8, 1], strides = [1, 1, 1]} : vector<8x8x8xf32> to vector<8x8x1xf32>
      %c2_120 = arith.constant 2 : index
      %c2_121 = arith.constant 2 : index
      %c10 = arith.constant 10 : index
      %170 = vector.load %arg5[%c2_120, %c2_121, %c10] : memref<12x12x128xf32, #tpu.memory_space<vmem>>, vector<8x8x1xf32>
      tpu.vector_store %arg5[%c2_120, %c2_121, %c10], %169 {strides = array<i32>} : memref<12x12x128xf32, #tpu.memory_space<vmem>>, vector<8x8x1xf32>,
      %c2_122 = arith.constant 2 : index
      %c3 = arith.constant 3 : index
      %c1_123 = arith.constant 1 : index
      %171 = vector.load %arg5[%c2_122, %c3, %c1_123] : memref<12x12x128xf32, #tpu.memory_space<vmem>>, vector<8x1x10xf32>
      %c2_124 = arith.constant 2 : index
      %c1_125 = arith.constant 1 : index
      %c1_126 = arith.constant 1 : index
      %172 = vector.load %arg5[%c2_124, %c1_125, %c1_126] : memref<12x12x128xf32, #tpu.memory_space<vmem>>, vector<8x1x10xf32>
      tpu.vector_store %arg5[%c2_124, %c1_125, %c1_126], %171 {strides = array<i32>} : memref<12x12x128xf32, #tpu.memory_space<vmem>>, vector<8x1x10xf32>,
      %c2_127 = arith.constant 2 : index
      %c8 = arith.constant 8 : index
      %c1_128 = arith.constant 1 : index
      %173 = vector.load %arg5[%c2_127, %c8, %c1_128] : memref<12x12x128xf32, #tpu.memory_space<vmem>>, vector<8x1x10xf32>
      %c2_129 = arith.constant 2 : index
      %c10_130 = arith.constant 10 : index
      %c1_131 = arith.constant 1 : index
      %174 = vector.load %arg5[%c2_129, %c10_130, %c1_131] : memref<12x12x128xf32, #tpu.memory_space<vmem>>, vector<8x1x10xf32>
      tpu.vector_store %arg5[%c2_129, %c10_130, %c1_131], %173 {strides = array<i32>} : memref<12x12x128xf32, #tpu.memory_space<vmem>>, vector<8x1x10xf32>,
      %c3_132 = arith.constant 3 : index
      %c1_133 = arith.constant 1 : index
      %c1_134 = arith.constant 1 : index
      %175 = vector.load %arg5[%c3_132, %c1_133, %c1_134] : memref<12x12x128xf32, #tpu.memory_space<vmem>>, vector<1x10x10xf32>
      %c1_135 = arith.constant 1 : index
      %c1_136 = arith.constant 1 : index
      %c1_137 = arith.constant 1 : index
      %176 = vector.load %arg5[%c1_135, %c1_136, %c1_137] : memref<12x12x128xf32, #tpu.memory_space<vmem>>, vector<1x10x10xf32>
      tpu.vector_store %arg5[%c1_135, %c1_136, %c1_137], %175 {strides = array<i32>} : memref<12x12x128xf32, #tpu.memory_space<vmem>>, vector<1x10x10xf32>,
      %c8_138 = arith.constant 8 : index
      %c1_139 = arith.constant 1 : index
      %c1_140 = arith.constant 1 : index
      %177 = vector.load %arg5[%c8_138, %c1_139, %c1_140] : memref<12x12x128xf32, #tpu.memory_space<vmem>>, vector<1x10x10xf32>
      %c10_141 = arith.constant 10 : index
      %c1_142 = arith.constant 1 : index
      %c1_143 = arith.constant 1 : index
      %178 = vector.load %arg5[%c10_141, %c1_142, %c1_143] : memref<12x12x128xf32, #tpu.memory_space<vmem>>, vector<1x10x10xf32>
      tpu.vector_store %arg5[%c10_141, %c1_142, %c1_143], %177 {strides = array<i32>} : memref<12x12x128xf32, #tpu.memory_space<vmem>>, vector<1x10x10xf32>,
      %c1_i32_144 = arith.constant 1 : i32
      %c0_i32_145 = arith.constant 0 : i32
      %c0_i32_146 = arith.constant 0 : i32
      %c0_i32_147 = arith.constant 0 : i32
      %179 = tpu.memref_slice %arg3[%arg0, %c0_i32_145, %c0_i32_146, %c0_i32_147] : memref<2x8x8x8xi8, #tpu.memory_space<any>> -> memref<1x8x8x8xi8, #tpu.memory_space<any>>
      %180 = tpu.memref_squeeze %179 : memref<1x8x8x8xi8, #tpu.memory_space<any>> -> memref<8x8x8xi8, #tpu.memory_space<any>>
      %181 = tpu.memref_slice %arg9[%c1_i32_144] : memref<2x!tpu.dma_semaphore, #tpu.memory_space<semaphore_mem>> -> memref<1x!tpu.dma_semaphore, #tpu.memory_space<semaphore_mem>>
      %182 = tpu.memref_squeeze %181 : memref<1x!tpu.dma_semaphore, #tpu.memory_space<semaphore_mem>> -> memref<!tpu.dma_semaphore, #tpu.memory_space<semaphore_mem>>
      tpu.wait_dma2 semaphore(%182 : memref<!tpu.dma_semaphore, #tpu.memory_space<semaphore_mem>>) src(%180 : memref<8x8x8xi8, #tpu.memory_space<any>>) dst(%arg8 : memref<8x8x8xi8, #tpu.memory_space<vmem>>)
      %c0_148 = arith.constant 0 : index
      %c0_149 = arith.constant 0 : index
      %c0_150 = arith.constant 0 : index
      %183 = vector.load %arg8[%c0_148, %c0_149, %c0_150] : memref<8x8x8xi8, #tpu.memory_space<vmem>>, vector<8x8x8xi8>
      %184 = arith.sitofp %183 : vector<8x8x8xi8> to vector<8x8x8xf32>
      %cst_151 = arith.constant 0.000000e+00 : f32
      %185 = vector.broadcast %cst_151 : f32 to vector<1x12x128xf32>
      %c0_152 = arith.constant 0 : index
      %c0_153 = arith.constant 0 : index
      %c0_154 = arith.constant 0 : index
      %186 = vector.load %arg6[%c0_152, %c0_153, %c0_154] : memref<12x12x128xf32, #tpu.memory_space<vmem>>, vector<1x12x128xf32>
      tpu.vector_store %arg6[%c0_152, %c0_153, %c0_154], %185 {strides = array<i32>} : memref<12x12x128xf32, #tpu.memory_space<vmem>>, vector<1x12x128xf32>,
      %cst_155 = arith.constant 0.000000e+00 : f32
      %187 = vector.broadcast %cst_155 : f32 to vector<1x12x128xf32>
      %c11_156 = arith.constant 11 : index
      %c0_157 = arith.constant 0 : index
      %c0_158 = arith.constant 0 : index
      %188 = vector.load %arg6[%c11_156, %c0_157, %c0_158] : memref<12x12x128xf32, #tpu.memory_space<vmem>>, vector<1x12x128xf32>
      tpu.vector_store %arg6[%c11_156, %c0_157, %c0_158], %187 {strides = array<i32>} : memref<12x12x128xf32, #tpu.memory_space<vmem>>, vector<1x12x128xf32>,
      %cst_159 = arith.constant 0.000000e+00 : f32
      %189 = vector.broadcast %cst_159 : f32 to vector<10x1x128xf32>
      %c1_160 = arith.constant 1 : index
      %c0_161 = arith.constant 0 : index
      %c0_162 = arith.constant 0 : index
      %190 = vector.load %arg6[%c1_160, %c0_161, %c0_162] : memref<12x12x128xf32, #tpu.memory_space<vmem>>, vector<10x1x128xf32>
      tpu.vector_store %arg6[%c1_160, %c0_161, %c0_162], %189 {strides = array<i32>} : memref<12x12x128xf32, #tpu.memory_space<vmem>>, vector<10x1x128xf32>,
      %cst_163 = arith.constant 0.000000e+00 : f32
      %191 = vector.broadcast %cst_163 : f32 to vector<10x1x128xf32>
      %c1_164 = arith.constant 1 : index
      %c11_165 = arith.constant 11 : index
      %c0_166 = arith.constant 0 : index
      %192 = vector.load %arg6[%c1_164, %c11_165, %c0_166] : memref<12x12x128xf32, #tpu.memory_space<vmem>>, vector<10x1x128xf32>
      tpu.vector_store %arg6[%c1_164, %c11_165, %c0_166], %191 {strides = array<i32>} : memref<12x12x128xf32, #tpu.memory_space<vmem>>, vector<10x1x128xf32>,
      %cst_167 = arith.constant 0.000000e+00 : f32
      %193 = vector.broadcast %cst_167 : f32 to vector<10x12x1xf32>
      %c1_168 = arith.constant 1 : index
      %c0_169 = arith.constant 0 : index
      %c0_170 = arith.constant 0 : index
      %194 = vector.load %arg6[%c1_168, %c0_169, %c0_170] : memref<12x12x128xf32, #tpu.memory_space<vmem>>, vector<10x12x1xf32>
      tpu.vector_store %arg6[%c1_168, %c0_169, %c0_170], %193 {strides = array<i32>} : memref<12x12x128xf32, #tpu.memory_space<vmem>>, vector<10x12x1xf32>,
      %cst_171 = arith.constant 0.000000e+00 : f32
      %195 = vector.broadcast %cst_171 : f32 to vector<10x12x1xf32>
      %c1_172 = arith.constant 1 : index
      %c0_173 = arith.constant 0 : index
      %c11_174 = arith.constant 11 : index
      %196 = vector.load %arg6[%c1_172, %c0_173, %c11_174] : memref<12x12x128xf32, #tpu.memory_space<vmem>>, vector<10x12x1xf32>
      tpu.vector_store %arg6[%c1_172, %c0_173, %c11_174], %195 {strides = array<i32>} : memref<12x12x128xf32, #tpu.memory_space<vmem>>, vector<10x12x1xf32>,
      %c2_175 = arith.constant 2 : index
      %c2_176 = arith.constant 2 : index
      %c2_177 = arith.constant 2 : index
      %197 = vector.load %arg6[%c2_175, %c2_176, %c2_177] : memref<12x12x128xf32, #tpu.memory_space<vmem>>, vector<8x8x8xf32>
      tpu.vector_store %arg6[%c2_175, %c2_176, %c2_177], %184 {strides = array<i32>} : memref<12x12x128xf32, #tpu.memory_space<vmem>>, vector<8x8x8xf32>,
      %198 = vector.extract_strided_slice %184 {offsets = [0, 0, 1], sizes = [8, 8, 1], strides = [1, 1, 1]} : vector<8x8x8xf32> to vector<8x8x1xf32>
      %c2_178 = arith.constant 2 : index
      %c2_179 = arith.constant 2 : index
      %c1_180 = arith.constant 1 : index
      %199 = vector.load %arg6[%c2_178, %c2_179, %c1_180] : memref<12x12x128xf32, #tpu.memory_space<vmem>>, vector<8x8x1xf32>
      tpu.vector_store %arg6[%c2_178, %c2_179, %c1_180], %198 {strides = array<i32>} : memref<12x12x128xf32, #tpu.memory_space<vmem>>, vector<8x8x1xf32>,
      %200 = vector.extract_strided_slice %184 {offsets = [0, 0, 6], sizes = [8, 8, 1], strides = [1, 1, 1]} : vector<8x8x8xf32> to vector<8x8x1xf32>
      %c2_181 = arith.constant 2 : index
      %c2_182 = arith.constant 2 : index
      %c10_183 = arith.constant 10 : index
      %201 = vector.load %arg6[%c2_181, %c2_182, %c10_183] : memref<12x12x128xf32, #tpu.memory_space<vmem>>, vector<8x8x1xf32>
      tpu.vector_store %arg6[%c2_181, %c2_182, %c10_183], %200 {strides = array<i32>} : memref<12x12x128xf32, #tpu.memory_space<vmem>>, vector<8x8x1xf32>,
      %c2_184 = arith.constant 2 : index
      %c3_185 = arith.constant 3 : index
      %c1_186 = arith.constant 1 : index
      %202 = vector.load %arg6[%c2_184, %c3_185, %c1_186] : memref<12x12x128xf32, #tpu.memory_space<vmem>>, vector<8x1x10xf32>
      %c2_187 = arith.constant 2 : index
      %c1_188 = arith.constant 1 : index
      %c1_189 = arith.constant 1 : index
      %203 = vector.load %arg6[%c2_187, %c1_188, %c1_189] : memref<12x12x128xf32, #tpu.memory_space<vmem>>, vector<8x1x10xf32>
      tpu.vector_store %arg6[%c2_187, %c1_188, %c1_189], %202 {strides = array<i32>} : memref<12x12x128xf32, #tpu.memory_space<vmem>>, vector<8x1x10xf32>,
      %c2_190 = arith.constant 2 : index
      %c8_191 = arith.constant 8 : index
      %c1_192 = arith.constant 1 : index
      %204 = vector.load %arg6[%c2_190, %c8_191, %c1_192] : memref<12x12x128xf32, #tpu.memory_space<vmem>>, vector<8x1x10xf32>
      %c2_193 = arith.constant 2 : index
      %c10_194 = arith.constant 10 : index
      %c1_195 = arith.constant 1 : index
      %205 = vector.load %arg6[%c2_193, %c10_194, %c1_195] : memref<12x12x128xf32, #tpu.memory_space<vmem>>, vector<8x1x10xf32>
      tpu.vector_store %arg6[%c2_193, %c10_194, %c1_195], %204 {strides = array<i32>} : memref<12x12x128xf32, #tpu.memory_space<vmem>>, vector<8x1x10xf32>,
      %c3_196 = arith.constant 3 : index
      %c1_197 = arith.constant 1 : index
      %c1_198 = arith.constant 1 : index
      %206 = vector.load %arg6[%c3_196, %c1_197, %c1_198] : memref<12x12x128xf32, #tpu.memory_space<vmem>>, vector<1x10x10xf32>
      %c1_199 = arith.constant 1 : index
      %c1_200 = arith.constant 1 : index
      %c1_201 = arith.constant 1 : index
      %207 = vector.load %arg6[%c1_199, %c1_200, %c1_201] : memref<12x12x128xf32, #tpu.memory_space<vmem>>, vector<1x10x10xf32>
      tpu.vector_store %arg6[%c1_199, %c1_200, %c1_201], %206 {strides = array<i32>} : memref<12x12x128xf32, #tpu.memory_space<vmem>>, vector<1x10x10xf32>,
      %c8_202 = arith.constant 8 : index
      %c1_203 = arith.constant 1 : index
      %c1_204 = arith.constant 1 : index
      %208 = vector.load %arg6[%c8_202, %c1_203, %c1_204] : memref<12x12x128xf32, #tpu.memory_space<vmem>>, vector<1x10x10xf32>
      %c10_205 = arith.constant 10 : index
      %c1_206 = arith.constant 1 : index
      %c1_207 = arith.constant 1 : index
      %209 = vector.load %arg6[%c10_205, %c1_206, %c1_207] : memref<12x12x128xf32, #tpu.memory_space<vmem>>, vector<1x10x10xf32>
      tpu.vector_store %arg6[%c10_205, %c1_206, %c1_207], %208 {strides = array<i32>} : memref<12x12x128xf32, #tpu.memory_space<vmem>>, vector<1x10x10xf32>,
      %cst_208 = arith.constant 0.000000e+00 : f32
      %210 = vector.broadcast %cst_208 : f32 to vector<1x1x1xf32>
      %c0_209 = arith.constant 0 : index
      %c0_210 = arith.constant 0 : index
      %c0_211 = arith.constant 0 : index
      %211 = vector.load %arg4[%c0_209, %c0_210, %c0_211] : memref<1x1x1xf32, #tpu.memory_space<vmem>>, vector<1x1x1xf32>
      tpu.vector_store %arg4[%c0_209, %c0_210, %c0_211], %210 {strides = array<i32>} : memref<1x1x1xf32, #tpu.memory_space<vmem>>, vector<1x1x1xf32>,
    } else {
    }
    %c5_i32 = arith.constant 5 : i32
    %3 = arith.muli %arg1, %c5_i32 : i32
    %4 = tpu.assume_multiple %3, 5 : i32
    %c1_i32 = arith.constant 1 : i32
    %5 = arith.addi %4, %c1_i32 : i32
    %6 = arith.index_cast %5 : i32 to index
    %c0 = arith.constant 0 : index
    %c0_1 = arith.constant 0 : index
    %7 = vector.load %arg5[%6, %c0, %c0_1] : memref<12x12x128xf32, #tpu.memory_space<vmem>>, vector<5x10x10xf32>
    %c1_i32_2 = arith.constant 1 : i32
    %8 = arith.addi %4, %c1_i32_2 : i32
    %9 = arith.index_cast %8 : i32 to index
    %c0_3 = arith.constant 0 : index
    %c1 = arith.constant 1 : index
    %10 = vector.load %arg5[%9, %c0_3, %c1] : memref<12x12x128xf32, #tpu.memory_space<vmem>>, vector<5x10x10xf32>
    %c1_i32_4 = arith.constant 1 : i32
    %11 = arith.addi %4, %c1_i32_4 : i32
    %12 = arith.index_cast %11 : i32 to index
    %c0_5 = arith.constant 0 : index
    %c2 = arith.constant 2 : index
    %13 = vector.load %arg5[%12, %c0_5, %c2] : memref<12x12x128xf32, #tpu.memory_space<vmem>>, vector<5x10x10xf32>
    %c1_i32_6 = arith.constant 1 : i32
    %14 = arith.addi %4, %c1_i32_6 : i32
    %15 = arith.index_cast %14 : i32 to index
    %c1_7 = arith.constant 1 : index
    %c0_8 = arith.constant 0 : index
    %16 = vector.load %arg5[%15, %c1_7, %c0_8] : memref<12x12x128xf32, #tpu.memory_space<vmem>>, vector<5x10x10xf32>
    %c1_i32_9 = arith.constant 1 : i32
    %17 = arith.addi %4, %c1_i32_9 : i32
    %18 = arith.index_cast %17 : i32 to index
    %c1_10 = arith.constant 1 : index
    %c1_11 = arith.constant 1 : index
    %19 = vector.load %arg5[%18, %c1_10, %c1_11] : memref<12x12x128xf32, #tpu.memory_space<vmem>>, vector<5x10x10xf32>
    %c1_i32_12 = arith.constant 1 : i32
    %20 = arith.addi %4, %c1_i32_12 : i32
    %21 = arith.index_cast %20 : i32 to index
    %c1_13 = arith.constant 1 : index
    %c2_14 = arith.constant 2 : index
    %22 = vector.load %arg5[%21, %c1_13, %c2_14] : memref<12x12x128xf32, #tpu.memory_space<vmem>>, vector<5x10x10xf32>
    %c1_i32_15 = arith.constant 1 : i32
    %23 = arith.addi %4, %c1_i32_15 : i32
    %24 = arith.index_cast %23 : i32 to index
    %c2_16 = arith.constant 2 : index
    %c0_17 = arith.constant 0 : index
    %25 = vector.load %arg5[%24, %c2_16, %c0_17] : memref<12x12x128xf32, #tpu.memory_space<vmem>>, vector<5x10x10xf32>
    %c1_i32_18 = arith.constant 1 : i32
    %26 = arith.addi %4, %c1_i32_18 : i32
    %27 = arith.index_cast %26 : i32 to index
    %c2_19 = arith.constant 2 : index
    %c1_20 = arith.constant 1 : index
    %28 = vector.load %arg5[%27, %c2_19, %c1_20] : memref<12x12x128xf32, #tpu.memory_space<vmem>>, vector<5x10x10xf32>
    %c1_i32_21 = arith.constant 1 : i32
    %29 = arith.addi %4, %c1_i32_21 : i32
    %30 = arith.index_cast %29 : i32 to index
    %c2_22 = arith.constant 2 : index
    %c2_23 = arith.constant 2 : index
    %31 = vector.load %arg5[%30, %c2_22, %c2_23] : memref<12x12x128xf32, #tpu.memory_space<vmem>>, vector<5x10x10xf32>
    %32 = arith.index_cast %4 : i32 to index
    %c1_24 = arith.constant 1 : index
    %c1_25 = arith.constant 1 : index
    %33 = vector.load %arg5[%32, %c1_24, %c1_25] : memref<12x12x128xf32, #tpu.memory_space<vmem>>, vector<5x10x10xf32>
    %c2_i32 = arith.constant 2 : i32
    %34 = arith.addi %4, %c2_i32 : i32
    %35 = arith.index_cast %34 : i32 to index
    %c1_26 = arith.constant 1 : index
    %c1_27 = arith.constant 1 : index
    %36 = vector.load %arg5[%35, %c1_26, %c1_27] : memref<12x12x128xf32, #tpu.memory_space<vmem>>, vector<5x10x10xf32>
    %37 = arith.subf %7, %13 : vector<5x10x10xf32>
    %38 = arith.subf %16, %22 : vector<5x10x10xf32>
    %cst = arith.constant 2.000000e+00 : f32
    %39 = vector.broadcast %cst : f32 to vector<5x10x10xf32>
    %40 = arith.mulf %39, %38 : vector<5x10x10xf32>
    %41 = arith.addf %37, %40 : vector<5x10x10xf32>
    %42 = arith.subf %25, %31 : vector<5x10x10xf32>
    %43 = arith.addf %41, %42 : vector<5x10x10xf32>
    %cst_28 = arith.constant 2.000000e+00 : f32
    %44 = vector.broadcast %cst_28 : f32 to vector<5x10x10xf32>
    %45 = arith.mulf %44, %10 : vector<5x10x10xf32>
    %46 = arith.addf %7, %45 : vector<5x10x10xf32>
    %47 = arith.addf %46, %13 : vector<5x10x10xf32>
    %cst_29 = arith.constant 2.000000e+00 : f32
    %48 = vector.broadcast %cst_29 : f32 to vector<5x10x10xf32>
    %49 = arith.mulf %48, %28 : vector<5x10x10xf32>
    %50 = arith.addf %25, %49 : vector<5x10x10xf32>
    %51 = arith.addf %50, %31 : vector<5x10x10xf32>
    %52 = arith.subf %47, %51 : vector<5x10x10xf32>
    %53 = arith.addf %10, %16 : vector<5x10x10xf32>
    %cst_30 = arith.constant 2.000000e+00 : f32
    %54 = vector.broadcast %cst_30 : f32 to vector<5x10x10xf32>
    %55 = arith.mulf %54, %19 : vector<5x10x10xf32>
    %56 = arith.addf %53, %55 : vector<5x10x10xf32>
    %57 = arith.addf %56, %22 : vector<5x10x10xf32>
    %58 = arith.addf %57, %28 : vector<5x10x10xf32>
    %59 = arith.addf %58, %33 : vector<5x10x10xf32>
    %60 = arith.subf %59, %36 : vector<5x10x10xf32>
    %61 = math.absf %43 : vector<5x10x10xf32>
    %62 = math.absf %52 : vector<5x10x10xf32>
    %63 = arith.addf %61, %62 : vector<5x10x10xf32>
    %64 = math.absf %60 : vector<5x10x10xf32>
    %65 = arith.addf %63, %64 : vector<5x10x10xf32>
    %cst_31 = arith.constant 0.333333343 : f32
    %66 = vector.broadcast %cst_31 : f32 to vector<5x10x10xf32>
    %67 = arith.mulf %65, %66 : vector<5x10x10xf32>
    %c1_i32_32 = arith.constant 1 : i32
    %68 = arith.addi %4, %c1_i32_32 : i32
    %69 = arith.index_cast %68 : i32 to index
    %c0_33 = arith.constant 0 : index
    %c0_34 = arith.constant 0 : index
    %70 = vector.load %arg6[%69, %c0_33, %c0_34] : memref<12x12x128xf32, #tpu.memory_space<vmem>>, vector<5x10x10xf32>
    %c1_i32_35 = arith.constant 1 : i32
    %71 = arith.addi %4, %c1_i32_35 : i32
    %72 = arith.index_cast %71 : i32 to index
    %c0_36 = arith.constant 0 : index
    %c1_37 = arith.constant 1 : index
    %73 = vector.load %arg6[%72, %c0_36, %c1_37] : memref<12x12x128xf32, #tpu.memory_space<vmem>>, vector<5x10x10xf32>
    %c1_i32_38 = arith.constant 1 : i32
    %74 = arith.addi %4, %c1_i32_38 : i32
    %75 = arith.index_cast %74 : i32 to index
    %c0_39 = arith.constant 0 : index
    %c2_40 = arith.constant 2 : index
    %76 = vector.load %arg6[%75, %c0_39, %c2_40] : memref<12x12x128xf32, #tpu.memory_space<vmem>>, vector<5x10x10xf32>
    %c1_i32_41 = arith.constant 1 : i32
    %77 = arith.addi %4, %c1_i32_41 : i32
    %78 = arith.index_cast %77 : i32 to index
    %c1_42 = arith.constant 1 : index
    %c0_43 = arith.constant 0 : index
    %79 = vector.load %arg6[%78, %c1_42, %c0_43] : memref<12x12x128xf32, #tpu.memory_space<vmem>>, vector<5x10x10xf32>
    %c1_i32_44 = arith.constant 1 : i32
    %80 = arith.addi %4, %c1_i32_44 : i32
    %81 = arith.index_cast %80 : i32 to index
    %c1_45 = arith.constant 1 : index
    %c1_46 = arith.constant 1 : index
    %82 = vector.load %arg6[%81, %c1_45, %c1_46] : memref<12x12x128xf32, #tpu.memory_space<vmem>>, vector<5x10x10xf32>
    %c1_i32_47 = arith.constant 1 : i32
    %83 = arith.addi %4, %c1_i32_47 : i32
    %84 = arith.index_cast %83 : i32 to index
    %c1_48 = arith.constant 1 : index
    %c2_49 = arith.constant 2 : index
    %85 = vector.load %arg6[%84, %c1_48, %c2_49] : memref<12x12x128xf32, #tpu.memory_space<vmem>>, vector<5x10x10xf32>
    %c1_i32_50 = arith.constant 1 : i32
    %86 = arith.addi %4, %c1_i32_50 : i32
    %87 = arith.index_cast %86 : i32 to index
    %c2_51 = arith.constant 2 : index
    %c0_52 = arith.constant 0 : index
    %88 = vector.load %arg6[%87, %c2_51, %c0_52] : memref<12x12x128xf32, #tpu.memory_space<vmem>>, vector<5x10x10xf32>
    %c1_i32_53 = arith.constant 1 : i32
    %89 = arith.addi %4, %c1_i32_53 : i32
    %90 = arith.index_cast %89 : i32 to index
    %c2_54 = arith.constant 2 : index
    %c1_55 = arith.constant 1 : index
    %91 = vector.load %arg6[%90, %c2_54, %c1_55] : memref<12x12x128xf32, #tpu.memory_space<vmem>>, vector<5x10x10xf32>
    %c1_i32_56 = arith.constant 1 : i32
    %92 = arith.addi %4, %c1_i32_56 : i32
    %93 = arith.index_cast %92 : i32 to index
    %c2_57 = arith.constant 2 : index
    %c2_58 = arith.constant 2 : index
    %94 = vector.load %arg6[%93, %c2_57, %c2_58] : memref<12x12x128xf32, #tpu.memory_space<vmem>>, vector<5x10x10xf32>
    %95 = arith.index_cast %4 : i32 to index
    %c1_59 = arith.constant 1 : index
    %c1_60 = arith.constant 1 : index
    %96 = vector.load %arg6[%95, %c1_59, %c1_60] : memref<12x12x128xf32, #tpu.memory_space<vmem>>, vector<5x10x10xf32>
    %c2_i32_61 = arith.constant 2 : i32
    %97 = arith.addi %4, %c2_i32_61 : i32
    %98 = arith.index_cast %97 : i32 to index
    %c1_62 = arith.constant 1 : index
    %c1_63 = arith.constant 1 : index
    %99 = vector.load %arg6[%98, %c1_62, %c1_63] : memref<12x12x128xf32, #tpu.memory_space<vmem>>, vector<5x10x10xf32>
    %100 = arith.subf %70, %76 : vector<5x10x10xf32>
    %101 = arith.subf %79, %85 : vector<5x10x10xf32>
    %cst_64 = arith.constant 2.000000e+00 : f32
    %102 = vector.broadcast %cst_64 : f32 to vector<5x10x10xf32>
    %103 = arith.mulf %102, %101 : vector<5x10x10xf32>
    %104 = arith.addf %100, %103 : vector<5x10x10xf32>
    %105 = arith.subf %88, %94 : vector<5x10x10xf32>
    %106 = arith.addf %104, %105 : vector<5x10x10xf32>
    %cst_65 = arith.constant 2.000000e+00 : f32
    %107 = vector.broadcast %cst_65 : f32 to vector<5x10x10xf32>
    %108 = arith.mulf %107, %73 : vector<5x10x10xf32>
    %109 = arith.addf %70, %108 : vector<5x10x10xf32>
    %110 = arith.addf %109, %76 : vector<5x10x10xf32>
    %cst_66 = arith.constant 2.000000e+00 : f32
    %111 = vector.broadcast %cst_66 : f32 to vector<5x10x10xf32>
    %112 = arith.mulf %111, %91 : vector<5x10x10xf32>
    %113 = arith.addf %88, %112 : vector<5x10x10xf32>
    %114 = arith.addf %113, %94 : vector<5x10x10xf32>
    %115 = arith.subf %110, %114 : vector<5x10x10xf32>
    %116 = arith.addf %73, %79 : vector<5x10x10xf32>
    %cst_67 = arith.constant 2.000000e+00 : f32
    %117 = vector.broadcast %cst_67 : f32 to vector<5x10x10xf32>
    %118 = arith.mulf %117, %82 : vector<5x10x10xf32>
    %119 = arith.addf %116, %118 : vector<5x10x10xf32>
    %120 = arith.addf %119, %85 : vector<5x10x10xf32>
    %121 = arith.addf %120, %91 : vector<5x10x10xf32>
    %122 = arith.addf %121, %96 : vector<5x10x10xf32>
    %123 = arith.subf %122, %99 : vector<5x10x10xf32>
    %124 = math.absf %106 : vector<5x10x10xf32>
    %125 = math.absf %115 : vector<5x10x10xf32>
    %126 = arith.addf %124, %125 : vector<5x10x10xf32>
    %127 = math.absf %123 : vector<5x10x10xf32>
    %128 = arith.addf %126, %127 : vector<5x10x10xf32>
    %cst_68 = arith.constant 0.333333343 : f32
    %129 = vector.broadcast %cst_68 : f32 to vector<5x10x10xf32>
    %130 = arith.mulf %128, %129 : vector<5x10x10xf32>
    %131 = arith.subf %67, %130 : vector<5x10x10xf32>
    %c0_69 = arith.constant 0 : index
    %c0_70 = arith.constant 0 : index
    %c0_71 = arith.constant 0 : index
    %132 = vector.load %arg4[%c0_69, %c0_70, %c0_71] : memref<1x1x1xf32, #tpu.memory_space<vmem>>, vector<1x1x1xf32>
    %133 = arith.mulf %131, %131 : vector<5x10x10xf32>
    %134 = vector.shape_cast %133 : vector<5x10x10xf32> to vector<1x5x10x10xf32>
    %cst_72 = arith.constant dense<0.000000e+00> : vector<1xf32>
    %135 = vector.multi_reduction <add>, %134, %cst_72 [1, 2, 3] : vector<1x5x10x10xf32> to vector<1xf32>
    %136 = vector.shape_cast %135 : vector<1xf32> to vector<1x1x1x1xf32>
    %137 = vector.extract %136[0, 0, 0, 0] : f32 from vector<1x1x1x1xf32>
    %138 = vector.broadcast %137 : f32 to vector<1x1x1xf32>
    %139 = arith.addf %132, %138 : vector<1x1x1xf32>
    %c0_73 = arith.constant 0 : index
    %c0_74 = arith.constant 0 : index
    %c0_75 = arith.constant 0 : index
    %140 = vector.load %arg4[%c0_73, %c0_74, %c0_75] : memref<1x1x1xf32, #tpu.memory_space<vmem>>, vector<1x1x1xf32>
    tpu.vector_store %arg4[%c0_73, %c0_74, %c0_75], %139 {strides = array<i32>} : memref<1x1x1xf32, #tpu.memory_space<vmem>>, vector<1x1x1xf32>,
    return
  }
  func.func @transform_2(%arg0: i32, %arg1: i32) -> (i32, i32, i32) {
    %c0_i32 = arith.constant 0 : i32
    %c0_i32_0 = arith.constant 0 : i32
    %c0_i32_1 = arith.constant 0 : i32
    return %arg0, %c0_i32, %c0_i32_0 : i32, i32, i32
  }
}

</mosaic_0001>

<bundles_post_ra>
// kernel: tpu_custom_call.1
= control target key start
LH: loop header
LB: loop body
LE: loop exit
PB: predicated region body
PF: predicated region fallthrough
CT: control target
= control target key end

     0   :  { %s2158_s9 = smov 0   ;;  %s2160_s10 = smov 0   ;;  %s3655_s0 = inlined_call_operand.hbm [shape: f32[2,8,8,8], index: 0, kind: input, shape index: {}]   ;;  %s3656_s1 = inlined_call_operand.hbm [shape: s8[2,8,8,8], index: 1, kind: input, shape index: {}]   ;;  %s3657_s2 = inlined_call_operand.vmem [shape: f32[2,1,1], index: 2, kind: output, shape index: {}]  }
   0x1   :  { %s2162_s11 = smov 0  }
   0x2 LB: > { %s18_s12 = sadd.s32 1, %s2125_s9  ;;  %s21_s13 = sadd.s32 1, %s2129_s10  ;;  %s2133_s11 = sphi %s2162_s11, %s12_s11   ;;  %s2129_s10 = sphi %s2160_s10, %s3893_s10   ;;  %s2125_s9 = sphi %s2158_s9, %s3892_s9  }
   0x3   : > { %p19_p0 = scmp.ge.s32.totalorder %s18_s12, 2  ;;  %p1885_p2 = scmp.ge.s32.totalorder %s2133_s11, 4 }
   0x5   : > { %s3895_s12 = smov (%p19_p0, %s18_s12), 0  ;;  %s3897_s13 = smov (!%p19_p0, %s21_s13), %s2129_s10 }
   0x6   : > { %p23_p1 = scmp.ge.s32.totalorder %s3897_s13, 2  ;;  %47 = sbr.rel (%p1885_p2) target bundleno = 1033 (0x409), region = 12 }
   0x8   : > { %s3899_s13 = smov (%p23_p1, %s3897_s13), 0 }
   0xd   : > { %p53_p3 = scmp.lt.s32.totalorder %s2129_s10, 1  ;;  %p1886_p4 = scmp.ne.s32.totalorder %s2125_s9, 0 }
   0xe   : > { %s1980_s18 = sshll.u32 (!%p1886_p4), %s2129_s10, 10  ;;  %s2135_s22 = smov (!%p1886_p4), [#allocation4]  }
   0xf   : > { %s54_s14 = scalar_select %p53_p3, %s2129_s10, 1 }
  0x10   : > { %59 = sbr.rel (%p1886_p4) target bundleno = 379 (0x17b), region = 16  ;;  %s62_s21 = scalar_lea.hbm (!%p1886_p4), %s3655_s0, %s1980_s18 }
  0x11   : > { %s2186_s17 = scalar_lea.vmem %s3657_s2, %s54_s14  ;;  %s70_s23 = sshll.u32 (!%p1886_p4), %s2135_s22, 4  ;;  %s71_s23 = int_to_ptr.vmem [resolvable:$true] %s70_s23 }
  0x12   : > { %s1981_s24 = sshll.u32 (!%p1886_p4), %s2129_s10, 8  ;;  %s2059_s25 = scalar_lea.hbm (!%p1886_p4), %s62_s21, 1024 }
  0x13   : > { %p2060_p5 = scmp.ne.s32.totalorder (!%p1886_p4), %s62_s21, %s2059_s25  ;;  %s2061_s28 = scalar_lea.hbm (!%p1886_p4), %s3655_s0, 2048 }
  0x14   : > { %p2062_p6 = scmp.lt.u32.totalorder (!%p1886_p4), %s62_s21, %s3655_s0  ;;  %p2063_p7 = scmp.lt.u32.totalorder (!%p1886_p4), %s2061_s28, %s2059_s25 }
  0x15   : > { %p2065_p9 = scmp.lt.u32.totalorder (!%p1886_p4), %s2059_s25, %s62_s21 }
  0x16   : > { %p2064_p8 = por (!%p1886_p4), %p2063_p7, %p2062_p6 }
  0x18   : > { %p2066_p10 = por %p2065_p9, %p2064_p8 }
  0x1a   : > { %p2067_p11 = pnand %p2066_p10, %p2060_p5 }
  0x1c   : > { %2070 = shalt.err (!%p2067_p11)  }
  0x1d   : > { %s2071_s3 = scalar_lea.vmem %s71_s23, 1024  ;;  %p2076_p13 = scmp.lt.s32.totalorder %s71_s23, %s71_s23 }
  0x1e   : > { %p2072_p12 = scmp.ne.s32.totalorder %s71_s23, %s2071_s3  ;;  %p2077_p0 = scmp.lt.s32.totalorder %s2071_s3, %s2071_s3 }
  0x20   : > { %p2078_p1 = por %p2077_p0, %p2076_p13 }
  0x22   : > { %p2079_p2 = pnand %p2078_p1, %p2072_p12 }
  0x24   : > { %2082 = shalt.err (!%p2079_p2)  }
  0x25   : > { %73 = dma.hbm_to_vmem [thread:$0]  %s62_s21, 1024, %s71_s23, [#allocation6] }
  0x26   : > { %s76_s6 = scalar_lea.hbm %s3656_s1, %s1981_s24  ;;  %s2136_s7 = smov [#allocation5]  }
  0x27   : > { %s85_s8 = sshll.u32 %s2136_s7, 4  ;;  %s2083_s10 = scalar_lea.hbm %s76_s6, 256  ;;  %s86_s8 = int_to_ptr.vmem [resolvable:$true] %s85_s8 }
  0x28   : > { %p2084_p3 = scmp.ne.s32.totalorder %s76_s6, %s2083_s10  ;;  %s2085_s16 = scalar_lea.hbm %s3656_s1, 512 }
  0x29   : > { %p2086_p4 = scmp.lt.u32.totalorder %s76_s6, %s3656_s1  ;;  %p2087_p5 = scmp.lt.u32.totalorder %s2085_s16, %s2083_s10 }
  0x2a   : > { %p2089_p7 = scmp.lt.u32.totalorder %s2083_s10, %s76_s6 }
  0x2b   : > { %p2088_p6 = por %p2087_p5, %p2086_p4 }
  0x2d   : > { %p2090_p8 = por %p2089_p7, %p2088_p6 }
  0x2f   : > { %p2091_p9 = pnand %p2090_p8, %p2084_p3 }
  0x31   : > { %2094 = shalt.err (!%p2091_p9)  }
  0x32   : > { %s2095_s20 = scalar_lea.vmem %s86_s8, 256  ;;  %p2100_p11 = scmp.lt.s32.totalorder %s86_s8, %s86_s8 }
  0x33   : > { %p2096_p10 = scmp.ne.s32.totalorder %s86_s8, %s2095_s20  ;;  %p2101_p12 = scmp.lt.s32.totalorder %s2095_s20, %s2095_s20 }
  0x35   : > { %p2102_p13 = por %p2101_p12, %p2100_p11 }
  0x37   : > { %p2103_p0 = pnand %p2102_p13, %p2096_p10 }
  0x39   : > { %2106 = shalt.err (!%p2103_p0)  }
  0x3a   : > { %88 = dma.hbm_to_vmem [thread:$0]  %s76_s6, 256, %s86_s8, [#allocation6 + $0x1] }
  0x3b   : > { %2119 = dma.done.wait [#allocation6], 1024 }
  0x3c   : > { %2120 = vsyncadd [#allocation6], 4294966272  ;;  %vm127_vm0 = vcmask 7168   ;;  %v2137_v0 = vmov 0.0   ;;  %vm129_vm1 = vcmask 3072   ;;  %vm149_vm2 = vcmask 97368  }
  0x3d   : > { %101 = vst [vmem:[#allocation2] sm:$0xff] %v2137_v0  ;;  %102 = vst [vmem:[#allocation2 + $0x8] sm:$0xf] %v2137_v0  ;;  %vm151_vm3 = vcmask 93272   ;;  %v94_v1 = vld [vmem:[#allocation4 + $0x8] sm:$0xff]  ;;  %s2138_s21 = smov 4  }
  0x3e   : > { %104 = vst [vmem:[#allocation2 + $0xb0] sm:$0xff] %v2137_v0  ;;  %105 = vst [vmem:[#allocation2 + $0xb8] sm:$0xf] %v2137_v0  ;;  %224 = vrot.lane.b32.xlu1 %v94_v1, %s2138_s21  ;;  %s2139_s22 = smov 2   ;;  %v99_v2 = vld [vmem:[#allocation4 + $0x30] sm:$0xff]  ;;  %v93_v4 = vld [vmem:[#allocation4] sm:$0xff] }
  0x3f   : > { %107 = vst [vmem:[#allocation2 + $0x10] sm:$0x1] %v2137_v0  ;;  %108 = vst [vmem:[#allocation2 + $0x20] sm:$0x1] %v2137_v0  ;;  %181 = vrot.lane.b32.xlu0 %v94_v1, %s2139_s22  ;;  %v95_v3 = vld [vmem:[#allocation4 + $0x10] sm:$0xff]  ;;  %v97_v5 = vld [vmem:[#allocation4 + $0x20] sm:$0xff] }
  0x40   : > { %109 = vst [vmem:[#allocation2 + $0x30] sm:$0x1] %v2137_v0  ;;  %110 = vst [vmem:[#allocation2 + $0x40] sm:$0x1] %v2137_v0  ;;  %v96_v6 = vld [vmem:[#allocation4 + $0x18] sm:$0xff]  ;;  %v98_v8 = vld [vmem:[#allocation4 + $0x28] sm:$0xff] }
  0x41   : > { %111 = vst [vmem:[#allocation2 + $0x50] sm:$0x1] %v2137_v0  ;;  %112 = vst [vmem:[#allocation2 + $0x60] sm:$0x1] %v2137_v0  ;;  %v100_v7 = vld [vmem:[#allocation4 + $0x38] sm:$0xff]  ;;  %vm204_vm4 = vcmask 80912  }
  0x42   : > { %113 = vst [vmem:[#allocation2 + $0x70] sm:$0x1] %v2137_v0  ;;  %114 = vst [vmem:[#allocation2 + $0x80] sm:$0x1] %v2137_v0  ;;  %234 = vrot.lane.b32.xlu1 %v99_v2, %s2138_s21  ;;  %vm213_vm5 = vcmask 15368   ;;  %vm246_vm6 = vcmask 89168  }
  0x43   : > { %115 = vst [vmem:[#allocation2 + $0x90] sm:$0x1] %v2137_v0  ;;  %116 = vst [vmem:[#allocation2 + $0xa0] sm:$0x1] %v2137_v0  ;;  %191 = vrot.lane.b32.xlu0 %v99_v2, %s2139_s22  ;;  %vm263_vm7 = vcmask 81928   ;;  %vm291_vm8 = vcmask 89096  }
  0x44   : > { %117 = vst [vmem:[#allocation2 + $0x1b] sm:$0x1] %v2137_v0  ;;  %118 = vst [vmem:[#allocation2 + $0x2b] sm:$0x1] %v2137_v0  ;;  %vm293_vm9 = vcmask 82952  }
  0x45   : > { %119 = vst [vmem:[#allocation2 + $0x3b] sm:$0x1] %v2137_v0  ;;  %120 = vst [vmem:[#allocation2 + $0x4b] sm:$0x1] %v2137_v0 }
  0x46   : > { %121 = vst [vmem:[#allocation2 + $0x5b] sm:$0x1] %v2137_v0  ;;  %122 = vst [vmem:[#allocation2 + $0x6b] sm:$0x1] %v2137_v0  ;;  %183 = vrot.lane.b32.xlu1 %v95_v3, %s2139_s22 }
  0x47   : > { %123 = vst [vmem:[#allocation2 + $0x7b] sm:$0x1] %v2137_v0  ;;  %124 = vst [vmem:[#allocation2 + $0x8b] sm:$0x1] %v2137_v0  ;;  %179 = vrot.lane.b32.xlu0 %v93_v4, %s2139_s22 }
  0x48   : > { %125 = vst [vmem:[#allocation2 + $0x9b] sm:$0x1] %v2137_v0  ;;  %126 = vst [vmem:[#allocation2 + $0xab] sm:$0x1] %v2137_v0 }
  0x49   : > { %128 = vst.msk [vmem:[#allocation2 + $0x10] sm:$0xff] %vm127_vm0, %v2137_v0  ;;  %133 = vst.msk [vmem:[#allocation2 + $0x30] sm:$0xff] %vm127_vm0, %v2137_v0 }
  0x4a   : > { %130 = vst.msk [vmem:[#allocation2 + $0x18] sm:$0xf] %vm129_vm1, %v2137_v0  ;;  %134 = vst.msk [vmem:[#allocation2 + $0x38] sm:$0xf] %vm129_vm1, %v2137_v0  ;;  %187 = vrot.lane.b32.xlu1 %v97_v5, %s2139_s22 }
  0x4b   : > { %131 = vst.msk [vmem:[#allocation2 + $0x20] sm:$0xff] %vm127_vm0, %v2137_v0  ;;  %135 = vst.msk [vmem:[#allocation2 + $0x40] sm:$0xff] %vm127_vm0, %v2137_v0  ;;  %185 = vrot.lane.b32.xlu0 %v96_v6, %s2139_s22 }
  0x4c   : > { %132 = vst.msk [vmem:[#allocation2 + $0x28] sm:$0xf] %vm129_vm1, %v2137_v0  ;;  %136 = vst.msk [vmem:[#allocation2 + $0x48] sm:$0xf] %vm129_vm1, %v2137_v0 }
  0x4d   : > { %137 = vst.msk [vmem:[#allocation2 + $0x50] sm:$0xff] %vm127_vm0, %v2137_v0  ;;  %139 = vst.msk [vmem:[#allocation2 + $0x60] sm:$0xff] %vm127_vm0, %v2137_v0 }
  0x4e   : > { %138 = vst.msk [vmem:[#allocation2 + $0x58] sm:$0xf] %vm129_vm1, %v2137_v0  ;;  %140 = vst.msk [vmem:[#allocation2 + $0x68] sm:$0xf] %vm129_vm1, %v2137_v0  ;;  %193 = vrot.lane.b32.xlu1 %v100_v7, %s2139_s22 }
  0x4f   : > { %141 = vst.msk [vmem:[#allocation2 + $0x70] sm:$0xff] %vm127_vm0, %v2137_v0  ;;  %143 = vst.msk [vmem:[#allocation2 + $0x80] sm:$0xff] %vm127_vm0, %v2137_v0  ;;  %189 = vrot.lane.b32.xlu0 %v98_v8, %s2139_s22 }
  0x50   : > { %142 = vst.msk [vmem:[#allocation2 + $0x78] sm:$0xf] %vm129_vm1, %v2137_v0  ;;  %144 = vst.msk [vmem:[#allocation2 + $0x88] sm:$0xf] %vm129_vm1, %v2137_v0 }
  0x51   : > { %145 = vst.msk [vmem:[#allocation2 + $0x90] sm:$0xff] %vm127_vm0, %v2137_v0  ;;  %147 = vst.msk [vmem:[#allocation2 + $0xa0] sm:$0xff] %vm127_vm0, %v2137_v0 }
  0x52   : > { %146 = vst.msk [vmem:[#allocation2 + $0x98] sm:$0xf] %vm129_vm1, %v2137_v0  ;;  %148 = vst.msk [vmem:[#allocation2 + $0xa8] sm:$0xf] %vm129_vm1, %v2137_v0  ;;  %226 = vrot.lane.b32.xlu1 %v95_v3, %s2138_s21 }
  0x53   : > { %150 = vst.msk [vmem:[#allocation2 + $0x10] sm:$0xff] %vm149_vm2, %v2137_v0  ;;  %155 = vst.msk [vmem:[#allocation2 + $0x30] sm:$0xff] %vm149_vm2, %v2137_v0  ;;  %222 = vrot.lane.b32.xlu0 %v93_v4, %s2138_s21 }
  0x54   : > { %152 = vst.msk [vmem:[#allocation2 + $0x18] sm:$0xf] %vm151_vm3, %v2137_v0  ;;  %156 = vst.msk [vmem:[#allocation2 + $0x38] sm:$0xf] %vm151_vm3, %v2137_v0 }
  0x55   : > { %153 = vst.msk [vmem:[#allocation2 + $0x20] sm:$0xff] %vm149_vm2, %v2137_v0  ;;  %157 = vst.msk [vmem:[#allocation2 + $0x40] sm:$0xff] %vm149_vm2, %v2137_v0 }
  0x56   : > { %154 = vst.msk [vmem:[#allocation2 + $0x28] sm:$0xf] %vm151_vm3, %v2137_v0  ;;  %158 = vst.msk [vmem:[#allocation2 + $0x48] sm:$0xf] %vm151_vm3, %v2137_v0  ;;  %230 = vrot.lane.b32.xlu1 %v97_v5, %s2138_s21 }
  0x57   : > { %159 = vst.msk [vmem:[#allocation2 + $0x50] sm:$0xff] %vm149_vm2, %v2137_v0  ;;  %161 = vst.msk [vmem:[#allocation2 + $0x60] sm:$0xff] %vm149_vm2, %v2137_v0  ;;  %228 = vrot.lane.b32.xlu0 %v96_v6, %s2138_s21 }
  0x58   : > { %160 = vst.msk [vmem:[#allocation2 + $0x58] sm:$0xf] %vm151_vm3, %v2137_v0  ;;  %162 = vst.msk [vmem:[#allocation2 + $0x68] sm:$0xf] %vm151_vm3, %v2137_v0 }
  0x59   : > { %163 = vst.msk [vmem:[#allocation2 + $0x70] sm:$0xff] %vm149_vm2, %v2137_v0  ;;  %165 = vst.msk [vmem:[#allocation2 + $0x80] sm:$0xff] %vm149_vm2, %v2137_v0 }
  0x5a   : > { %164 = vst.msk [vmem:[#allocation2 + $0x78] sm:$0xf] %vm151_vm3, %v2137_v0  ;;  %166 = vst.msk [vmem:[#allocation2 + $0x88] sm:$0xf] %vm151_vm3, %v2137_v0  ;;  %236 = vrot.lane.b32.xlu1 %v100_v7, %s2138_s21 }
  0x5b   : > { %167 = vst.msk [vmem:[#allocation2 + $0x90] sm:$0xff] %vm149_vm2, %v2137_v0  ;;  %169 = vst.msk [vmem:[#allocation2 + $0xa0] sm:$0xff] %vm149_vm2, %v2137_v0  ;;  %232 = vrot.lane.b32.xlu0 %v98_v8, %s2138_s21 }
  0x5c   : > { %168 = vst.msk [vmem:[#allocation2 + $0x98] sm:$0xf] %vm151_vm3, %v2137_v0  ;;  %170 = vst.msk [vmem:[#allocation2 + $0xa8] sm:$0xf] %vm151_vm3, %v2137_v0 }
  0xb0   : > { %v225_v9 = vpop.permute.xlu1 %224 }
  0xb1   : > { %v182_v10 = vpop.permute.xlu0 %181 }
  0xb2   : > { %206 = vst.msk [vmem:[#allocation2 + $0x32] sm:$0xff] %vm204_vm4, %v182_v10 }
  0xb3   : > { %215 = vst.msk [vmem:[#allocation2 + $0x32] sm:$0xff] %vm213_vm5, %v94_v1 }
  0xb4   : > { %248 = vst.msk [vmem:[#allocation2 + $0x32] sm:$0xff] %vm246_vm6, %v225_v9  ;;  %v235_v11 = vpop.permute.xlu1 %234 }
  0xb5   : > { %v192_v12 = vpop.permute.xlu0 %191 }
  0xb6   : > { %211 = vst.msk [vmem:[#allocation2 + $0x82] sm:$0xff] %vm204_vm4, %v192_v12 }
  0xb7   : > { %220 = vst.msk [vmem:[#allocation2 + $0x82] sm:$0xff] %vm213_vm5, %v99_v2 }
  0xb8   : > { %253 = vst.msk [vmem:[#allocation2 + $0x82] sm:$0xff] %vm246_vm6, %v235_v11  ;;  %v184_v13 = vpop.permute.xlu1 %183 }
  0xb9   : > { %v180_v14 = vpop.permute.xlu0 %179  ;;  %207 = vst.msk [vmem:[#allocation2 + $0x42] sm:$0xff] %vm204_vm4, %v184_v13 }
  0xba   : > { %205 = vst.msk [vmem:[#allocation2 + $0x22] sm:$0xff] %vm204_vm4, %v180_v14 }
  0xbb   : > { %v256_v15 = vld [vmem:[#allocation2 + $0x33] sm:$0x1]  ;;  %v273_v16 = vld [vmem:[#allocation2 + $0x38] sm:$0x1]  ;;  %216 = vst.msk [vmem:[#allocation2 + $0x42] sm:$0xff] %vm213_vm5, %v95_v3  ;;  %214 = vst.msk [vmem:[#allocation2 + $0x22] sm:$0xff] %vm213_vm5, %v93_v4 }
  0xbc   : > { %265 = vst.msk [vmem:[#allocation2 + $0x31] sm:$0x1] %vm263_vm7, %v256_v15  ;;  %281 = vst.msk [vmem:[#allocation2 + $0x3a] sm:$0x1] %vm263_vm7, %v273_v16  ;;  %v188_v17 = vpop.permute.xlu1 %187 }
  0xbd   : > { %v186_v18 = vpop.permute.xlu0 %185  ;;  %209 = vst.msk [vmem:[#allocation2 + $0x62] sm:$0xff] %vm204_vm4, %v188_v17 }
  0xbe   : > { %208 = vst.msk [vmem:[#allocation2 + $0x52] sm:$0xff] %vm204_vm4, %v186_v18 }
  0xbf   : > { %v261_v19 = vld [vmem:[#allocation2 + $0x83] sm:$0x1]  ;;  %v278_v20 = vld [vmem:[#allocation2 + $0x88] sm:$0x1]  ;;  %218 = vst.msk [vmem:[#allocation2 + $0x62] sm:$0xff] %vm213_vm5, %v97_v5  ;;  %217 = vst.msk [vmem:[#allocation2 + $0x52] sm:$0xff] %vm213_vm5, %v96_v6 }
  0xc0   : > { %270 = vst.msk [vmem:[#allocation2 + $0x81] sm:$0x1] %vm263_vm7, %v261_v19  ;;  %286 = vst.msk [vmem:[#allocation2 + $0x8a] sm:$0x1] %vm263_vm7, %v278_v20  ;;  %v194_v21 = vpop.permute.xlu1 %193 }
  0xc1   : > { %v190_v22 = vpop.permute.xlu0 %189  ;;  %212 = vst.msk [vmem:[#allocation2 + $0x92] sm:$0xff] %vm204_vm4, %v194_v21 }
  0xc2   : > { %210 = vst.msk [vmem:[#allocation2 + $0x72] sm:$0xff] %vm204_vm4, %v190_v22 }
  0xc3   : > { %v289_v23 = vld [vmem:[#allocation2 + $0x31] sm:$0xff]  ;;  %v290_v24 = vld [vmem:[#allocation2 + $0x39] sm:$0x3]  ;;  %221 = vst.msk [vmem:[#allocation2 + $0x92] sm:$0xff] %vm213_vm5, %v100_v7  ;;  %219 = vst.msk [vmem:[#allocation2 + $0x72] sm:$0xff] %vm213_vm5, %v98_v8 }
  0xc4   : > { %292 = vst.msk [vmem:[#allocation2 + $0x11] sm:$0xff] %vm291_vm8, %v289_v23  ;;  %v227_v25 = vpop.permute.xlu1 %226 }
  0xc5   : > { %294 = vst.msk [vmem:[#allocation2 + $0x19] sm:$0x3] %vm293_vm9, %v290_v24  ;;  %v223_v26 = vpop.permute.xlu0 %222 }
  0xc6   : > { %249 = vst.msk [vmem:[#allocation2 + $0x42] sm:$0xff] %vm246_vm6, %v227_v25  ;;  %247 = vst.msk [vmem:[#allocation2 + $0x22] sm:$0xff] %vm246_vm6, %v223_v26 }
  0xc7   : > { %v296_v27 = vld [vmem:[#allocation2 + $0x81] sm:$0xff]  ;;  %v297_v28 = vld [vmem:[#allocation2 + $0x89] sm:$0x3] }
  0xc8   : > { %299 = vst.msk [vmem:[#allocation2 + $0xa1] sm:$0xff] %vm291_vm8, %v296_v27  ;;  %v231_v29 = vpop.permute.xlu1 %230 }
  0xc9   : > { %300 = vst.msk [vmem:[#allocation2 + $0xa9] sm:$0x3] %vm293_vm9, %v297_v28  ;;  %v229_v30 = vpop.permute.xlu0 %228 }
  0xca   : > { %251 = vst.msk [vmem:[#allocation2 + $0x62] sm:$0xff] %vm246_vm6, %v231_v29  ;;  %250 = vst.msk [vmem:[#allocation2 + $0x52] sm:$0xff] %vm246_vm6, %v229_v30 }
  0xcc   : > { %v237_v34 = vpop.permute.xlu1 %236 }
  0xcd   : > { %v257_v31 = vld [vmem:[#allocation2 + $0x43] sm:$0x1]  ;;  %v274_v32 = vld [vmem:[#allocation2 + $0x48] sm:$0x1]  ;;  %v233_v35 = vpop.permute.xlu0 %232  ;;  %254 = vst.msk [vmem:[#allocation2 + $0x92] sm:$0xff] %vm246_vm6, %v237_v34 }
  0xce   : > { %v255_v33 = vld [vmem:[#allocation2 + $0x23] sm:$0x1]  ;;  %266 = vst.msk [vmem:[#allocation2 + $0x41] sm:$0x1] %vm263_vm7, %v257_v31  ;;  %282 = vst.msk [vmem:[#allocation2 + $0x4a] sm:$0x1] %vm263_vm7, %v274_v32 }
  0xcf   : > { %264 = vst.msk [vmem:[#allocation2 + $0x21] sm:$0x1] %vm263_vm7, %v255_v33  ;;  %v272_v36 = vld [vmem:[#allocation2 + $0x28] sm:$0x1] }
  0xd0   : > { %252 = vst.msk [vmem:[#allocation2 + $0x72] sm:$0xff] %vm246_vm6, %v233_v35 }
  0xd1   : > { %280 = vst.msk [vmem:[#allocation2 + $0x2a] sm:$0x1] %vm263_vm7, %v272_v36  ;;  %v259_v37 = vld [vmem:[#allocation2 + $0x63] sm:$0x1]  ;;  %v276_v38 = vld [vmem:[#allocation2 + $0x68] sm:$0x1] }
  0xd2   : > { %v258_v39 = vld [vmem:[#allocation2 + $0x53] sm:$0x1]  ;;  %268 = vst.msk [vmem:[#allocation2 + $0x61] sm:$0x1] %vm263_vm7, %v259_v37  ;;  %284 = vst.msk [vmem:[#allocation2 + $0x6a] sm:$0x1] %vm263_vm7, %v276_v38 }
  0xd3   : > { %267 = vst.msk [vmem:[#allocation2 + $0x51] sm:$0x1] %vm263_vm7, %v258_v39  ;;  %v275_v40 = vld [vmem:[#allocation2 + $0x58] sm:$0x1] }
  0xd4   : > { %283 = vst.msk [vmem:[#allocation2 + $0x5a] sm:$0x1] %vm263_vm7, %v275_v40  ;;  %v262_v41 = vld [vmem:[#allocation2 + $0x93] sm:$0x1]  ;;  %v279_v42 = vld [vmem:[#allocation2 + $0x98] sm:$0x1] }
  0xd5   : > { %271 = vst.msk [vmem:[#allocation2 + $0x91] sm:$0x1] %vm263_vm7, %v262_v41  ;;  %287 = vst.msk [vmem:[#allocation2 + $0x9a] sm:$0x1] %vm263_vm7, %v279_v42 }
  0xd7   : > { %v260_v43 = vld [vmem:[#allocation2 + $0x73] sm:$0x1]  ;;  %v277_v44 = vld [vmem:[#allocation2 + $0x78] sm:$0x1] }
  0xd8   : > { %269 = vst.msk [vmem:[#allocation2 + $0x71] sm:$0x1] %vm263_vm7, %v260_v43  ;;  %285 = vst.msk [vmem:[#allocation2 + $0x7a] sm:$0x1] %vm263_vm7, %v277_v44 }
  0xd9   : > { %2121 = dma.done.wait [#allocation6 + $0x1], 256 }
  0xda   : > { %2122 = vsyncadd [#allocation6 + $0x1], 4294967040  ;;  %vm520_vm10 = vcmask 0   ;;  %330 = vst [vmem:[#allocation3] sm:$0xff] %v2137_v0  ;;  %v1983_v45 = vld [vmem:[#allocation5] sm:$0xff]   ;;  %v2000_v46 = vld [vmem:[#allocation5 + $0x8] sm:$0xff]  }
  0xdb   : > { %331 = vst [vmem:[#allocation3 + $0x8] sm:$0xf] %v2137_v0  ;;  %333 = vst [vmem:[#allocation3 + $0xb0] sm:$0xff] %v2137_v0  ;;  %v1985_v47 = vunpack.c.1.s8 %v1983_v45  ;;  %v1996_v48 = vunpack.c.2.s8 %v2000_v46  ;;  %v1988_v51 = vunpack.c.2.s8 %v1983_v45  ;;  %v1984_v52 = vunpack.c.0.s8 %v1983_v45 }
  0xdc   : > { %334 = vst [vmem:[#allocation3 + $0xb8] sm:$0xf] %v2137_v0  ;;  %521 = vst.msk [vmem:[%s2186_s17] sm:$0x1] %vm520_vm10, %v2137_v0  ;;  %v1992_v55 = vunpack.c.0.s8 %v2000_v46  ;;  %v1989_v56 = vunpack.c.3.s8 %v1983_v45  ;;  %v1997_v59 = vunpack.c.3.s8 %v2000_v46  ;;  %v1993_v60 = vunpack.c.1.s8 %v2000_v46 }
  0xdd   : > { %336 = vst [vmem:[#allocation3 + $0x10] sm:$0x1] %v2137_v0  ;;  %337 = vst [vmem:[#allocation3 + $0x20] sm:$0x1] %v2137_v0  ;;  %v323_v49 = vcvt.s32.f32 %v1985_v47  ;;  %v328_v50 = vcvt.s32.f32 %v1996_v48  ;;  %v324_v53 = vcvt.s32.f32 %v1988_v51  ;;  %v322_v54 = vcvt.s32.f32 %v1984_v52 }
  0xde   : > { %338 = vst [vmem:[#allocation3 + $0x30] sm:$0x1] %v2137_v0  ;;  %339 = vst [vmem:[#allocation3 + $0x40] sm:$0x1] %v2137_v0  ;;  %v326_v57 = vcvt.s32.f32 %v1992_v55  ;;  %v325_v58 = vcvt.s32.f32 %v1989_v56  ;;  %v329_v61 = vcvt.s32.f32 %v1997_v59  ;;  %v327_v62 = vcvt.s32.f32 %v1993_v60 }
  0xdf   : > { %340 = vst [vmem:[#allocation3 + $0x50] sm:$0x1] %v2137_v0  ;;  %341 = vst [vmem:[#allocation3 + $0x60] sm:$0x1] %v2137_v0  ;;  %447 = vrot.lane.b32.xlu1 %v323_v49, %s2138_s21  ;;  %406 = vrot.lane.b32.xlu0 %v323_v49, %s2139_s22 }
  0xe0   : > { %342 = vst [vmem:[#allocation3 + $0x70] sm:$0x1] %v2137_v0  ;;  %343 = vst [vmem:[#allocation3 + $0x80] sm:$0x1] %v2137_v0 }
  0xe1   : > { %344 = vst [vmem:[#allocation3 + $0x90] sm:$0x1] %v2137_v0  ;;  %345 = vst [vmem:[#allocation3 + $0xa0] sm:$0x1] %v2137_v0 }
  0xe2   : > { %346 = vst [vmem:[#allocation3 + $0x1b] sm:$0x1] %v2137_v0  ;;  %347 = vst [vmem:[#allocation3 + $0x2b] sm:$0x1] %v2137_v0 }
  0xe3   : > { %348 = vst [vmem:[#allocation3 + $0x3b] sm:$0x1] %v2137_v0  ;;  %349 = vst [vmem:[#allocation3 + $0x4b] sm:$0x1] %v2137_v0  ;;  %457 = vrot.lane.b32.xlu1 %v328_v50, %s2138_s21  ;;  %416 = vrot.lane.b32.xlu0 %v328_v50, %s2139_s22 }
  0xe4   : > { %350 = vst [vmem:[#allocation3 + $0x5b] sm:$0x1] %v2137_v0  ;;  %351 = vst [vmem:[#allocation3 + $0x6b] sm:$0x1] %v2137_v0 }
  0xe5   : > { %352 = vst [vmem:[#allocation3 + $0x7b] sm:$0x1] %v2137_v0  ;;  %353 = vst [vmem:[#allocation3 + $0x8b] sm:$0x1] %v2137_v0 }
  0xe6   : > { %354 = vst [vmem:[#allocation3 + $0x9b] sm:$0x1] %v2137_v0  ;;  %355 = vst [vmem:[#allocation3 + $0xab] sm:$0x1] %v2137_v0 }
  0xe7   : > { %356 = vst.msk [vmem:[#allocation3 + $0x10] sm:$0xff] %vm127_vm0, %v2137_v0  ;;  %358 = vst.msk [vmem:[#allocation3 + $0x20] sm:$0xff] %vm127_vm0, %v2137_v0  ;;  %408 = vrot.lane.b32.xlu1 %v324_v53, %s2139_s22  ;;  %404 = vrot.lane.b32.xlu0 %v322_v54, %s2139_s22 }
  0xe8   : > { %357 = vst.msk [vmem:[#allocation3 + $0x18] sm:$0xf] %vm129_vm1, %v2137_v0  ;;  %359 = vst.msk [vmem:[#allocation3 + $0x28] sm:$0xf] %vm129_vm1, %v2137_v0 }
  0xe9   : > { %360 = vst.msk [vmem:[#allocation3 + $0x30] sm:$0xff] %vm127_vm0, %v2137_v0  ;;  %362 = vst.msk [vmem:[#allocation3 + $0x40] sm:$0xff] %vm127_vm0, %v2137_v0 }
  0xea   : > { %361 = vst.msk [vmem:[#allocation3 + $0x38] sm:$0xf] %vm129_vm1, %v2137_v0  ;;  %363 = vst.msk [vmem:[#allocation3 + $0x48] sm:$0xf] %vm129_vm1, %v2137_v0 }
  0xeb   : > { %364 = vst.msk [vmem:[#allocation3 + $0x50] sm:$0xff] %vm127_vm0, %v2137_v0  ;;  %366 = vst.msk [vmem:[#allocation3 + $0x60] sm:$0xff] %vm127_vm0, %v2137_v0  ;;  %412 = vrot.lane.b32.xlu1 %v326_v57, %s2139_s22  ;;  %410 = vrot.lane.b32.xlu0 %v325_v58, %s2139_s22 }
  0xec   : > { %365 = vst.msk [vmem:[#allocation3 + $0x58] sm:$0xf] %vm129_vm1, %v2137_v0  ;;  %367 = vst.msk [vmem:[#allocation3 + $0x68] sm:$0xf] %vm129_vm1, %v2137_v0 }
  0xed   : > { %368 = vst.msk [vmem:[#allocation3 + $0x70] sm:$0xff] %vm127_vm0, %v2137_v0  ;;  %370 = vst.msk [vmem:[#allocation3 + $0x80] sm:$0xff] %vm127_vm0, %v2137_v0 }
  0xee   : > { %369 = vst.msk [vmem:[#allocation3 + $0x78] sm:$0xf] %vm129_vm1, %v2137_v0  ;;  %371 = vst.msk [vmem:[#allocation3 + $0x88] sm:$0xf] %vm129_vm1, %v2137_v0 }
  0xef   : > { %372 = vst.msk [vmem:[#allocation3 + $0x90] sm:$0xff] %vm127_vm0, %v2137_v0  ;;  %374 = vst.msk [vmem:[#allocation3 + $0xa0] sm:$0xff] %vm127_vm0, %v2137_v0  ;;  %418 = vrot.lane.b32.xlu1 %v329_v61, %s2139_s22  ;;  %414 = vrot.lane.b32.xlu0 %v327_v62, %s2139_s22 }
  0xf0   : > { %373 = vst.msk [vmem:[#allocation3 + $0x98] sm:$0xf] %vm129_vm1, %v2137_v0  ;;  %375 = vst.msk [vmem:[#allocation3 + $0xa8] sm:$0xf] %vm129_vm1, %v2137_v0 }
  0xf1   : > { %376 = vst.msk [vmem:[#allocation3 + $0x10] sm:$0xff] %vm149_vm2, %v2137_v0  ;;  %378 = vst.msk [vmem:[#allocation3 + $0x20] sm:$0xff] %vm149_vm2, %v2137_v0 }
  0xf2   : > { %377 = vst.msk [vmem:[#allocation3 + $0x18] sm:$0xf] %vm151_vm3, %v2137_v0  ;;  %379 = vst.msk [vmem:[#allocation3 + $0x28] sm:$0xf] %vm151_vm3, %v2137_v0 }
  0xf3   : > { %380 = vst.msk [vmem:[#allocation3 + $0x30] sm:$0xff] %vm149_vm2, %v2137_v0  ;;  %382 = vst.msk [vmem:[#allocation3 + $0x40] sm:$0xff] %vm149_vm2, %v2137_v0  ;;  %449 = vrot.lane.b32.xlu1 %v324_v53, %s2138_s21  ;;  %445 = vrot.lane.b32.xlu0 %v322_v54, %s2138_s21 }
  0xf4   : > { %381 = vst.msk [vmem:[#allocation3 + $0x38] sm:$0xf] %vm151_vm3, %v2137_v0  ;;  %383 = vst.msk [vmem:[#allocation3 + $0x48] sm:$0xf] %vm151_vm3, %v2137_v0 }
  0xf5   : > { %384 = vst.msk [vmem:[#allocation3 + $0x50] sm:$0xff] %vm149_vm2, %v2137_v0  ;;  %386 = vst.msk [vmem:[#allocation3 + $0x60] sm:$0xff] %vm149_vm2, %v2137_v0 }
  0xf6   : > { %385 = vst.msk [vmem:[#allocation3 + $0x58] sm:$0xf] %vm151_vm3, %v2137_v0  ;;  %387 = vst.msk [vmem:[#allocation3 + $0x68] sm:$0xf] %vm151_vm3, %v2137_v0 }
  0xf7   : > { %388 = vst.msk [vmem:[#allocation3 + $0x70] sm:$0xff] %vm149_vm2, %v2137_v0  ;;  %390 = vst.msk [vmem:[#allocation3 + $0x80] sm:$0xff] %vm149_vm2, %v2137_v0  ;;  %453 = vrot.lane.b32.xlu1 %v326_v57, %s2138_s21  ;;  %451 = vrot.lane.b32.xlu0 %v325_v58, %s2138_s21 }
  0xf8   : > { %389 = vst.msk [vmem:[#allocation3 + $0x78] sm:$0xf] %vm151_vm3, %v2137_v0  ;;  %391 = vst.msk [vmem:[#allocation3 + $0x88] sm:$0xf] %vm151_vm3, %v2137_v0 }
  0xf9   : > { %392 = vst.msk [vmem:[#allocation3 + $0x90] sm:$0xff] %vm149_vm2, %v2137_v0  ;;  %394 = vst.msk [vmem:[#allocation3 + $0xa0] sm:$0xff] %vm149_vm2, %v2137_v0 }
  0xfa   : > { %393 = vst.msk [vmem:[#allocation3 + $0x98] sm:$0xf] %vm151_vm3, %v2137_v0  ;;  %395 = vst.msk [vmem:[#allocation3 + $0xa8] sm:$0xf] %vm151_vm3, %v2137_v0 }
  0xfb   : > { %459 = vrot.lane.b32.xlu1 %v329_v61, %s2138_s21  ;;  %455 = vrot.lane.b32.xlu0 %v327_v62, %s2138_s21 }
 0x151   : > { %v448_v63 = vpop.permute.xlu1 %447  ;;  %v407_v0 = vpop.permute.xlu0 %406 }
 0x152   : > { %430 = vst.msk [vmem:[#allocation3 + $0x32] sm:$0xff] %vm204_vm4, %v407_v0 }
 0x153   : > { %438 = vst.msk [vmem:[#allocation3 + $0x32] sm:$0xff] %vm213_vm5, %v323_v49 }
 0x154   : > { %470 = vst.msk [vmem:[#allocation3 + $0x32] sm:$0xff] %vm246_vm6, %v448_v63 }
 0x155   : > { %v458_v1 = vpop.permute.xlu1 %457  ;;  %v417_v2 = vpop.permute.xlu0 %416 }
 0x156   : > { %435 = vst.msk [vmem:[#allocation3 + $0x82] sm:$0xff] %vm204_vm4, %v417_v2 }
 0x157   : > { %443 = vst.msk [vmem:[#allocation3 + $0x82] sm:$0xff] %vm213_vm5, %v328_v50 }
 0x158   : > { %475 = vst.msk [vmem:[#allocation3 + $0x82] sm:$0xff] %vm246_vm6, %v458_v1 }
 0x159   : > { %v409_v3 = vpop.permute.xlu1 %408  ;;  %v405_v4 = vpop.permute.xlu0 %404 }
 0x15a   : > { %431 = vst.msk [vmem:[#allocation3 + $0x42] sm:$0xff] %vm204_vm4, %v409_v3  ;;  %429 = vst.msk [vmem:[#allocation3 + $0x22] sm:$0xff] %vm204_vm4, %v405_v4 }
 0x15b   : > { %v478_v5 = vld [vmem:[#allocation3 + $0x33] sm:$0x1]  ;;  %v494_v6 = vld [vmem:[#allocation3 + $0x38] sm:$0x1]  ;;  %439 = vst.msk [vmem:[#allocation3 + $0x42] sm:$0xff] %vm213_vm5, %v324_v53  ;;  %437 = vst.msk [vmem:[#allocation3 + $0x22] sm:$0xff] %vm213_vm5, %v322_v54 }
 0x15c   : > { %486 = vst.msk [vmem:[#allocation3 + $0x31] sm:$0x1] %vm263_vm7, %v478_v5  ;;  %502 = vst.msk [vmem:[#allocation3 + $0x3a] sm:$0x1] %vm263_vm7, %v494_v6 }
 0x15d   : > { %v413_v7 = vpop.permute.xlu1 %412  ;;  %v411_v8 = vpop.permute.xlu0 %410 }
 0x15e   : > { %433 = vst.msk [vmem:[#allocation3 + $0x62] sm:$0xff] %vm204_vm4, %v413_v7  ;;  %432 = vst.msk [vmem:[#allocation3 + $0x52] sm:$0xff] %vm204_vm4, %v411_v8 }
 0x15f   : > { %v483_v9 = vld [vmem:[#allocation3 + $0x83] sm:$0x1]  ;;  %v499_v10 = vld [vmem:[#allocation3 + $0x88] sm:$0x1]  ;;  %441 = vst.msk [vmem:[#allocation3 + $0x62] sm:$0xff] %vm213_vm5, %v326_v57  ;;  %440 = vst.msk [vmem:[#allocation3 + $0x52] sm:$0xff] %vm213_vm5, %v325_v58 }
 0x160   : > { %491 = vst.msk [vmem:[#allocation3 + $0x81] sm:$0x1] %vm263_vm7, %v483_v9  ;;  %507 = vst.msk [vmem:[#allocation3 + $0x8a] sm:$0x1] %vm263_vm7, %v499_v10 }
 0x161   : > { %v419_v11 = vpop.permute.xlu1 %418  ;;  %v415_v12 = vpop.permute.xlu0 %414 }
 0x162   : > { %436 = vst.msk [vmem:[#allocation3 + $0x92] sm:$0xff] %vm204_vm4, %v419_v11  ;;  %434 = vst.msk [vmem:[#allocation3 + $0x72] sm:$0xff] %vm204_vm4, %v415_v12 }
 0x163   : > { %v510_v13 = vld [vmem:[#allocation3 + $0x31] sm:$0xff]  ;;  %v511_v14 = vld [vmem:[#allocation3 + $0x39] sm:$0x3]  ;;  %444 = vst.msk [vmem:[#allocation3 + $0x92] sm:$0xff] %vm213_vm5, %v329_v61  ;;  %442 = vst.msk [vmem:[#allocation3 + $0x72] sm:$0xff] %vm213_vm5, %v327_v62 }
 0x164   : > { %512 = vst.msk [vmem:[#allocation3 + $0x11] sm:$0xff] %vm291_vm8, %v510_v13 }
 0x165   : > { %513 = vst.msk [vmem:[#allocation3 + $0x19] sm:$0x3] %vm293_vm9, %v511_v14  ;;  %v450_v15 = vpop.permute.xlu1 %449  ;;  %v446_v16 = vpop.permute.xlu0 %445 }
 0x166   : > { %471 = vst.msk [vmem:[#allocation3 + $0x42] sm:$0xff] %vm246_vm6, %v450_v15  ;;  %469 = vst.msk [vmem:[#allocation3 + $0x22] sm:$0xff] %vm246_vm6, %v446_v16 }
 0x167   : > { %v515_v17 = vld [vmem:[#allocation3 + $0x81] sm:$0xff]  ;;  %v516_v18 = vld [vmem:[#allocation3 + $0x89] sm:$0x3] }
 0x168   : > { %518 = vst.msk [vmem:[#allocation3 + $0xa1] sm:$0xff] %vm291_vm8, %v515_v17 }
 0x169   : > { %519 = vst.msk [vmem:[#allocation3 + $0xa9] sm:$0x3] %vm293_vm9, %v516_v18  ;;  %v454_v19 = vpop.permute.xlu1 %453  ;;  %v452_v20 = vpop.permute.xlu0 %451 }
 0x16a   : > { %473 = vst.msk [vmem:[#allocation3 + $0x62] sm:$0xff] %vm246_vm6, %v454_v19  ;;  %472 = vst.msk [vmem:[#allocation3 + $0x52] sm:$0xff] %vm246_vm6, %v452_v20 }
 0x16d   : > { %v479_v21 = vld [vmem:[#allocation3 + $0x43] sm:$0x1]  ;;  %v495_v22 = vld [vmem:[#allocation3 + $0x48] sm:$0x1]  ;;  %v460_v24 = vpop.permute.xlu1 %459  ;;  %v456_v25 = vpop.permute.xlu0 %455 }
 0x16e   : > { %v477_v23 = vld [vmem:[#allocation3 + $0x23] sm:$0x1]  ;;  %487 = vst.msk [vmem:[#allocation3 + $0x41] sm:$0x1] %vm263_vm7, %v479_v21  ;;  %503 = vst.msk [vmem:[#allocation3 + $0x4a] sm:$0x1] %vm263_vm7, %v495_v22 }
 0x16f   : > { %485 = vst.msk [vmem:[#allocation3 + $0x21] sm:$0x1] %vm263_vm7, %v477_v23  ;;  %v493_v26 = vld [vmem:[#allocation3 + $0x28] sm:$0x1] }
 0x170   : > { %476 = vst.msk [vmem:[#allocation3 + $0x92] sm:$0xff] %vm246_vm6, %v460_v24  ;;  %474 = vst.msk [vmem:[#allocation3 + $0x72] sm:$0xff] %vm246_vm6, %v456_v25 }
 0x171   : > { %501 = vst.msk [vmem:[#allocation3 + $0x2a] sm:$0x1] %vm263_vm7, %v493_v26  ;;  %v481_v27 = vld [vmem:[#allocation3 + $0x63] sm:$0x1]  ;;  %v497_v28 = vld [vmem:[#allocation3 + $0x68] sm:$0x1] }
 0x172   : > { %v480_v29 = vld [vmem:[#allocation3 + $0x53] sm:$0x1]  ;;  %489 = vst.msk [vmem:[#allocation3 + $0x61] sm:$0x1] %vm263_vm7, %v481_v27  ;;  %505 = vst.msk [vmem:[#allocation3 + $0x6a] sm:$0x1] %vm263_vm7, %v497_v28 }
 0x173   : > { %488 = vst.msk [vmem:[#allocation3 + $0x51] sm:$0x1] %vm263_vm7, %v480_v29  ;;  %v496_v30 = vld [vmem:[#allocation3 + $0x58] sm:$0x1] }
 0x174   : > { %504 = vst.msk [vmem:[#allocation3 + $0x5a] sm:$0x1] %vm263_vm7, %v496_v30 }
 0x177   : > { %v484_v31 = vld [vmem:[#allocation3 + $0x93] sm:$0x1]  ;;  %v500_v32 = vld [vmem:[#allocation3 + $0x98] sm:$0x1] }
 0x178   : > { %v482_v33 = vld [vmem:[#allocation3 + $0x73] sm:$0x1]  ;;  %492 = vst.msk [vmem:[#allocation3 + $0x91] sm:$0x1] %vm263_vm7, %v484_v31  ;;  %508 = vst.msk [vmem:[#allocation3 + $0x9a] sm:$0x1] %vm263_vm7, %v500_v32 }
 0x179   : > { %490 = vst.msk [vmem:[#allocation3 + $0x71] sm:$0x1] %vm263_vm7, %v482_v33  ;;  %v498_v34 = vld [vmem:[#allocation3 + $0x78] sm:$0x1] }
 0x17a   : > { %506 = vst.msk [vmem:[#allocation3 + $0x7a] sm:$0x1] %vm263_vm7, %v498_v34 }
 0x17b PF: > { %s1891_s23 = smul.u32 80, %s2125_s9  ;;  %s2140_s25 = smov 126   ;;  %vm1775_vm11 = vcmask 80896   ;;  %vm1777_vm12 = vcmask 74752   ;;  %vm1807_vm13 = vcmask 0  }
 0x17c   : > { %s2141_s26 = smov 1   ;;  %s2142_s9 = smov 127  }
 0x17d   : > { %s2542_s24 = scalar_lea.vmem [#allocation2], %s1891_s23  ;;  %s2653_s27 = scalar_lea.vmem [#allocation3], %s1891_s23 }
 0x17e   : > { %v2545_v35 = vld [vmem:[%s2542_s24 + $0x20] sm:$0xff]  ;;  %v2548_v36 = vld [vmem:[%s2542_s24 + $0x10] sm:$0xff]  ;;  %v2555_v37 = vld [vmem:[%s2542_s24 + $0x28] sm:$0x3] }
 0x17f   : > { %595 = vrot.lane.b32.xlu1 %v2545_v35, %s2140_s25  ;;  %591 = vrot.lane.b32.xlu0 %v2548_v36, %s2140_s25  ;;  %3720 = vst [vmem:[#allocation15_spill] sm:$0xff] %v2555_v37  ;;  %v2558_v38 = vld [vmem:[%s2542_s24 + $0x18] sm:$0x3]  ;;  %v2568_v40 = vld [vmem:[%s2542_s24 + $0x30] sm:$0xff]  ;;  %v761_v6 = vmul.f32 2.0, %v2548_v36  ;;  %v763_v31 = vmul.f32 2.0, %v2545_v35 }
 0x180   : > { %v2565_v39 = vld [vmem:[%s2542_s24 + $0x38] sm:$0x3]  ;;  %3722 = vst [vmem:[#allocation17_spill] sm:$0xff] %v2568_v40  ;;  %v2575_v41 = vld [vmem:[%s2542_s24 + $0x48] sm:$0x3]  ;;  %v2578_v42 = vld [vmem:[%s2542_s24 + $0x40] sm:$0xff] }
 0x181   : > { %3721 = vst [vmem:[#allocation16_spill] sm:$0xff] %v2565_v39  ;;  %3723 = vst [vmem:[#allocation18_spill] sm:$0xff] %v2575_v41  ;;  %v2585_v43 = vld [vmem:[%s2542_s24 + $0x58] sm:$0x3]  ;;  %v2588_v44 = vld [vmem:[%s2542_s24 + $0x50] sm:$0xff]  ;;  %v762_v9 = vmul.f32 2.0, %v2558_v38 }
 0x182   : > { %3724 = vst [vmem:[#allocation19_spill] sm:$0xff] %v2585_v43  ;;  %3725 = vst [vmem:[#allocation20_spill] sm:$0xff] %v2588_v44  ;;  %v2595_v45 = vld [vmem:[%s2542_s24 + $0x19] sm:$0x3]  ;;  %v2598_v46 = vld [vmem:[%s2542_s24 + $0x11] sm:$0xff] }
 0x183   : > { %597 = vrot.lane.b32.xlu1 %v2555_v37, %s2140_s25  ;;  %593 = vrot.lane.b32.xlu0 %v2558_v38, %s2140_s25  ;;  %v2605_v47 = vld [vmem:[%s2542_s24 + $0x29] sm:$0x3]  ;;  %v2608_v48 = vld [vmem:[%s2542_s24 + $0x21] sm:$0xff] }
 0x184   : > { %v2615_v49 = vld [vmem:[%s2542_s24 + $0x39] sm:$0x3]  ;;  %v2618_v50 = vld [vmem:[%s2542_s24 + $0x31] sm:$0xff]  ;;  %v2625_v51 = vld [vmem:[%s2542_s24 + $0x49] sm:$0x3] }
 0x185   : > { %3726 = vst [vmem:[#allocation21_spill] sm:$0xff] %v2618_v50  ;;  %3727 = vst [vmem:[#allocation22_spill] sm:$0xff] %v2625_v51  ;;  %v2628_v52 = vld [vmem:[%s2542_s24 + $0x41] sm:$0xff]  ;;  %v2635_v53 = vld [vmem:[%s2542_s24 + $0x59] sm:$0x3] }
 0x186   : > { %3728 = vst [vmem:[#allocation23_spill] sm:$0xff] %v2628_v52  ;;  %3729 = vst [vmem:[#allocation24_spill] sm:$0xff] %v2635_v53  ;;  %v2638_v54 = vld [vmem:[%s2542_s24 + $0x51] sm:$0xff]  ;;  %v2663_v57 = vld [vmem:[%s2653_s27 + $0x19] sm:$0x3] }
 0x187   : > { %601 = vrot.lane.b32.xlu1 %v2565_v39, %s2140_s25  ;;  %599 = vrot.lane.b32.xlu0 %v2568_v40, %s2140_s25  ;;  %3730 = vst [vmem:[#allocation25_spill] sm:$0xff] %v2638_v54  ;;  %v2645_v55 = vld [vmem:[%s2542_s24 + $0x12] sm:$0xff]  ;;  %v2670_v58 = vld [vmem:[%s2653_s27 + $0x21] sm:$0xff] }
 0x188   : > { %v2656_v56 = vld [vmem:[%s2653_s27 + $0x11] sm:$0xff]  ;;  %v2681_v59 = vld [vmem:[%s2653_s27 + $0x29] sm:$0x3]  ;;  %v2703_v61 = vld [vmem:[%s2653_s27 + $0x39] sm:$0x3]  ;;  %v831_v10 = vmul.f32 2.0, %v2645_v55 }
 0x189   : > { %3731 = vst [vmem:[#allocation26_spill] sm:$0xff] %v2681_v59  ;;  %v2692_v60 = vld [vmem:[%s2653_s27 + $0x31] sm:$0xff]  ;;  %3733 = vst [vmem:[#allocation28_spill] sm:$0xff] %v2703_v61  ;;  %v2714_v62 = vld [vmem:[%s2653_s27 + $0x41] sm:$0xff] }
 0x18a   : > { %3732 = vst [vmem:[#allocation27_spill] sm:$0xff] %v2692_v60  ;;  %3734 = vst [vmem:[#allocation29_spill] sm:$0xff] %v2714_v62  ;;  %v2725_v63 = vld [vmem:[%s2653_s27 + $0x49] sm:$0x3]  ;;  %v2736_v0 = vld [vmem:[%s2653_s27 + $0x51] sm:$0xff] }
 0x18b   : > { %605 = vrot.lane.b32.xlu1 %v2575_v41, %s2140_s25  ;;  %603 = vrot.lane.b32.xlu0 %v2578_v42, %s2140_s25  ;;  %3735 = vst [vmem:[#allocation30_spill] sm:$0xff] %v2736_v0  ;;  %v2747_v1 = vld [vmem:[%s2653_s27 + $0x59] sm:$0x3]  ;;  %v2794_v15 = vld [vmem:[%s2653_s27 + $0x10] sm:$0xff] }
 0x18c   : > { %3736 = vst [vmem:[#allocation31_spill] sm:$0xff] %v2747_v1  ;;  %v2784_v11 = vld [vmem:[%s2542_s24 + $0x1a] sm:$0x3]  ;;  %v2804_v18 = vld [vmem:[%s2653_s27 + $0x18] sm:$0x3]  ;;  %v1374_v21 = vmul.f32 2.0, %v2794_v15 }
 0x18d   : > { %v832_v14 = vmul.f32 2.0, %v2784_v11  ;;  %v1375_v22 = vmul.f32 2.0, %v2804_v18  ;;  %v2817_v23 = vld [vmem:[%s2653_s27 + $0x12] sm:$0xff]  ;;  %v2820_v24 = vld [vmem:[%s2653_s27 + $0x1a] sm:$0x3]  ;;  %v2838_v32 = vld [vmem:[%s2542_s24 + $0x22] sm:$0xff] }
 0x18e   : > { %v1444_v27 = vmul.f32 2.0, %v2817_v23  ;;  %v1445_v28 = vmul.f32 2.0, %v2820_v24 }
 0x18f   : > { %609 = vrot.lane.b32.xlu1 %v2585_v43, %s2140_s25  ;;  %607 = vrot.lane.b32.xlu0 %v2588_v44, %s2140_s25 }
 0x193   : > { %643 = vrot.lane.b32.xlu1 %v2595_v45, %s2140_s25  ;;  %641 = vrot.lane.b32.xlu0 %v2598_v46, %s2140_s25 }
 0x197   : > { %647 = vrot.lane.b32.xlu1 %v2605_v47, %s2140_s25  ;;  %645 = vrot.lane.b32.xlu0 %v2608_v48, %s2140_s25 }
 0x19b   : > { %651 = vrot.lane.b32.xlu1 %v2615_v49, %s2140_s25  ;;  %649 = vrot.lane.b32.xlu0 %v2618_v50, %s2140_s25 }
 0x19f   : > { %655 = vrot.lane.b32.xlu1 %v2625_v51, %s2140_s25  ;;  %653 = vrot.lane.b32.xlu0 %v2628_v52, %s2140_s25 }
 0x1a3   : > { %659 = vrot.lane.b32.xlu1 %v2635_v53, %s2140_s25  ;;  %657 = vrot.lane.b32.xlu0 %v2638_v54, %s2140_s25 }
 0x1a7   : > { %911 = vrot.lane.b32.xlu1 %v2598_v46, %s2141_s26  ;;  %711 = vrot.lane.b32.xlu0 %v2645_v55, %s2140_s25 }
 0x1ab   : > { %1524 = vrot.lane.b32.xlu1 %v2656_v56, %s2141_s26  ;;  %913 = vrot.lane.b32.xlu0 %v2595_v45, %s2141_s26 }
 0x1af   : > { %915 = vrot.lane.b32.xlu1 %v2608_v48, %s2141_s26  ;;  %1526 = vrot.lane.b32.xlu0 %v2663_v57, %s2141_s26 }
 0x1b3   : > { %917 = vrot.lane.b32.xlu1 %v2605_v47, %s2141_s26  ;;  %1528 = vrot.lane.b32.xlu0 %v2670_v58, %s2141_s26 }
 0x1b7   : > { %973 = vrot.lane.b32.xlu1 %v2595_v45, %s2142_s9  ;;  %971 = vrot.lane.b32.xlu0 %v2598_v46, %s2142_s9 }
 0x1bb   : > { %1584 = vrot.lane.b32.xlu1 %v2656_v56, %s2142_s9  ;;  %1530 = vrot.lane.b32.xlu0 %v2681_v59, %s2141_s26 }
 0x1bf   : > { %919 = vrot.lane.b32.xlu1 %v2618_v50, %s2141_s26  ;;  %1586 = vrot.lane.b32.xlu0 %v2663_v57, %s2142_s9 }
 0x1c3   : > { %1532 = vrot.lane.b32.xlu1 %v2692_v60, %s2141_s26  ;;  %975 = vrot.lane.b32.xlu0 %v2608_v48, %s2142_s9 }
 0x1c7   : > { %921 = vrot.lane.b32.xlu1 %v2615_v49, %s2141_s26  ;;  %1588 = vrot.lane.b32.xlu0 %v2670_v58, %s2142_s9 }
 0x1cb   : > { %1534 = vrot.lane.b32.xlu1 %v2703_v61, %s2141_s26  ;;  %977 = vrot.lane.b32.xlu0 %v2605_v47, %s2142_s9 }
 0x1cf   : > { %923 = vrot.lane.b32.xlu1 %v2628_v52, %s2141_s26  ;;  %1590 = vrot.lane.b32.xlu0 %v2681_v59, %s2142_s9 }
 0x1d3   : > { %1536 = vrot.lane.b32.xlu1 %v2714_v62, %s2141_s26  ;;  %979 = vrot.lane.b32.xlu0 %v2618_v50, %s2142_s9 }
 0x1d7   : > { %925 = vrot.lane.b32.xlu1 %v2625_v51, %s2141_s26  ;;  %1592 = vrot.lane.b32.xlu0 %v2692_v60, %s2142_s9 }
 0x1db   : > { %1538 = vrot.lane.b32.xlu1 %v2725_v63, %s2141_s26  ;;  %981 = vrot.lane.b32.xlu0 %v2615_v49, %s2142_s9 }
 0x1df   : > { %927 = vrot.lane.b32.xlu1 %v2638_v54, %s2141_s26  ;;  %1594 = vrot.lane.b32.xlu0 %v2703_v61, %s2142_s9 }
 0x1e3   : > { %1540 = vrot.lane.b32.xlu1 %v2736_v0, %s2141_s26  ;;  %983 = vrot.lane.b32.xlu0 %v2628_v52, %s2142_s9  ;;  %v951_v52 = vmul.f32 2.0, %v2598_v46 }
 0x1e7   : > { %929 = vrot.lane.b32.xlu1 %v2635_v53, %s2141_s26  ;;  %1596 = vrot.lane.b32.xlu0 %v2714_v62, %s2142_s9 }
 0x1eb   : > { %1542 = vrot.lane.b32.xlu1 %v2747_v1, %s2141_s26  ;;  %985 = vrot.lane.b32.xlu0 %v2625_v51, %s2142_s9 }
 0x1ef   : > { %987 = vrot.lane.b32.xlu1 %v2638_v54, %s2142_s9  ;;  %1598 = vrot.lane.b32.xlu0 %v2725_v63, %s2142_s9 }
 0x1f1   : > { %v2757_v2 = vpop.permute.xlu1 %595  ;;  %v2759_v3 = vpop.permute.xlu0 %591 }
 0x1f2   : > { %3737 = vst [vmem:[#allocation32_spill] sm:$0xff] %v2757_v2  ;;  %3738 = vst [vmem:[#allocation33_spill] sm:$0xff] %v2759_v3 }
 0x1f3   : > { %989 = vrot.lane.b32.xlu1 %v2635_v53, %s2142_s9  ;;  %1600 = vrot.lane.b32.xlu0 %v2736_v0, %s2142_s9 }
 0x1f5   : > { %v2765_v4 = vpop.permute.xlu1 %597  ;;  %v2767_v5 = vpop.permute.xlu0 %593 }
 0x1f6   : > { %3739 = vst [vmem:[#allocation34_spill] sm:$0xff] %v2765_v4  ;;  %3740 = vst [vmem:[#allocation35_spill] sm:$0xff] %v2767_v5 }
 0x1f7   : > { %1254 = vrot.lane.b32.xlu1 %v2656_v56, %s2140_s25  ;;  %1602 = vrot.lane.b32.xlu0 %v2747_v1, %s2142_s9 }
 0x1f9   : > { %v2774_v7 = vpop.permute.xlu1 %601  ;;  %v2776_v8 = vpop.permute.xlu0 %599 }
 0x1fa   : > { %3741 = vst [vmem:[#allocation36_spill] sm:$0xff] %v2774_v7  ;;  %3742 = vst [vmem:[#allocation37_spill] sm:$0xff] %v2776_v8 }
 0x1fb   : > { %1256 = vrot.lane.b32.xlu0 %v2663_v57, %s2140_s25  ;;  %781 = vrot.lane.b32.xlu1 %v761_v6, %s2142_s9  ;;  %v833_v6 = vmul.f32 2.0, %v2838_v32 }
 0x1fd   : > { %v2786_v12 = vpop.permute.xlu1 %605  ;;  %v2788_v13 = vpop.permute.xlu0 %603 }
 0x1fe   : > { %3743 = vst [vmem:[#allocation38_spill] sm:$0xff] %v2786_v12  ;;  %3744 = vst [vmem:[#allocation39_spill] sm:$0xff] %v2788_v13 }
 0x1ff   : > { %783 = vrot.lane.b32.xlu0 %v762_v9, %s2142_s9  ;;  %851 = vrot.lane.b32.xlu1 %v831_v10, %s2142_s9  ;;  %v2849_v9 = vld [vmem:[%s2653_s27 + $0x20] sm:$0xff] }
 0x201   : > { %v2796_v16 = vpop.permute.xlu1 %609  ;;  %v2798_v17 = vpop.permute.xlu0 %607 }
 0x202   : > { %3745 = vst [vmem:[#allocation40_spill] sm:$0xff] %v2796_v16  ;;  %3746 = vst [vmem:[#allocation41_spill] sm:$0xff] %v2798_v17  ;;  %v2875_v16 = vld [vmem:[%s2542_s24 + $0x2a] sm:$0x3] }
 0x203   : > { %853 = vrot.lane.b32.xlu0 %v832_v14, %s2142_s9  ;;  %1204 = vrot.lane.b32.xlu1 %v2794_v15, %s2140_s25  ;;  %3758 = vst [vmem:[#allocation53_spill] sm:$0xff] %v2875_v16 }
 0x205   : > { %v2806_v19 = vpop.permute.xlu1 %643  ;;  %v2808_v20 = vpop.permute.xlu0 %641 }
 0x206   : > { %3747 = vst [vmem:[#allocation42_spill] sm:$0xff] %v2808_v20  ;;  %v2901_v20 = vld [vmem:[%s2653_s27 + $0x2a] sm:$0x3] }
 0x207   : > { %1206 = vrot.lane.b32.xlu0 %v2804_v18, %s2140_s25  ;;  %1258 = vrot.lane.b32.xlu1 %v2670_v58, %s2140_s25  ;;  %3760 = vst [vmem:[#allocation55_spill] sm:$0xff] %v2901_v20 }
 0x209   : > { %v2822_v25 = vpop.permute.xlu1 %647  ;;  %v2824_v26 = vpop.permute.xlu0 %645 }
 0x20a   : > { %3748 = vst [vmem:[#allocation43_spill] sm:$0xff] %v2822_v25  ;;  %3749 = vst [vmem:[#allocation44_spill] sm:$0xff] %v2824_v26  ;;  %v765_v25 = vmul.f32 2.0, %v2568_v40  ;;  %v2942_v40 = vld [vmem:[%s2653_s27 + $0x32] sm:$0xff] }
 0x20b   : > { %1394 = vrot.lane.b32.xlu0 %v1374_v21, %s2142_s9  ;;  %1396 = vrot.lane.b32.xlu1 %v1375_v22, %s2142_s9 }
 0x20d   : > { %v2830_v29 = vpop.permute.xlu1 %651  ;;  %v2832_v30 = vpop.permute.xlu0 %649 }
 0x20e   : > { %3750 = vst [vmem:[#allocation45_spill] sm:$0xff] %v2830_v29  ;;  %3751 = vst [vmem:[#allocation46_spill] sm:$0xff] %v2832_v30 }
 0x20f   : > { %1464 = vrot.lane.b32.xlu0 %v1444_v27, %s2142_s9  ;;  %1466 = vrot.lane.b32.xlu1 %v1445_v28, %s2142_s9  ;;  %v1376_v27 = vmul.f32 2.0, %v2849_v9  ;;  %v2866_v28 = vld [vmem:[%s2653_s27 + $0x22] sm:$0xff] }
 0x210   : > { %3757 = vst [vmem:[#allocation52_spill] sm:$0xff] %v2866_v28  ;;  %v1446_v17 = vmul.f32 2.0, %v2866_v28 }
 0x211   : > { %v2840_v33 = vpop.permute.xlu1 %655  ;;  %v2842_v34 = vpop.permute.xlu0 %653 }
 0x212   : > { %3752 = vst [vmem:[#allocation47_spill] sm:$0xff] %v2840_v33  ;;  %3753 = vst [vmem:[#allocation48_spill] sm:$0xff] %v2842_v34  ;;  %v834_v33 = vmul.f32 2.0, %v2875_v16  ;;  %v2893_v34 = vld [vmem:[%s2653_s27 + $0x28] sm:$0x3] }
 0x213   : > { %713 = vrot.lane.b32.xlu0 %v2784_v11, %s2140_s25  ;;  %785 = vrot.lane.b32.xlu1 %v763_v31, %s2142_s9  ;;  %3759 = vst [vmem:[#allocation54_spill] sm:$0xff] %v2893_v34  ;;  %v1377_v29 = vmul.f32 2.0, %v2893_v34 }
 0x215   : > { %v2851_v10 = vpop.permute.xlu1 %659  ;;  %v2853_v14 = vpop.permute.xlu0 %657 }
 0x216   : > { %3754 = vst [vmem:[#allocation49_spill] sm:$0xff] %v2851_v10  ;;  %3755 = vst [vmem:[#allocation50_spill] sm:$0xff] %v2853_v14  ;;  %v764_v10 = vmul.f32 2.0, %v2555_v37 }
 0x217   : > { %855 = vrot.lane.b32.xlu0 %v833_v6, %s2142_s9  ;;  %1208 = vrot.lane.b32.xlu1 %v2849_v9, %s2140_s25 }
 0x219   : > { %v912_v21 = vpop.permute.xlu1 %911  ;;  %v2858_v22 = vpop.permute.xlu0 %711 }
 0x21a   : > { %3756 = vst [vmem:[#allocation51_spill] sm:$0xff] %v2858_v22 }
 0x21b   : > { %1260 = vrot.lane.b32.xlu0 %v2681_v59, %s2140_s25  ;;  %1324 = vrot.lane.b32.xlu1 %v2817_v23, %s2140_s25 }
 0x21d   : > { %v2868_v31 = vpop.permute.xlu1 %1524  ;;  %v914_v6 = vpop.permute.xlu0 %913 }
 0x21e   : > { %v942_v44 = vadd.f32 %v2558_v38, %v914_v6 }
 0x21f   : > { %1326 = vrot.lane.b32.xlu0 %v2820_v24, %s2140_s25  ;;  %1398 = vrot.lane.b32.xlu1 %v1376_v27, %s2142_s9 }
 0x221   : > { %v2877_v12 = vpop.permute.xlu1 %915  ;;  %v2879_v14 = vpop.permute.xlu0 %1526 }
 0x223   : > { %1468 = vrot.lane.b32.xlu0 %v1446_v17, %s2142_s9  ;;  %715 = vrot.lane.b32.xlu1 %v2838_v32, %s2140_s25 }
 0x225   : > { %v2886_v13 = vpop.permute.xlu1 %917  ;;  %v2888_v27 = vpop.permute.xlu0 %1528 }
 0x227   : > { %787 = vrot.lane.b32.xlu0 %v764_v10, %s2142_s9  ;;  %857 = vrot.lane.b32.xlu1 %v834_v33, %s2142_s9  ;;  %v1447_v33 = vmul.f32 2.0, %v2901_v20  ;;  %v2912_v10 = vld [vmem:[%s2542_s24 + $0x32] sm:$0xff] }
 0x228   : > { %3761 = vst [vmem:[#allocation56_spill] sm:$0xff] %v2912_v10  ;;  %v835_v53 = vmul.f32 2.0, %v2912_v10 }
 0x229   : > { %v974_v7 = vpop.permute.xlu1 %973  ;;  %v972_v17 = vpop.permute.xlu0 %971 }
 0x22b   : > { %1210 = vrot.lane.b32.xlu0 %v2893_v34, %s2140_s25  ;;  %1262 = vrot.lane.b32.xlu1 %v2692_v60, %s2140_s25 }
 0x22d   : > { %v2903_v8 = vpop.permute.xlu1 %1584  ;;  %v2905_v30 = vpop.permute.xlu0 %1530 }
 0x22f   : > { %1328 = vrot.lane.b32.xlu0 %v2866_v28, %s2140_s25  ;;  %1400 = vrot.lane.b32.xlu1 %v1377_v29, %s2142_s9 }
 0x231   : > { %v2914_v43 = vpop.permute.xlu1 %919  ;;  %v2916_v1 = vpop.permute.xlu0 %1586 }
 0x232   : > { %3762 = vst [vmem:[#allocation57_spill] sm:$0xff] %v2914_v43 }
 0x233   : > { %1470 = vrot.lane.b32.xlu0 %v1447_v33, %s2142_s9  ;;  %717 = vrot.lane.b32.xlu1 %v2875_v16, %s2140_s25  ;;  %v2934_v33 = vld [vmem:[%s2653_s27 + $0x30] sm:$0xff] }
 0x234   : > { %3765 = vst [vmem:[#allocation60_spill] sm:$0xff] %v2934_v33 }
 0x235   : > { %v2923_v4 = vpop.permute.xlu1 %1532  ;;  %v2925_v29 = vpop.permute.xlu0 %975 }
 0x236   : > { %3763 = vst [vmem:[#allocation58_spill] sm:$0xff] %v2923_v4  ;;  %v1378_v4 = vmul.f32 2.0, %v2934_v33 }
 0x237   : > { %789 = vrot.lane.b32.xlu0 %v765_v25, %s2142_s9  ;;  %859 = vrot.lane.b32.xlu1 %v835_v53, %s2142_s9  ;;  %v1448_v53 = vmul.f32 2.0, %v2942_v40 }
 0x239   : > { %v2929_v2 = vpop.permute.xlu1 %921  ;;  %v2931_v43 = vpop.permute.xlu0 %1588 }
 0x23a   : > { %3764 = vst [vmem:[#allocation59_spill] sm:$0xff] %v2929_v2  ;;  %v2953_v2 = vld [vmem:[%s2542_s24 + $0x3a] sm:$0x3] }
 0x23b   : > { %1212 = vrot.lane.b32.xlu0 %v2934_v33, %s2140_s25  ;;  %1264 = vrot.lane.b32.xlu1 %v2703_v61, %s2140_s25  ;;  %v952_v33 = vmul.f32 2.0, %v2595_v45 }
 0x23d   : > { %v2944_v5 = vpop.permute.xlu1 %1534  ;;  %v2946_v25 = vpop.permute.xlu0 %977  ;;  %v962_v26 = vadd.f32 %v952_v33, %v942_v44  ;;  %v1554_v33 = vadd.f32 %v2794_v15, %v2868_v31  ;;  %v1565_v31 = vmul.f32 2.0, %v2663_v57 }
 0x23e   : > { %3766 = vst [vmem:[#allocation61_spill] sm:$0xff] %v2944_v5  ;;  %v941_v5 = vadd.f32 %v2548_v36, %v912_v21 }
 0x23f   : > { %1330 = vrot.lane.b32.xlu0 %v2901_v20, %s2140_s25  ;;  %1402 = vrot.lane.b32.xlu1 %v1378_v4, %s2142_s9  ;;  %v766_v4 = vmul.f32 2.0, %v2565_v39  ;;  %v1002_v21 = vadd.f32 %v974_v7, %v962_v26  ;;  %v2979_v39 = vld [vmem:[%s2653_s27 + $0x38] sm:$0x3]  ;;  %v559_v26 = vld [vmem:[%s2542_s24 + $0x9] sm:$0x3] }
 0x240   : > { %v961_v61 = vadd.f32 %v951_v52, %v941_v5  ;;  %3773 = vst [vmem:[#allocation68_spill] sm:$0xff] %v2979_v39  ;;  %v1379_v44 = vmul.f32 2.0, %v2979_v39  ;;  %v2987_v52 = vld [vmem:[%s2653_s27 + $0x3a] sm:$0x3] }
 0x241   : > { %v2955_v54 = vpop.permute.xlu1 %923  ;;  %v2957_v51 = vpop.permute.xlu0 %1590  ;;  %3774 = vst [vmem:[#allocation69_spill] sm:$0xff] %v2987_v52 }
 0x242   : > { %3767 = vst [vmem:[#allocation62_spill] sm:$0xff] %v2955_v54  ;;  %3768 = vst [vmem:[#allocation63_spill] sm:$0xff] %v2957_v51  ;;  %v836_v54 = vmul.f32 2.0, %v2953_v2  ;;  %v1001_v6 = vadd.f32 %v972_v17, %v961_v61  ;;  %v558_v17 = vld [vmem:[%s2542_s24 + $0x1] sm:$0xff] }
 0x243   : > { %1472 = vrot.lane.b32.xlu0 %v1448_v53, %s2142_s9  ;;  %719 = vrot.lane.b32.xlu1 %v2912_v10, %s2140_s25 }
 0x244   : > { %v1011_v61 = vadd.f32 %v2645_v55, %v1001_v6 }
 0x245   : > { %v2968_v20 = vpop.permute.xlu1 %1536  ;;  %v2970_v51 = vpop.permute.xlu0 %979 }
 0x246   : > { %3769 = vst [vmem:[#allocation64_spill] sm:$0xff] %v2968_v20  ;;  %3770 = vst [vmem:[#allocation65_spill] sm:$0xff] %v2970_v51  ;;  %v1925_v20 = vld [vmem:[%s2542_s24 + $0x29] sm:$0x3]  ;;  %v1555_v51 = vadd.f32 %v2804_v18, %v2879_v14 }
 0x247   : > { %791 = vrot.lane.b32.xlu0 %v766_v4, %s2142_s9  ;;  %861 = vrot.lane.b32.xlu1 %v836_v54, %s2142_s9  ;;  %v1012_v54 = vadd.f32 %v2784_v11, %v1002_v21  ;;  %v1564_v4 = vmul.f32 2.0, %v2656_v56  ;;  %v1449_v21 = vmul.f32 2.0, %v2987_v52 }
 0x248   : > { %v1575_v14 = vadd.f32 %v1565_v31, %v1555_v51  ;;  %v943_v51 = vadd.f32 %v2545_v35, %v2877_v12 }
 0x249   : > { %v2974_v53 = vpop.permute.xlu1 %925  ;;  %v2976_v10 = vpop.permute.xlu0 %1592  ;;  %v1022_v6 = vadd.f32 %v1012_v54, %v559_v26 }
 0x24a   : > { %3771 = vst [vmem:[#allocation66_spill] sm:$0xff] %v2974_v53  ;;  %3772 = vst [vmem:[#allocation67_spill] sm:$0xff] %v2976_v10  ;;  %v3005_v53 = vld [vmem:[%s2542_s24 + $0x42] sm:$0xff] }
 0x24b   : > { %1214 = vrot.lane.b32.xlu0 %v2979_v39, %s2140_s25  ;;  %1266 = vrot.lane.b32.xlu1 %v2714_v62, %s2140_s25  ;;  %3777 = vst [vmem:[#allocation72_spill] sm:$0xff] %v3005_v53  ;;  %v1574_v39 = vadd.f32 %v1564_v4, %v1554_v33  ;;  %v837_v54 = vmul.f32 2.0, %v3005_v53  ;;  %v1615_v4 = vadd.f32 %v2916_v1, %v1575_v14 }
 0x24d   : > { %v2991_v5 = vpop.permute.xlu1 %1538  ;;  %v2993_v7 = vpop.permute.xlu0 %981  ;;  %v1625_v1 = vadd.f32 %v2820_v24, %v1615_v4 }
 0x24e   : > { %3775 = vst [vmem:[#allocation70_spill] sm:$0xff] %v2991_v5  ;;  %3776 = vst [vmem:[#allocation71_spill] sm:$0xff] %v2993_v7  ;;  %v1021_v5 = vadd.f32 %v1011_v61, %v558_v17  ;;  %v1032_v61 = vsub.f32 %v1022_v6, %v1925_v20  ;;  %v1614_v17 = vadd.f32 %v2903_v8, %v1574_v39  ;;  %v953_v6 = vmul.f32 2.0, %v2608_v48 }
 0x24f   : > { %1332 = vrot.lane.b32.xlu0 %v2942_v40, %s2140_s25  ;;  %1404 = vrot.lane.b32.xlu1 %v1379_v44, %s2142_s9  ;;  %v767_v44 = vmul.f32 2.0, %v2578_v42 }
 0x250   : > { %v1031_v26 = vsub.f32 %v1021_v5, %v2608_v48  ;;  %v1624_v33 = vadd.f32 %v2817_v23, %v1614_v17  ;;  %v1072_v8 = vand.u32 2147483647, %v1032_v61  ;;  %v1174_v61 = vld [vmem:[%s2653_s27 + $0x9] sm:$0x3]  ;;  %v963_v17 = vadd.f32 %v953_v6, %v943_v51 }
 0x251   : > { %v3007_v10 = vpop.permute.xlu1 %927  ;;  %v3009_v7 = vpop.permute.xlu0 %1594 }
 0x252   : > { %3778 = vst [vmem:[#allocation73_spill] sm:$0xff] %v3007_v10  ;;  %3779 = vst [vmem:[#allocation74_spill] sm:$0xff] %v3009_v7  ;;  %v1071_v39 = vand.u32 2147483647, %v1031_v26  ;;  %v3047_v26 = vld [vmem:[%s2653_s27 + $0x40] sm:$0xff]  ;;  %v1003_v4 = vadd.f32 %v2925_v29, %v963_v17  ;;  %v1556_v17 = vadd.f32 %v2849_v9, %v2888_v27  ;;  %v768_v27 = vmul.f32 2.0, %v2575_v41 }
 0x253   : > { %1474 = vrot.lane.b32.xlu0 %v1449_v21, %s2142_s9  ;;  %721 = vrot.lane.b32.xlu1 %v2953_v2, %s2140_s25  ;;  %v1173_v21 = vld [vmem:[%s2653_s27 + $0x1] sm:$0xff]  ;;  %3785 = vst [vmem:[#allocation80_spill] sm:$0xff] %v3047_v26  ;;  %v1380_v12 = vmul.f32 2.0, %v3047_v26  ;;  %v3216_v41 = vld [vmem:[%s2653_s27 + $0x50] sm:$0xff] }
 0x254   : > { %v1634_v31 = vadd.f32 %v1624_v33, %v1173_v21  ;;  %v1635_v33 = vadd.f32 %v1625_v1, %v1174_v61  ;;  %v1967_v21 = vld [vmem:[%s2653_s27 + $0x29] sm:$0x3] }
 0x255   : > { %v3022_v10 = vpop.permute.xlu1 %1540  ;;  %v3024_v7 = vpop.permute.xlu0 %983 }
 0x256   : > { %3780 = vst [vmem:[#allocation75_spill] sm:$0xff] %v3022_v10  ;;  %v1644_v14 = vsub.f32 %v1634_v31, %v2670_v58  ;;  %v1645_v6 = vsub.f32 %v1635_v33, %v1967_v21  ;;  %v1013_v31 = vadd.f32 %v2838_v32, %v1003_v4  ;;  %v3084_v21 = vld [vmem:[%s2542_s24 + $0x4a] sm:$0x3] }
 0x257   : > { %793 = vrot.lane.b32.xlu0 %v767_v44, %s2142_s9  ;;  %863 = vrot.lane.b32.xlu1 %v837_v54, %s2142_s9  ;;  %3792 = vst [vmem:[#allocation87_spill] sm:$0xff] %v3084_v21 }
 0x258   : > { %v1684_v61 = vand.u32 2147483647, %v1644_v14  ;;  %v1685_v4 = vand.u32 2147483647, %v1645_v6  ;;  %v838_v14 = vmul.f32 2.0, %v3084_v21 }
 0x259   : > { %v3030_v20 = vpop.permute.xlu1 %929  ;;  %v3032_v5 = vpop.permute.xlu0 %1596 }
 0x25a   : > { %3781 = vst [vmem:[#allocation76_spill] sm:$0xff] %v3030_v20  ;;  %3782 = vst [vmem:[#allocation77_spill] sm:$0xff] %v3032_v5 }
 0x25b   : > { %1091 = vrot.lane.b32.xlu0 %v1071_v39, %s2142_s9  ;;  %1093 = vrot.lane.b32.xlu1 %v1072_v8, %s2142_s9 }
 0x25d   : > { %v3041_v44 = vpop.permute.xlu1 %1542  ;;  %v3043_v54 = vpop.permute.xlu0 %985 }
 0x25e   : > { %3783 = vst [vmem:[#allocation78_spill] sm:$0xff] %v3041_v44  ;;  %3784 = vst [vmem:[#allocation79_spill] sm:$0xff] %v3043_v54  ;;  %v3062_v44 = vld [vmem:[%s2653_s27 + $0x42] sm:$0xff] }
 0x25f   : > { %1216 = vrot.lane.b32.xlu0 %v3047_v26, %s2140_s25  ;;  %1268 = vrot.lane.b32.xlu1 %v2725_v63, %s2140_s25  ;;  %3788 = vst [vmem:[#allocation83_spill] sm:$0xff] %v3062_v44  ;;  %v1450_v51 = vmul.f32 2.0, %v3062_v44 }
 0x261   : > { %v3056_v39 = vpop.permute.xlu1 %987  ;;  %v3058_v8 = vpop.permute.xlu0 %1598 }
 0x262   : > { %3786 = vst [vmem:[#allocation81_spill] sm:$0xff] %v3056_v39  ;;  %3787 = vst [vmem:[#allocation82_spill] sm:$0xff] %v3058_v8  ;;  %v1566_v39 = vmul.f32 2.0, %v2670_v58 }
 0x263   : > { %1334 = vrot.lane.b32.xlu0 %v2987_v52, %s2140_s25  ;;  %1406 = vrot.lane.b32.xlu1 %v1380_v12, %s2142_s9  ;;  %v1023_v12 = vadd.f32 %v2598_v46, %v1013_v31  ;;  %v1176_v52 = vld [vmem:[%s2653_s27 + $0x19] sm:$0x3] }
 0x265   : > { %v3069_v1 = vpop.permute.xlu1 %989  ;;  %v3071_v29 = vpop.permute.xlu0 %1600  ;;  %v1033_v46 = vsub.f32 %v1023_v12, %v2618_v50 }
 0x266   : > { %3789 = vst [vmem:[#allocation84_spill] sm:$0xff] %v3069_v1  ;;  %3790 = vst [vmem:[#allocation85_spill] sm:$0xff] %v3071_v29  ;;  %v1576_v1 = vadd.f32 %v1566_v39, %v1556_v17  ;;  %v944_v39 = vadd.f32 %v2555_v37, %v2886_v13 }
 0x267   : > { %1476 = vrot.lane.b32.xlu0 %v1450_v51, %s2142_s9  ;;  %1704 = vrot.lane.b32.xlu1 %v1684_v61, %s2142_s9  ;;  %v954_v61 = vmul.f32 2.0, %v2605_v47 }
 0x268   : > { %v1616_v51 = vadd.f32 %v2931_v43, %v1576_v1  ;;  %v1073_v43 = vand.u32 2147483647, %v1033_v46  ;;  %v3103_v1 = vld [vmem:[%s2653_s27 + $0x48] sm:$0x3] }
 0x269   : > { %v3079_v20 = vpop.permute.xlu1 %1254  ;;  %v3081_v33 = vpop.permute.xlu0 %1602  ;;  %3793 = vst [vmem:[#allocation88_spill] sm:$0xff] %v3103_v1  ;;  %v964_v8 = vadd.f32 %v954_v61, %v944_v39 }
 0x26a   : > { %3791 = vst [vmem:[#allocation86_spill] sm:$0xff] %v3081_v33 }
 0x26b   : > { %1706 = vrot.lane.b32.xlu0 %v1685_v4, %s2142_s9  ;;  %723 = vrot.lane.b32.xlu1 %v3005_v53, %s2140_s25  ;;  %v1626_v4 = vadd.f32 %v2866_v28, %v1616_v51  ;;  %v3796_v28 = vld [vmem:[#allocation28_spill] sm:$0xff] }
 0x26c   : > { %v3151_v54 = vmul.f32 2.0, %v3796_v28 }
 0x26d   : > { %v3093_v31 = vpop.permute.xlu0 %1256  ;;  %v782_v6 = vpop.permute.xlu1 %781 }
 0x26e   : > { %v811_v17 = vadd.f32 %v2548_v36, %v782_v6 }
 0x26f   : > { %795 = vrot.lane.b32.xlu0 %v768_v27, %s2142_s9  ;;  %865 = vrot.lane.b32.xlu1 %v838_v14, %s2142_s9  ;;  %v1636_v27 = vadd.f32 %v2656_v56, %v1626_v4  ;;  %v1004_v14 = vadd.f32 %v2946_v25, %v964_v8  ;;  %v1557_v4 = vadd.f32 %v2893_v34, %v2905_v30  ;;  %v3148_v30 = vmul.f32 2.0, %v2615_v49  ;;  %v3798_v49 = vld [vmem:[#allocation20_spill] sm:$0xff] }
 0x270   : > { %v3110_v13 = vadd.f32 %v811_v17, %v2759_v3  ;;  %v561_v17 = vld [vmem:[%s2542_s24 + $0x19] sm:$0x3] }
 0x271   : > { %v784_v12 = vpop.permute.xlu0 %783  ;;  %v852_v33 = vpop.permute.xlu1 %851  ;;  %v1646_v25 = vsub.f32 %v1636_v27, %v2692_v60  ;;  %v1014_v8 = vadd.f32 %v2875_v16, %v1004_v14  ;;  %v955_v27 = vmul.f32 2.0, %v2618_v50  ;;  %v672_v14 = vsub.f32 %v2595_v45, %v2806_v19  ;;  %v1927_v16 = vld [vmem:[%s2542_s24 + $0x39] sm:$0x3] }
 0x272   : > { %v881_v29 = vadd.f32 %v2645_v55, %v852_v33  ;;  %3794 = vst [vmem:[#allocation89_spill] sm:$0xff] %v3110_v13  ;;  %v3120_v55 = vld [vmem:[%s2653_s27 + $0x4a] sm:$0x3]  ;;  %v3797_v45 = vld [vmem:[#allocation44_spill] sm:$0xff] }
 0x273   : > { %1095 = vrot.lane.b32.xlu0 %v1073_v43, %s2142_s9  ;;  %1218 = vrot.lane.b32.xlu1 %v3103_v1, %s2140_s25  ;;  %v1451_v6 = vmul.f32 2.0, %v3120_v55  ;;  %v1567_v43 = vmul.f32 2.0, %v2681_v59  ;;  %v1024_v33 = vadd.f32 %v1014_v8, %v561_v17  ;;  %v1686_v3 = vand.u32 2147483647, %v1646_v25  ;;  %v3799_v17 = vld [vmem:[#allocation23_spill] sm:$0xff]  ;;  %v3803_v59 = vld [vmem:[#allocation25_spill] sm:$0xff] }
 0x274   : > { %v3113_v36 = vadd.f32 %v881_v29, %v2858_v22  ;;  %v1381_v29 = vmul.f32 2.0, %v3103_v1  ;;  %v673_v19 = vsub.f32 %v2608_v48, %v3797_v45  ;;  %v769_v25 = vmul.f32 2.0, %v3798_v49  ;;  %v3800_v45 = vld [vmem:[#allocation63_spill] sm:$0xff] }
 0x275   : > { %v854_v46 = vpop.permute.xlu0 %853  ;;  %v3117_v51 = vpop.permute.xlu1 %1204  ;;  %v1577_v8 = vadd.f32 %v1567_v43, %v1557_v4  ;;  %v1034_v43 = vsub.f32 %v1024_v33, %v1927_v16  ;;  %v3184_v1 = vmul.f32 2.0, %v3803_v59  ;;  %v3807_v16 = vld [vmem:[#allocation35_spill] sm:$0xff]  ;;  %v3811_v59 = vld [vmem:[#allocation60_spill] sm:$0xff] }
 0x276   : > { %3795 = vst [vmem:[#allocation90_spill] sm:$0xff] %v3113_v36  ;;  %v1568_v36 = vmul.f32 2.0, %v2692_v60  ;;  %v3166_v60 = vmul.f32 2.0, %v3799_v17  ;;  %v622_v33 = vsub.f32 %v2558_v38, %v3807_v16  ;;  %3818 = vst [vmem:[#allocation35_spill] sm:$0xff] %v3216_v41 }
 0x277   : > { %1270 = vrot.lane.b32.xlu0 %v2736_v0, %s2140_s25  ;;  %1336 = vrot.lane.b32.xlu1 %v3062_v44, %s2140_s25  ;;  %v3801_v44 = vld [vmem:[#allocation22_spill] sm:$0xff]  ;;  %3804 = vst [vmem:[#allocation44_spill] sm:$0xff] %v3184_v1 }
 0x278   : > { %v3179_v50 = vmul.f32 2.0, %v3801_v44  ;;  %v683_v44 = vmul.f32 2.0, %v673_v19  ;;  %v882_v19 = vadd.f32 %v2784_v11, %v854_v46 }
 0x279   : > { %v3132_v39 = vpop.permute.xlu0 %1206  ;;  %v3134_v61 = vpop.permute.xlu1 %1258 }
 0x27a   : > { %3802 = vst [vmem:[#allocation28_spill] sm:$0xff] %v3179_v50  ;;  %v3810_v50 = vld [vmem:[#allocation58_spill] sm:$0xff] }
 0x27b   : > { %1408 = vrot.lane.b32.xlu0 %v1381_v29, %s2142_s9  ;;  %1478 = vrot.lane.b32.xlu1 %v1451_v6, %s2142_s9  ;;  %v3154_v29 = vld [vmem:[%s2542_s24 + $0x52] sm:$0xff]  ;;  %v1558_v1 = vadd.f32 %v3811_v59, %v3810_v50 }
 0x27c   : > { %v839_v28 = vmul.f32 2.0, %v3154_v29  ;;  %v3817_v50 = vld [vmem:[#allocation55_spill] sm:$0xff] }
 0x27d   : > { %v1395_v13 = vpop.permute.xlu0 %1394  ;;  %v1397_v22 = vpop.permute.xlu1 %1396 }
 0x27e   : > { %v1424_v6 = vadd.f32 %v2794_v15, %v1395_v13  ;;  %v1425_v34 = vadd.f32 %v2804_v18, %v1397_v22  ;;  %v3169_v13 = vmul.f32 2.0, %v2714_v62  ;;  %v3187_v62 = vmul.f32 2.0, %v2725_v63  ;;  %v3812_v63 = vld [vmem:[#allocation32_spill] sm:$0xff] }
 0x27f   : > { %1708 = vrot.lane.b32.xlu0 %v1686_v3, %s2142_s9  ;;  %725 = vrot.lane.b32.xlu1 %v3084_v21, %s2140_s25  ;;  %v682_v3 = vmul.f32 2.0, %v672_v14  ;;  %v1617_v21 = vadd.f32 %v3800_v45, %v1577_v8  ;;  %v3808_v14 = vld [vmem:[#allocation57_spill] sm:$0xff] }
 0x280   : > { %v3172_v22 = vadd.f32 %v1424_v6, %v3117_v51  ;;  %v3175_v4 = vadd.f32 %v1425_v34, %v3132_v39  ;;  %3805 = vst [vmem:[#allocation23_spill] sm:$0xff] %v3187_v62  ;;  %v3190_v6 = vmul.f32 2.0, %v2736_v0  ;;  %v812_v34 = vadd.f32 %v2558_v38, %v784_v12  ;;  %v3809_v8 = vld [vmem:[#allocation17_spill] sm:$0xff]  ;;  %v3814_v38 = vld [vmem:[#allocation24_spill] sm:$0xff] }
 0x281   : > { %v1465_v10 = vpop.permute.xlu0 %1464  ;;  %v3181_v49 = vpop.permute.xlu1 %1466  ;;  %v945_v45 = vadd.f32 %v3809_v8, %v3808_v14  ;;  %v623_v0 = vsub.f32 %v2545_v35, %v3812_v63  ;;  %v3206_v62 = vmul.f32 2.0, %v3814_v38  ;;  %v692_v5 = vadd.f32 %v682_v3, %v622_v33  ;;  %v3816_v14 = vld [vmem:[#allocation43_spill] sm:$0xff] }
 0x282   : > { %3806 = vst [vmem:[#allocation63_spill] sm:$0xff] %v3190_v6  ;;  %v1627_v59 = vadd.f32 %v3817_v50, %v1617_v21  ;;  %v822_v6 = vadd.f32 %v812_v34, %v3807_v16  ;;  %v1286_v38 = vsub.f32 %v2670_v58, %v3134_v61  ;;  %v1578_v21 = vadd.f32 %v1568_v36, %v1558_v1  ;;  %v3819_v50 = vld [vmem:[#allocation59_spill] sm:$0xff]  ;;  %v3820_v34 = vld [vmem:[#allocation16_spill] sm:$0xff]  ;;  %v3823_v36 = vld [vmem:[#allocation65_spill] sm:$0xff] }
 0x283   : > { %797 = vrot.lane.b32.xlu0 %v769_v25, %s2142_s9  ;;  %867 = vrot.lane.b32.xlu1 %v839_v28, %s2142_s9  ;;  %3815 = vst [vmem:[#allocation22_spill] sm:$0xff] %v3206_v62  ;;  %v1074_v28 = vand.u32 2147483647, %v1034_v43  ;;  %v3222_v33 = vadd.f32 %v683_v44, %v623_v0  ;;  %v965_v8 = vadd.f32 %v955_v27, %v945_v45  ;;  %v1382_v43 = vmul.f32 2.0, %v3216_v41  ;;  %v3821_v0 = vld [vmem:[#allocation61_spill] sm:$0xff]  ;;  %v3822_v44 = vld [vmem:[#allocation68_spill] sm:$0xff] }
 0x284   : > { %v946_v16 = vadd.f32 %v3820_v34, %v3819_v50  ;;  %v1284_v61 = vsub.f32 %v2656_v56, %v3079_v20  ;;  %v1559_v27 = vadd.f32 %v3822_v44, %v3821_v0  ;;  %v1969_v45 = vld [vmem:[%s2653_s27 + $0x39] sm:$0x3]  ;;  %v1637_v1 = vadd.f32 %v1627_v59, %v1176_v52  ;;  %v3824_v20 = vld [vmem:[#allocation62_spill] sm:$0xff]  ;;  %v3828_v0 = vld [vmem:[#allocation67_spill] sm:$0xff] }
 0x285   : > { %v714_v25 = vpop.permute.xlu0 %713  ;;  %v3212_v53 = vpop.permute.xlu1 %785  ;;  %v3239_v12 = vld [vmem:[%s2653_s27 + $0x52] sm:$0xff]  ;;  %v1296_v50 = vmul.f32 2.0, %v1286_v38  ;;  %v1285_v52 = vsub.f32 %v2663_v57, %v3093_v31  ;;  %v1494_v38 = vadd.f32 %v2817_v23, %v1465_v10  ;;  %v1618_v57 = vadd.f32 %v3828_v0, %v1578_v21 }
 0x286   : > { %v742_v46 = vsub.f32 %v2784_v11, %v714_v25  ;;  %v892_v3 = vadd.f32 %v882_v19, %v714_v25  ;;  %v1005_v25 = vadd.f32 %v3823_v36, %v965_v8  ;;  %v1294_v8 = vmul.f32 2.0, %v1284_v61  ;;  %v3829_v10 = vld [vmem:[#allocation19_spill] sm:$0xff] }
 0x287   : > { %1097 = vrot.lane.b32.xlu0 %v1074_v28, %s2142_s9  ;;  %1220 = vrot.lane.b32.xlu1 %v3216_v41, %s2140_s25  ;;  %v1234_v28 = vsub.f32 %v2794_v15, %v3117_v51  ;;  %v3826_v15 = vld [vmem:[#allocation31_spill] sm:$0xff]  ;;  %v1452_v51 = vmul.f32 2.0, %v3239_v12  ;;  %v1235_v31 = vsub.f32 %v2804_v18, %v3132_v39  ;;  %v1295_v21 = vmul.f32 2.0, %v1285_v52  ;;  %v3831_v52 = vld [vmem:[#allocation74_spill] sm:$0xff] }
 0x288   : > { %v752_v11 = vadd.f32 %v742_v46, %v692_v5  ;;  %v902_v19 = vsub.f32 %v822_v6, %v892_v3  ;;  %v947_v5 = vadd.f32 %v2578_v42, %v3824_v20  ;;  %v3825_v6 = vld [vmem:[#allocation64_spill] sm:$0xff]  ;;  %v1647_v3 = vsub.f32 %v1637_v1, %v1969_v45 }
 0x289   : > { %v856_v62 = vpop.permute.xlu0 %855  ;;  %v1209_v41 = vpop.permute.xlu1 %1208  ;;  %v1560_v59 = vadd.f32 %v3047_v26, %v3825_v6  ;;  %v1304_v6 = vadd.f32 %v1294_v8, %v1234_v28  ;;  %v1579_v45 = vadd.f32 %v3151_v54, %v1559_v27  ;;  %v1305_v54 = vadd.f32 %v1295_v21, %v1235_v31 }
 0x28a   : > { %v1042_v34 = vand.u32 2147483647, %v752_v11  ;;  %v1052_v37 = vand.u32 2147483647, %v902_v19  ;;  %v1236_v56 = vsub.f32 %v2849_v9, %v1209_v41  ;;  %v3827_v11 = vld [vmem:[#allocation56_spill] sm:$0xff]  ;;  %v967_v1 = vadd.f32 %v3166_v60, %v947_v5 }
 0x28b   : > { %1272 = vrot.lane.b32.xlu0 %v3826_v15, %s2140_s25  ;;  %1338 = vrot.lane.b32.xlu1 %v3120_v55, %s2140_s25  ;;  %v1015_v19 = vadd.f32 %v3827_v11, %v1005_v25  ;;  %v1580_v18 = vadd.f32 %v3169_v13, %v1560_v59  ;;  %v1687_v28 = vand.u32 2147483647, %v1647_v3  ;;  %v3830_v59 = vld [vmem:[#allocation71_spill] sm:$0xff] }
 0x28c   : > { %v3254_v46 = vadd.f32 %v1296_v50, %v1236_v56  ;;  %v3256_v42 = vadd.f32 %v1052_v37, %v1042_v34  ;;  %v770_v50 = vmul.f32 2.0, %v3829_v10  ;;  %v966_v37 = vadd.f32 %v3148_v30, %v946_v16  ;;  %v3278_v34 = vld [vmem:[%s2542_s24 + $0x5a] sm:$0x3] }
 0x28d   : > { %v3262_v36 = vpop.permute.xlu0 %1260  ;;  %v1325_v20 = vpop.permute.xlu1 %1324  ;;  %v1025_v30 = vadd.f32 %v2608_v48, %v1015_v19  ;;  %v1628_v16 = vadd.f32 %v2942_v40, %v1618_v57 }
 0x28e   : > { %v1354_v61 = vsub.f32 %v2817_v23, %v1325_v20  ;;  %v1504_v26 = vadd.f32 %v1494_v38, %v1325_v20  ;;  %v1495_v23 = vadd.f32 %v2820_v24, %v3181_v49  ;;  %v1006_v49 = vadd.f32 %v3830_v59, %v966_v37  ;;  %v563_v37 = vld [vmem:[%s2542_s24 + $0x29] sm:$0x3] }
 0x28f   : > { %1410 = vrot.lane.b32.xlu0 %v1382_v43, %s2142_s9  ;;  %1480 = vrot.lane.b32.xlu1 %v1452_v51, %s2142_s9  ;;  %v1619_v51 = vadd.f32 %v3831_v52, %v1579_v45  ;;  %v1035_v3 = vsub.f32 %v1025_v30, %v3799_v17  ;;  %v1638_v57 = vadd.f32 %v2670_v58, %v1628_v16  ;;  %v3834_v58 = vld [vmem:[#allocation18_spill] sm:$0xff]  ;;  %v3835_v45 = vld [vmem:[#allocation69_spill] sm:$0xff]  ;;  %v3844_v52 = vld [vmem:[#allocation15_spill] sm:$0xff] }
 0x290   : > { %v1364_v39 = vadd.f32 %v1354_v61, %v1304_v6  ;;  %v1514_v25 = vsub.f32 %v3172_v22, %v1504_v26  ;;  %v813_v26 = vadd.f32 %v2545_v35, %v3212_v53  ;;  %v840_v22 = vmul.f32 2.0, %v3278_v34  ;;  %v3833_v61 = vld [vmem:[#allocation66_spill] sm:$0xff] }
 0x291   : > { %v1327_v27 = vpop.permute.xlu0 %1326  ;;  %v1399_v60 = vpop.permute.xlu1 %1398  ;;  %v1007_v35 = vadd.f32 %v3024_v7, %v967_v1  ;;  %v3832_v17 = vsub.f32 %v2605_v47, %v3816_v14  ;;  %v1016_v7 = vadd.f32 %v2953_v2, %v1006_v49  ;;  %v948_v10 = vadd.f32 %v3834_v58, %v3833_v61  ;;  %v1178_v47 = vld [vmem:[%s2653_s27 + $0x29] sm:$0x3]  ;;  %v3836_v14 = vld [vmem:[#allocation72_spill] sm:$0xff]  ;;  %v3842_v49 = vld [vmem:[#allocation73_spill] sm:$0xff] }
 0x292   : > { %v1654_v43 = vand.u32 2147483647, %v1364_v39  ;;  %v1664_v56 = vand.u32 2147483647, %v1514_v25  ;;  %v1355_v13 = vsub.f32 %v2820_v24, %v1327_v27  ;;  %v1505_v5 = vadd.f32 %v1495_v23, %v1327_v27  ;;  %v3837_v39 = vld [vmem:[#allocation77_spill] sm:$0xff]  ;;  %v3838_v27 = vld [vmem:[#allocation70_spill] sm:$0xff] }
 0x293   : > { %v1426_v48 = vadd.f32 %v2849_v9, %v1399_v60  ;;  %1710 = vrot.lane.b32.xlu0 %v1687_v28, %s2142_s9  ;;  %727 = vrot.lane.b32.xlu1 %v3154_v29, %s2140_s25  ;;  %v883_v9 = vadd.f32 %v2838_v32, %v856_v62  ;;  %v684_v6 = vmul.f32 2.0, %v3832_v17  ;;  %v823_v62 = vadd.f32 %v813_v26, %v3812_v63  ;;  %v3318_v25 = vld [vmem:[%s2653_s27 + $0x58] sm:$0x3]  ;;  %v3850_v17 = vld [vmem:[#allocation21_spill] sm:$0xff]  ;;  %v3351_v61 = vld [vmem:[%s2653_s27 + $0x5a] sm:$0x3] }
 0x294   : > { %v1365_v8 = vadd.f32 %v1355_v13, %v1305_v54  ;;  %v1515_v24 = vsub.f32 %v3175_v4, %v1505_v5  ;;  %v3291_v38 = vadd.f32 %v1664_v56, %v1654_v43  ;;  %v1629_v1 = vadd.f32 %v3835_v45, %v1619_v51  ;;  %v3839_v60 = vld [vmem:[#allocation88_spill] sm:$0xff]  ;;  %v3841_v5 = vld [vmem:[#allocation29_spill] sm:$0xff]  ;;  %v3845_v51 = vld [vmem:[#allocation34_spill] sm:$0xff] }
 0x295   : > { %v3296_v53 = vadd.f32 %v1426_v48, %v1209_v41  ;;  %v1469_v19 = vpop.permute.xlu0 %1468  ;;  %v716_v0 = vpop.permute.xlu1 %715  ;;  %v1017_v23 = vadd.f32 %v3836_v14, %v1007_v35  ;;  %v1620_v63 = vadd.f32 %v3837_v39, %v1580_v18  ;;  %v1075_v54 = vand.u32 2147483647, %v1035_v3  ;;  %v3843_v26 = vld [vmem:[#allocation20_spill] sm:$0xff] }
 0x296   : > { %v1655_v31 = vand.u32 2147483647, %v1365_v8  ;;  %v1665_v20 = vand.u32 2147483647, %v1515_v24  ;;  %v743_v4 = vsub.f32 %v2838_v32, %v716_v0  ;;  %v893_v41 = vadd.f32 %v883_v9, %v716_v0  ;;  %v1929_v24 = vld [vmem:[%s2542_s24 + $0x49] sm:$0x3] }
 0x297   : > { %799 = vrot.lane.b32.xlu0 %v770_v50, %s2142_s9  ;;  %869 = vrot.lane.b32.xlu1 %v840_v22, %s2142_s9  ;;  %v1561_v28 = vadd.f32 %v3839_v60, %v3838_v27  ;;  %v1383_v13 = vmul.f32 2.0, %v3318_v25  ;;  %v1648_v18 = vsub.f32 %v1638_v57, %v3841_v5  ;;  %v1026_v59 = vadd.f32 %v1016_v7, %v563_v37  ;;  %v3847_v35 = vld [vmem:[#allocation28_spill] sm:$0xff]  ;;  %v1971_v57 = vld [vmem:[%s2653_s27 + $0x49] sm:$0x3] }
 0x298   : > { %v753_v32 = vadd.f32 %v743_v4, %v3222_v33  ;;  %v3312_v21 = vadd.f32 %v1665_v20, %v1655_v31  ;;  %v903_v50 = vsub.f32 %v823_v62, %v893_v41  ;;  %v3840_v33 = vld [vmem:[#allocation26_spill] sm:$0xff]  ;;  %v949_v48 = vadd.f32 %v3843_v26, %v3842_v49  ;;  %v3848_v31 = vld [vmem:[#allocation75_spill] sm:$0xff]  ;;  %v3855_v27 = vld [vmem:[#allocation44_spill] sm:$0xff] }
 0x299   : > { %v788_v30 = vpop.permute.xlu0 %787  ;;  %v3320_v16 = vpop.permute.xlu1 %857  ;;  %v1287_v43 = vsub.f32 %v3840_v33, %v3262_v36  ;;  %v3846_v8 = vsub.f32 %v3844_v52, %v3845_v51  ;;  %v3339_v3 = vadd.f32 %v1629_v1, %v1178_v47  ;;  %v968_v9 = vadd.f32 %v3847_v35, %v948_v10  ;;  %v3849_v20 = vld [vmem:[#allocation35_spill] sm:$0xff]  ;;  %v3856_v5 = vld [vmem:[#allocation82_spill] sm:$0xff]  ;;  %v3373_v52 = vld [vmem:[%s2542_s24 + $0x58] sm:$0x3] }
 0x29a   : > { %v1043_v56 = vand.u32 2147483647, %v753_v32  ;;  %v1053_v22 = vand.u32 2147483647, %v903_v50  ;;  %v1573_v0 = vmul.f32 2.0, %v3826_v15  ;;  %v1562_v4 = vadd.f32 %v3849_v20, %v3848_v31  ;;  %v3851_v62 = vld [vmem:[#allocation83_spill] sm:$0xff] }
 0x29b   : > { %1099 = vrot.lane.b32.xlu0 %v1075_v54, %s2142_s9  ;;  %1222 = vrot.lane.b32.xlu1 %v3318_v25, %s2140_s25  ;;  %v3336_v36 = vadd.f32 %v684_v6, %v3846_v8  ;;  %v3347_v7 = vadd.f32 %v3850_v17, %v1017_v23  ;;  %v1630_v41 = vadd.f32 %v3851_v62, %v1620_v63  ;;  %v3852_v1 = vld [vmem:[#allocation23_spill] sm:$0xff]  ;;  %v1297_v15 = vmul.f32 2.0, %v1287_v43  ;;  %v3853_v32 = vld [vmem:[#allocation54_spill] sm:$0xff]  ;;  %v3857_v43 = vld [vmem:[#allocation52_spill] sm:$0xff] }
 0x29c   : > { %v3355_v37 = vadd.f32 %v1053_v22, %v1043_v56  ;;  %v1581_v10 = vadd.f32 %v3852_v1, %v1561_v28  ;;  %v1453_v39 = vmul.f32 2.0, %v3351_v61  ;;  %v1036_v50 = vsub.f32 %v1026_v59, %v1929_v24  ;;  %v3854_v23 = vld [vmem:[#allocation79_spill] sm:$0xff]  ;;  %v3858_v59 = vld [vmem:[#allocation25_spill] sm:$0xff] }
 0x29d   : > { %v1211_v6 = vpop.permute.xlu0 %1210  ;;  %v3353_v58 = vpop.permute.xlu1 %1262  ;;  %v1008_v54 = vadd.f32 %v3854_v23, %v968_v9  ;;  %v969_v63 = vadd.f32 %v3855_v27, %v949_v48  ;;  %v1688_v33 = vand.u32 2147483647, %v1648_v18  ;;  %v1649_v56 = vsub.f32 %v3339_v3, %v1971_v57  ;;  %v3859_v48 = vld [vmem:[#allocation76_spill] sm:$0xff]  ;;  %v3860_v24 = vld [vmem:[#allocation27_spill] sm:$0xff]  ;;  %v3862_v57 = vld [vmem:[#allocation78_spill] sm:$0xff] }
 0x29e   : > { %v1237_v47 = vsub.f32 %v3853_v32, %v1211_v6  ;;  %v1621_v28 = vadd.f32 %v3856_v5, %v1581_v10  ;;  %v1496_v49 = vadd.f32 %v3857_v43, %v1469_v19  ;;  %v1037_v22 = vsub.f32 %v3347_v7, %v3858_v59  ;;  %v3861_v18 = vld [vmem:[#allocation63_spill] sm:$0xff]  ;;  %v2036_v23 = vld [vmem:[%s2542_s24 + $0x28] sm:$0x3] }
 0x29f   : > { %1340 = vrot.lane.b32.xlu0 %v3239_v12, %s2140_s25  ;;  %1412 = vrot.lane.b32.xlu1 %v1383_v13, %s2142_s9  ;;  %v950_v8 = vadd.f32 %v3373_v52, %v3859_v48  ;;  %v1640_v13 = vadd.f32 %v3860_v24, %v1630_v41  ;;  %v1582_v3 = vadd.f32 %v3861_v18, %v1562_v4  ;;  %v3863_v1 = vld [vmem:[#allocation87_spill] sm:$0xff]  ;;  %v1076_v4 = vand.u32 2147483647, %v1036_v50  ;;  %v565_v41 = vld [vmem:[%s2542_s24 + $0x39] sm:$0x3] }
 0x2a0   : > { %v3368_v26 = vadd.f32 %v1297_v15, %v1237_v47  ;;  %v1563_v19 = vadd.f32 %v3318_v25, %v3862_v57  ;;  %v1018_v10 = vadd.f32 %v3863_v1, %v1008_v54  ;;  %v3864_v15 = vld [vmem:[#allocation81_spill] sm:$0xff]  ;;  %v814_v27 = vadd.f32 %v2036_v23, %v788_v30  ;;  %v1180_v48 = vld [vmem:[%s2653_s27 + $0x39] sm:$0x3] }
 0x2a1   : > { %v1329_v35 = vpop.permute.xlu0 %1328  ;;  %v1401_v9 = vpop.permute.xlu1 %1400  ;;  %v1009_v47 = vadd.f32 %v3864_v15, %v969_v63  ;;  %v1631_v5 = vadd.f32 %v3120_v55, %v1621_v28  ;;  %v3866_v63 = vld [vmem:[#allocation22_spill] sm:$0xff]  ;;  %v3867_v30 = vld [vmem:[#allocation85_spill] sm:$0xff] }
 0x2a2   : > { %v1356_v31 = vsub.f32 %v3857_v43, %v1329_v35  ;;  %v1506_v17 = vadd.f32 %v1496_v49, %v1329_v35  ;;  %v1427_v7 = vadd.f32 %v3853_v32, %v1401_v9  ;;  %v3865_v32 = vld [vmem:[#allocation30_spill] sm:$0xff]  ;;  %v970_v24 = vadd.f32 %v3866_v63, %v950_v8 }
 0x2a3   : > { %1482 = vrot.lane.b32.xlu0 %v1453_v39, %s2142_s9  ;;  %1712 = vrot.lane.b32.xlu1 %v1688_v33, %s2142_s9  ;;  %v1650_v54 = vsub.f32 %v1640_v13, %v3865_v32  ;;  %v1622_v18 = vadd.f32 %v3867_v30, %v1582_v3  ;;  %v3868_v39 = vld [vmem:[#allocation53_spill] sm:$0xff]  ;;  %v1583_v28 = vadd.f32 %v1573_v0, %v1563_v19 }
 0x2a4   : > { %v1366_v43 = vadd.f32 %v1356_v31, %v3254_v46  ;;  %v1516_v49 = vsub.f32 %v3296_v53, %v1506_v17  ;;  %v3392_v59 = vadd.f32 %v1427_v7, %v1211_v6  ;;  %v884_v33 = vadd.f32 %v3868_v39, %v3320_v16  ;;  %v1931_v31 = vld [vmem:[%s2542_s24 + $0x59] sm:$0x3]  ;;  %v3426_v30 = vld [vmem:[%s2653_s27 + $0x41] sm:$0xff] }
 0x2a5   : > { %v1471_v50 = vpop.permute.xlu0 %1470  ;;  %v718_v35 = vpop.permute.xlu1 %717  ;;  %v1028_v6 = vadd.f32 %v1018_v10, %v565_v41  ;;  %v824_v13 = vadd.f32 %v814_v27, %v3845_v51  ;;  %v1689_v16 = vand.u32 2147483647, %v1649_v56  ;;  %v1019_v8 = vadd.f32 %v3154_v29, %v1009_v47  ;;  %v1973_v17 = vld [vmem:[%s2653_s27 + $0x59] sm:$0x3]  ;;  %v3870_v10 = vld [vmem:[#allocation86_spill] sm:$0xff]  ;;  %v2037_v47 = vld [vmem:[%s2653_s27 + $0x31] sm:$0xff] }
 0x2a6   : > { %v1656_v46 = vand.u32 2147483647, %v1366_v43  ;;  %v1666_v9 = vand.u32 2147483647, %v1516_v49  ;;  %v744_v53 = vsub.f32 %v3868_v39, %v718_v35  ;;  %v894_v57 = vadd.f32 %v884_v33, %v718_v35  ;;  %v3869_v7 = vld [vmem:[#allocation84_spill] sm:$0xff]  ;;  %v3420_v49 = vld [vmem:[%s2542_s24 + $0x41] sm:$0xff] }
 0x2a7   : > { %729 = vrot.lane.b32.xlu0 %v3278_v34, %s2140_s25  ;;  %1101 = vrot.lane.b32.xlu1 %v1076_v4, %s2142_s9  ;;  %v1641_v3 = vadd.f32 %v1631_v5, %v1180_v48  ;;  %v1010_v51 = vadd.f32 %v3869_v7, %v970_v24  ;;  %v1632_v1 = vadd.f32 %v3239_v12, %v1622_v18  ;;  %v1077_v5 = vand.u32 2147483647, %v1037_v22 }
 0x2a8   : > { %v754_v0 = vadd.f32 %v744_v53, %v3336_v36  ;;  %v3407_v19 = vadd.f32 %v1666_v9, %v1656_v46  ;;  %v1623_v15 = vadd.f32 %v3870_v10, %v1583_v28  ;;  %v904_v23 = vsub.f32 %v824_v13, %v894_v57  ;;  %v2040_v28 = vld [vmem:[%s2542_s24 + $0x31] sm:$0xff]  ;;  %v3871_v46 = vld [vmem:[#allocation46_spill] sm:$0xff] }
 0x2a9   : > { %v790_v27 = vpop.permute.xlu0 %789  ;;  %v860_v56 = vpop.permute.xlu1 %859  ;;  %v1288_v4 = vsub.f32 %v2037_v47, %v3353_v58  ;;  %v1038_v43 = vsub.f32 %v1028_v6, %v1931_v31  ;;  %v1029_v32 = vadd.f32 %v3420_v49, %v1019_v8  ;;  %v1651_v48 = vsub.f32 %v1641_v3, %v1973_v17  ;;  %v1932_v58 = vld [vmem:[%s2542_s24 + $0x61] sm:$0xff]  ;;  %v567_v53 = vld [vmem:[%s2542_s24 + $0x49] sm:$0x3]  ;;  %v3872_v57 = vld [vmem:[#allocation60_spill] sm:$0xff] }
 0x2aa   : > { %v1044_v36 = vand.u32 2147483647, %v754_v0  ;;  %v1054_v41 = vand.u32 2147483647, %v904_v23  ;;  %v1690_v63 = vand.u32 2147483647, %v1650_v54  ;;  %v1020_v24 = vadd.f32 %v3278_v34, %v1010_v51 }
 0x2ab   : > { %1342 = vrot.lane.b32.xlu0 %v3351_v61, %s2140_s25  ;;  %1714 = vrot.lane.b32.xlu1 %v1689_v16, %s2142_s9  ;;  %v1642_v18 = vadd.f32 %v3426_v30, %v1632_v1  ;;  %v1633_v39 = vadd.f32 %v3351_v61, %v1623_v15  ;;  %v675_v9 = vsub.f32 %v2040_v28, %v3871_v46  ;;  %v1974_v6 = vld [vmem:[%s2653_s27 + $0x61] sm:$0xff]  ;;  %v1182_v54 = vld [vmem:[%s2653_s27 + $0x49] sm:$0x3]  ;;  %v1298_v13 = vmul.f32 2.0, %v1288_v4  ;;  %v3873_v3 = vld [vmem:[#allocation55_spill] sm:$0xff] }
 0x2ac   : > { %v3432_v35 = vadd.f32 %v1054_v41, %v1044_v36  ;;  %v1039_v8 = vsub.f32 %v1029_v32, %v1932_v58  ;;  %v1497_v0 = vadd.f32 %v3873_v3, %v1471_v50  ;;  %v1078_v17 = vand.u32 2147483647, %v1038_v43  ;;  %v1933_v4 = vld [vmem:[%s2542_s24 + $0x69] sm:$0x3]  ;;  %v3874_v58 = vld [vmem:[#allocation37_spill] sm:$0xff] }
 0x2ad   : > { %v1213_v22 = vpop.permute.xlu0 %1212  ;;  %v3430_v33 = vpop.permute.xlu1 %1264  ;;  %v1030_v7 = vadd.f32 %v1020_v24, %v567_v53  ;;  %v1652_v51 = vsub.f32 %v1642_v18, %v1974_v6  ;;  %v1643_v1 = vadd.f32 %v1633_v39, %v1182_v54  ;;  %v1691_v23 = vand.u32 2147483647, %v1651_v48  ;;  %v1975_v36 = vld [vmem:[%s2653_s27 + $0x69] sm:$0x3] }
 0x2ae   : > { %v1238_v16 = vsub.f32 %v3872_v57, %v1213_v22  ;;  %v685_v47 = vmul.f32 2.0, %v675_v9  ;;  %v1079_v18 = vand.u32 2147483647, %v1039_v8  ;;  %v885_v9 = vadd.f32 %v3827_v11, %v860_v56 }
 0x2af   : > { %1103 = vrot.lane.b32.xlu0 %v1077_v5, %s2142_s9  ;;  %1716 = vrot.lane.b32.xlu1 %v1690_v63, %s2142_s9  ;;  %v2041_v63 = vld [vmem:[%s2542_s24 + $0x30] sm:$0xff]  ;;  %v1040_v39 = vsub.f32 %v1030_v7, %v1933_v4  ;;  %v1653_v46 = vsub.f32 %v1643_v1, %v1975_v36  ;;  %v1692_v54 = vand.u32 2147483647, %v1652_v51  ;;  %v2042_v51 = vld [vmem:[%s2653_s27 + $0x39] sm:$0x3]  ;;  %v3876_v36 = vld [vmem:[#allocation45_spill] sm:$0xff] }
 0x2b0   : > { %v3443_v31 = vadd.f32 %v1298_v13, %v1238_v16  ;;  %v625_v50 = vsub.f32 %v2041_v63, %v3874_v58  ;;  %v815_v28 = vadd.f32 %v2041_v63, %v790_v27  ;;  %v2044_v4 = vld [vmem:[%s2542_s24 + $0x39] sm:$0x3] }
 0x2b1   : > { %v1331_v10 = vpop.permute.xlu0 %1330  ;;  %v1403_v15 = vpop.permute.xlu1 %1402  ;;  %v1693_v7 = vand.u32 2147483647, %v1653_v46 }
 0x2b2   : > { %v1357_v41 = vsub.f32 %v3873_v3, %v1331_v10  ;;  %v1507_v5 = vadd.f32 %v1497_v0, %v1331_v10  ;;  %v1428_v32 = vadd.f32 %v3872_v57, %v1403_v15  ;;  %v695_v27 = vadd.f32 %v685_v47, %v625_v50  ;;  %v2043_v15 = vld [vmem:[%s2542_s24 + $0x11] sm:$0xff] }
 0x2b3   : > { %1105 = vrot.lane.b32.xlu0 %v1078_v17, %s2142_s9  ;;  %1718 = vrot.lane.b32.xlu1 %v1691_v23, %s2142_s9  ;;  %v1080_v17 = vand.u32 2147483647, %v1040_v39  ;;  %v3875_v23 = vld [vmem:[#allocation42_spill] sm:$0xff] }
 0x2b4   : > { %v1367_v43 = vadd.f32 %v1357_v41, %v3368_v26  ;;  %v1517_v48 = vsub.f32 %v3392_v59, %v1507_v5  ;;  %v3455_v24 = vadd.f32 %v1428_v32, %v1213_v22  ;;  %v825_v26 = vadd.f32 %v815_v28, %v3874_v58 }
 0x2b5   : > { %v1473_v53 = vpop.permute.xlu0 %1472  ;;  %v720_v6 = vpop.permute.xlu1 %719  ;;  %v671_v47 = vsub.f32 %v2043_v15, %v3875_v23  ;;  %v676_v41 = vsub.f32 %v2044_v4, %v3876_v36 }
 0x2b6   : > { %v1657_v13 = vand.u32 2147483647, %v1367_v43  ;;  %v1667_v57 = vand.u32 2147483647, %v1517_v48  ;;  %v745_v16 = vsub.f32 %v3827_v11, %v720_v6  ;;  %v895_v3 = vadd.f32 %v885_v9, %v720_v6  ;;  %v2045_v48 = vld [vmem:[%s2542_s24 + $0x10] sm:$0xff] }
 0x2b7   : > { %1107 = vrot.lane.b32.xlu0 %v1079_v18, %s2142_s9  ;;  %1720 = vrot.lane.b32.xlu1 %v1692_v54, %s2142_s9  ;;  %v1289_v11 = vsub.f32 %v2042_v51, %v3430_v33  ;;  %v681_v50 = vmul.f32 2.0, %v671_v47  ;;  %v1498_v28 = vadd.f32 %v2942_v40, %v1473_v53  ;;  %v3877_v18 = vld [vmem:[#allocation33_spill] sm:$0xff]  ;;  %v686_v46 = vmul.f32 2.0, %v676_v41  ;;  %v2046_v54 = vld [vmem:[%s2542_s24 + $0x12] sm:$0xff] }
 0x2b8   : > { %v755_v59 = vadd.f32 %v745_v16, %v695_v27  ;;  %v3462_v56 = vadd.f32 %v1667_v57, %v1657_v13  ;;  %v905_v22 = vsub.f32 %v825_v26, %v895_v3  ;;  %v621_v39 = vsub.f32 %v2045_v48, %v3877_v18  ;;  %v3878_v27 = vld [vmem:[#allocation51_spill] sm:$0xff]  ;;  %v2047_v3 = vld [vmem:[%s2542_s24 + $0x38] sm:$0x3] }
 0x2b9   : > { %v792_v8 = vpop.permute.xlu0 %791  ;;  %v862_v0 = vpop.permute.xlu1 %861  ;;  %v1299_v33 = vmul.f32 2.0, %v1289_v11  ;;  %v741_v13 = vsub.f32 %v2046_v54, %v3878_v27 }
 0x2ba   : > { %v1045_v1 = vand.u32 2147483647, %v755_v59  ;;  %v1055_v10 = vand.u32 2147483647, %v905_v22  ;;  %v3879_v59 = vld [vmem:[#allocation36_spill] sm:$0xff]  ;;  %v691_v53 = vadd.f32 %v681_v50, %v621_v39 }
 0x2bb   : > { %1109 = vrot.lane.b32.xlu0 %v1080_v17, %s2142_s9  ;;  %1722 = vrot.lane.b32.xlu1 %v1693_v7, %s2142_s9  ;;  %v626_v22 = vsub.f32 %v2047_v3, %v3879_v59  ;;  %v816_v17 = vadd.f32 %v2047_v3, %v792_v8  ;;  %v3883_v3 = vld [vmem:[#allocation80_spill] sm:$0xff] }
 0x2bc   : > { %v3472_v63 = vadd.f32 %v1055_v10, %v1045_v1  ;;  %v886_v10 = vadd.f32 %v2953_v2, %v862_v0 }
 0x2bd   : > { %v1215_v5 = vpop.permute.xlu0 %1214  ;;  %v1267_v32 = vpop.permute.xlu1 %1266  ;;  %v696_v1 = vadd.f32 %v686_v46, %v626_v22  ;;  %v826_v36 = vadd.f32 %v816_v17, %v3879_v59 }
 0x2be   : > { %v1239_v58 = vsub.f32 %v3822_v44, %v1215_v5  ;;  %v1290_v54 = vsub.f32 %v3426_v30, %v1267_v32 }
 0x2c0   : > { %v1309_v43 = vadd.f32 %v1299_v33, %v1239_v58  ;;  %v3880_v33 = vld [vmem:[#allocation89_spill] sm:$0xff]  ;;  %v3881_v58 = vld [vmem:[#allocation90_spill] sm:$0xff] }
 0x2c1   : > { %v1333_v9 = vpop.permute.xlu0 %1332  ;;  %v1405_v6 = vpop.permute.xlu1 %1404 }
 0x2c2   : > { %v1358_v57 = vsub.f32 %v2942_v40, %v1333_v9  ;;  %v1508_v16 = vadd.f32 %v1498_v28, %v1333_v9  ;;  %v1429_v26 = vadd.f32 %v3822_v44, %v1405_v6  ;;  %v751_v44 = vadd.f32 %v741_v13, %v691_v53  ;;  %v3884_v53 = vld [vmem:[#allocation48_spill] sm:$0xff] }
 0x2c4   : > { %v1368_v7 = vadd.f32 %v1358_v57, %v3443_v31  ;;  %v1518_v51 = vsub.f32 %v3455_v24, %v1508_v16  ;;  %v1439_v11 = vadd.f32 %v1429_v26, %v1215_v5  ;;  %v3882_v31 = vsub.f32 %v3880_v33, %v3881_v58  ;;  %v3885_v33 = vld [vmem:[#allocation39_spill] sm:$0xff] }
 0x2c5   : > { %v1475_v15 = vpop.permute.xlu0 %1474  ;;  %v722_v23 = vpop.permute.xlu1 %721  ;;  %v1041_v18 = vand.u32 2147483647, %v751_v44  ;;  %v1300_v26 = vmul.f32 2.0, %v1290_v54 }
 0x2c6   : > { %v1658_v47 = vand.u32 2147483647, %v1368_v7  ;;  %v1668_v40 = vand.u32 2147483647, %v1518_v51  ;;  %v746_v4 = vsub.f32 %v2953_v2, %v722_v23  ;;  %v896_v41 = vadd.f32 %v886_v10, %v722_v23 }
 0x2c7   : > { %v1051_v50 = vand.u32 2147483647, %v3882_v31  ;;  %v1499_v22 = vadd.f32 %v3835_v45, %v1475_v15  ;;  %v677_v7 = vsub.f32 %v3420_v49, %v3884_v53 }
 0x2c8   : > { %v756_v8 = vadd.f32 %v746_v4, %v696_v1  ;;  %v3492_v24 = vadd.f32 %v1668_v40, %v1658_v47  ;;  %v906_v5 = vsub.f32 %v826_v36, %v896_v41  ;;  %v2048_v4 = vld [vmem:[%s2542_s24 + $0x40] sm:$0xff] }
 0x2c9   : > { %v794_v28 = vpop.permute.xlu0 %793  ;;  %v864_v0 = vpop.permute.xlu1 %863  ;;  %v1061_v46 = vadd.f32 %v1051_v50, %v1041_v18  ;;  %v687_v40 = vmul.f32 2.0, %v677_v7  ;;  %v627_v58 = vsub.f32 %v2048_v4, %v3885_v33 }
 0x2ca   : > { %v1046_v48 = vand.u32 2147483647, %v756_v8  ;;  %v1056_v39 = vand.u32 2147483647, %v906_v5  ;;  %v817_v44 = vadd.f32 %v2048_v4, %v794_v28 }
 0x2cc   : > { %v3494_v6 = vadd.f32 %v1056_v39, %v1046_v48 }
 0x2cd   : > { %v1092_v9 = vpop.permute.xlu0 %1091  ;;  %v1094_v2 = vpop.permute.xlu1 %1093 }
 0x2ce   : > { %v1121_v27 = vadd.f32 %v1092_v9, %v1061_v46  ;;  %v1122_v13 = vadd.f32 %v1094_v2, %v3256_v42  ;;  %v2049_v46 = vld [vmem:[%s2542_s24 + $0x42] sm:$0xff] }
 0x2d0   : > { %v1131_v31 = vmul.f32 0.33333334, %v1121_v27 }
 0x2d1   : > { %v1217_v57 = vpop.permute.xlu0 %1216  ;;  %v3498_v16 = vpop.permute.xlu1 %1268 }
 0x2d2   : > { %v1240_v59 = vsub.f32 %v3883_v3, %v1217_v57 }
 0x2d4   : > { %v1310_v17 = vadd.f32 %v1300_v26, %v1240_v59 }
 0x2d5   : > { %v1335_v51 = vpop.permute.xlu0 %1334  ;;  %v1407_v1 = vpop.permute.xlu1 %1406 }
 0x2d6   : > { %v1359_v30 = vsub.f32 %v3835_v45, %v1335_v51  ;;  %v1509_v32 = vadd.f32 %v1499_v22, %v1335_v51  ;;  %v1430_v42 = vadd.f32 %v3883_v3, %v1407_v1  ;;  %v887_v45 = vadd.f32 %v3836_v14, %v864_v0 }
 0x2d8   : > { %v1369_v10 = vadd.f32 %v1359_v30, %v1309_v43  ;;  %v1519_v23 = vsub.f32 %v1439_v11, %v1509_v32  ;;  %v1440_v47 = vadd.f32 %v1430_v42, %v1217_v57  ;;  %v697_v43 = vadd.f32 %v687_v40, %v627_v58 }
 0x2d9   : > { %v1477_v36 = vpop.permute.xlu0 %1476  ;;  %v1705_v15 = vpop.permute.xlu1 %1704  ;;  %v827_v11 = vadd.f32 %v817_v44, %v3885_v33 }
 0x2da   : > { %v1659_v41 = vand.u32 2147483647, %v1369_v10  ;;  %v1669_v8 = vand.u32 2147483647, %v1519_v23  ;;  %v1734_v49 = vadd.f32 %v1705_v15, %v3291_v38  ;;  %v1132_v38 = vmul.f32 0.33333334, %v1122_v13 }
 0x2db   : > { %v1500_v32 = vadd.f32 %v3851_v62, %v1477_v36 }
 0x2dc   : > { %v1744_v50 = vmul.f32 0.33333334, %v1734_v49  ;;  %v3510_v5 = vadd.f32 %v1669_v8, %v1659_v41 }
 0x2dd   : > { %v1707_v48 = vpop.permute.xlu0 %1706  ;;  %v724_v28 = vpop.permute.xlu1 %723 }
 0x2de   : > { %v1754_v18 = vsub.f32 %v1131_v31, %v1744_v50  ;;  %v1735_v39 = vadd.f32 %v1707_v48, %v3312_v21  ;;  %v747_v9 = vsub.f32 %v2049_v46, %v724_v28  ;;  %v897_v2 = vadd.f32 %v887_v45, %v724_v28 }
 0x2e0   : > { %v1745_v54 = vmul.f32 0.33333334, %v1735_v39  ;;  %v757_v57 = vadd.f32 %v747_v9, %v697_v43  ;;  %v907_v26 = vsub.f32 %v827_v11, %v897_v2  ;;  %v1765_v27 = vmul.f32 %v1754_v18, %v1754_v18 }
 0x2e1   : > { %v3515_v14 = vpop.permute.xlu0 %795  ;;  %v3517_v0 = vpop.permute.xlu1 %865 }
 0x2e2   : > { %v1755_v3 = vsub.f32 %v1132_v38, %v1745_v54  ;;  %v1047_v59 = vand.u32 2147483647, %v757_v57  ;;  %v1057_v22 = vand.u32 2147483647, %v907_v26  ;;  %v1776_v13 = vsel %vm1775_vm11, %v1765_v27, 0.0 }
 0x2e4   : > { %v1766_v53 = vmul.f32 %v1755_v3, %v1755_v3  ;;  %v3519_v7 = vadd.f32 %v1057_v22, %v1047_v59  ;;  %v2050_v3 = vld [vmem:[%s2542_s24 + $0x49] sm:$0x3]  ;;  %v3886_v59 = vld [vmem:[#allocation47_spill] sm:$0xff] }
 0x2e5   : > { %v1096_v21 = vpop.permute.xlu0 %1095  ;;  %v3521_v51 = vpop.permute.xlu1 %1218  ;;  %v678_v22 = vsub.f32 %v2050_v3, %v3886_v59 }
 0x2e6   : > { %v1778_v1 = vsel %vm1777_vm12, %v1766_v53, 0.0  ;;  %v1123_v33 = vadd.f32 %v1096_v21, %v3355_v37 }
 0x2e7   : > { %v1779_v30 = vadd.f32 %v1778_v1, %v1776_v13  ;;  %v2051_v1 = vld [vmem:[%s2542_s24 + $0x59] sm:$0x3] }
 0x2e8   : > { %v1133_v50 = vmul.f32 0.33333334, %v1123_v33  ;;  %v2054_v33 = vld [vmem:[%s2542_s24 + $0x48] sm:$0x3] }
 0x2e9   : > { %v3526_v42 = vpop.permute.xlu0 %1270  ;;  %v1337_v10 = vpop.permute.xlu1 %1336 }
 0x2ea   : > { %v1360_v23 = vsub.f32 %v3851_v62, %v1337_v10  ;;  %v1510_v40 = vadd.f32 %v1500_v32, %v1337_v10  ;;  %v688_v10 = vmul.f32 2.0, %v678_v22 }
 0x2ec   : > { %v1370_v4 = vadd.f32 %v1360_v23, %v1310_v17  ;;  %v1520_v44 = vsub.f32 %v1440_v47, %v1510_v40  ;;  %v2052_v23 = vld [vmem:[%s2653_s27 + $0x49] sm:$0x3] }
 0x2ed   : > { %v1409_v15 = vpop.permute.xlu0 %1408  ;;  %v1479_v41 = vpop.permute.xlu1 %1478 }
 0x2ee   : > { %v1660_v8 = vand.u32 2147483647, %v1370_v4  ;;  %v1670_v49 = vand.u32 2147483647, %v1520_v44  ;;  %v2053_v44 = vld [vmem:[%s2542_s24 + $0x51] sm:$0xff]  ;;  %v1501_v3 = vadd.f32 %v3120_v55, %v1479_v41 }
 0x2f0   : > { %v3530_v58 = vadd.f32 %v1670_v49, %v1660_v8  ;;  %v3888_v8 = vld [vmem:[#allocation50_spill] sm:$0xff] }
 0x2f1   : > { %v1709_v45 = vpop.permute.xlu0 %1708  ;;  %v3532_v31 = vpop.permute.xlu1 %725  ;;  %v679_v49 = vsub.f32 %v2053_v44, %v3888_v8 }
 0x2f2   : > { %v1736_v36 = vadd.f32 %v1709_v45, %v3407_v19  ;;  %v818_v45 = vadd.f32 %v2054_v33, %v3515_v14 }
 0x2f4   : > { %v1746_v43 = vmul.f32 0.33333334, %v1736_v36  ;;  %v2055_v36 = vld [vmem:[%s2542_s24 + $0x4a] sm:$0x3] }
 0x2f5   : > { %v3535_v11 = vpop.permute.xlu0 %797  ;;  %v3537_v62 = vpop.permute.xlu1 %867 }
 0x2f6   : > { %v1756_v17 = vsub.f32 %v1133_v50, %v1746_v43  ;;  %v888_v50 = vadd.f32 %v2055_v36, %v3517_v0 }
 0x2f8   : > { %v1767_v47 = vmul.f32 %v1756_v17, %v1756_v17  ;;  %v3889_v17 = vld [vmem:[#allocation38_spill] sm:$0xff]  ;;  %v898_v14 = vadd.f32 %v888_v50, %v3532_v31 }
 0x2f9   : > { %v1098_v48 = vpop.permute.xlu0 %1097  ;;  %v3539_v28 = vpop.permute.xlu1 %1220 }
 0x2fa   : > { %v1780_v37 = vsel %vm1775_vm11, %v1767_v47, 0.0  ;;  %v1124_v2 = vadd.f32 %v1098_v48, %v3432_v35  ;;  %v3887_v35 = vld [vmem:[#allocation49_spill] sm:$0xff]  ;;  %v628_v47 = vsub.f32 %v2054_v33, %v3889_v17  ;;  %v2058_v33 = vld [vmem:[%s2653_s27 + $0x59] sm:$0x3] }
 0x2fb   : > { %v1781_v18 = vadd.f32 %v1780_v37, %v1779_v30  ;;  %v680_v30 = vsub.f32 %v2051_v1, %v3887_v35  ;;  %v828_v1 = vadd.f32 %v818_v45, %v3889_v17  ;;  %v3891_v35 = vld [vmem:[#allocation41_spill] sm:$0xff] }
 0x2fc   : > { %v1134_v26 = vmul.f32 0.33333334, %v1124_v2  ;;  %v1431_v2 = vadd.f32 %v3839_v60, %v1409_v15 }
 0x2fd   : > { %v3542_v39 = vpop.permute.xlu0 %1272  ;;  %v3544_v46 = vpop.permute.xlu1 %1338  ;;  %v690_v48 = vmul.f32 2.0, %v680_v30  ;;  %v908_v44 = vsub.f32 %v828_v1, %v898_v14 }
 0x2fe   : > { %v1361_v15 = vsub.f32 %v3120_v55, %v3544_v46  ;;  %v1511_v41 = vadd.f32 %v1501_v3, %v3544_v46  ;;  %v889_v55 = vadd.f32 %v3154_v29, %v3537_v62  ;;  %v1293_v45 = vsub.f32 %v2058_v33, %v3542_v39 }
 0x300   : > { %v1303_v14 = vmul.f32 2.0, %v1293_v45 }
 0x301   : > { %v3546_v19 = vpop.permute.xlu0 %1410  ;;  %v3548_v9 = vpop.permute.xlu1 %1480 }
 0x302   : > { %v1502_v39 = vadd.f32 %v3239_v12, %v3548_v9 }
 0x305   : > { %v1711_v38 = vpop.permute.xlu0 %1710  ;;  %v3551_v54 = vpop.permute.xlu1 %727 }
 0x306   : > { %v1737_v57 = vadd.f32 %v1711_v38, %v3462_v56  ;;  %v1291_v56 = vsub.f32 %v2052_v23, %v3498_v16  ;;  %v1241_v16 = vsub.f32 %v3839_v60, %v3521_v51  ;;  %v748_v38 = vsub.f32 %v2055_v36, %v3532_v31  ;;  %v2057_v31 = vld [vmem:[%s2542_s24 + $0x50] sm:$0xff] }
 0x307   : > { %v629_v30 = vsub.f32 %v2057_v31, %v3891_v35  ;;  %v1441_v23 = vadd.f32 %v1431_v2, %v3521_v51  ;;  %v749_v62 = vsub.f32 %v3154_v29, %v3551_v54  ;;  %v1058_v2 = vand.u32 2147483647, %v908_v44 }
 0x308   : > { %v1747_v27 = vmul.f32 0.33333334, %v1737_v57  ;;  %v3890_v57 = vld [vmem:[#allocation40_spill] sm:$0xff] }
 0x309   : > { %v3556_v53 = vpop.permute.xlu0 %799  ;;  %v3558_v21 = vpop.permute.xlu1 %869  ;;  %v630_v0 = vsub.f32 %v3373_v52, %v3890_v57 }
 0x30a   : > { %v1757_v13 = vsub.f32 %v1134_v26, %v1747_v27  ;;  %v698_v26 = vadd.f32 %v688_v10, %v628_v47  ;;  %v1301_v27 = vmul.f32 2.0, %v1291_v56  ;;  %v820_v1 = vadd.f32 %v3373_v52, %v3556_v53 }
 0x30c   : > { %v1768_v32 = vmul.f32 %v1757_v13, %v1757_v13  ;;  %v689_v13 = vmul.f32 2.0, %v679_v49  ;;  %v1311_v10 = vadd.f32 %v1301_v27, %v1241_v16  ;;  %v3595_v56 = vadd.f32 %v748_v38, %v698_v26 }
 0x30d   : > { %v1100_v40 = vpop.permute.xlu0 %1099  ;;  %v3564_v4 = vpop.permute.xlu1 %1222  ;;  %v1242_v49 = vsub.f32 %v3849_v20, %v3539_v28 }
 0x30e   : > { %v1782_v43 = vsel %vm1777_vm12, %v1768_v32, 0.0  ;;  %v3591_v32 = vadd.f32 %v690_v48, %v630_v0  ;;  %v1125_v8 = vadd.f32 %v1100_v40, %v3472_v63  ;;  %v699_v50 = vadd.f32 %v689_v13, %v629_v30 }
 0x30f   : > { %v3576_v37 = vadd.f32 %v1782_v43, %v1781_v18  ;;  %v2056_v18 = vld [vmem:[%s2653_s27 + $0x51] sm:$0xff]  ;;  %v3605_v43 = vadd.f32 %v1361_v15, %v1311_v10  ;;  %v1521_v63 = vsub.f32 %v1441_v23, %v1511_v41  ;;  %v899_v40 = vadd.f32 %v889_v55, %v3551_v54 }
 0x310   : > { %v1292_v60 = vsub.f32 %v2056_v18, %v3526_v42  ;;  %v819_v42 = vadd.f32 %v2057_v31, %v3535_v11  ;;  %v1432_v11 = vadd.f32 %v3849_v20, %v3546_v19  ;;  %v1048_v47 = vand.u32 2147483647, %v3595_v56 }
 0x311   : > { %v1341_v59 = vpop.permute.xlu0 %1340  ;;  %v1413_v22 = vpop.permute.xlu1 %1412  ;;  %v1135_v48 = vmul.f32 0.33333334, %v1125_v8  ;;  %v1661_v20 = vand.u32 2147483647, %v3605_v43  ;;  %v1671_v27 = vand.u32 2147483647, %v1521_v63  ;;  %v759_v13 = vadd.f32 %v749_v62, %v699_v50 }
 0x312   : > { %v1302_v51 = vmul.f32 2.0, %v1292_v60  ;;  %v829_v38 = vadd.f32 %v819_v42, %v3891_v35  ;;  %v1362_v29 = vsub.f32 %v3239_v12, %v1341_v59  ;;  %v1512_v19 = vadd.f32 %v1502_v39, %v1341_v59 }
 0x313   : > { %v1442_v3 = vadd.f32 %v1432_v11, %v3539_v28  ;;  %v890_v18 = vadd.f32 %v3278_v34, %v3558_v21  ;;  %v1243_v60 = vsub.f32 %v3318_v25, %v3564_v4  ;;  %v1433_v31 = vadd.f32 %v3318_v25, %v1413_v22 }
 0x314   : > { %v909_v9 = vsub.f32 %v829_v38, %v899_v40  ;;  %v1049_v22 = vand.u32 2147483647, %v759_v13  ;;  %v1068_v63 = vadd.f32 %v1058_v2, %v1048_v47 }
 0x315   : > { %v1483_v36 = vpop.permute.xlu0 %1482  ;;  %v1713_v46 = vpop.permute.xlu1 %1712  ;;  %v1522_v41 = vsub.f32 %v1442_v3, %v1512_v19  ;;  %v1313_v8 = vadd.f32 %v1303_v14, %v1243_v60 }
 0x316   : > { %v1738_v17 = vadd.f32 %v1713_v46, %v3492_v24  ;;  %v1312_v24 = vadd.f32 %v1302_v51, %v1242_v49  ;;  %v1503_v12 = vadd.f32 %v3351_v61, %v1483_v36  ;;  %v1059_v44 = vand.u32 2147483647, %v909_v9 }
 0x318   : > { %v1748_v16 = vmul.f32 0.33333334, %v1738_v17  ;;  %v1372_v10 = vadd.f32 %v1362_v29, %v1312_v24  ;;  %v1069_v39 = vadd.f32 %v1059_v44, %v1049_v22 }
 0x319   : > { %v730_v0 = vpop.permute.xlu0 %729  ;;  %v1102_v26 = vpop.permute.xlu1 %1101 }
 0x31a   : > { %v1758_v54 = vsub.f32 %v1135_v48, %v1748_v16  ;;  %v750_v59 = vsub.f32 %v3278_v34, %v730_v0  ;;  %v1126_v28 = vadd.f32 %v1102_v26, %v3494_v6  ;;  %v900_v53 = vadd.f32 %v890_v18, %v730_v0 }
 0x31b   : > { %v830_v34 = vadd.f32 %v820_v1, %v3890_v57  ;;  %v1443_v6 = vadd.f32 %v1433_v31, %v3564_v4  ;;  %v1662_v36 = vand.u32 2147483647, %v1372_v10  ;;  %v1681_v4 = vadd.f32 %v1671_v27, %v1661_v20 }
 0x31c   : > { %v1769_v15 = vmul.f32 %v1758_v54, %v1758_v54  ;;  %v760_v42 = vadd.f32 %v750_v59, %v3591_v32  ;;  %v1136_v55 = vmul.f32 0.33333334, %v1126_v28 }
 0x31d   : > { %v1343_v35 = vpop.permute.xlu0 %1342  ;;  %v1715_v30 = vpop.permute.xlu1 %1714 }
 0x31e   : > { %v1784_v52 = vsel %vm1775_vm11, %v1769_v15, 0.0  ;;  %v1363_v23 = vsub.f32 %v3351_v61, %v1343_v35  ;;  %v1513_v56 = vadd.f32 %v1503_v12, %v1343_v35  ;;  %v1739_v25 = vadd.f32 %v1715_v30, %v3510_v5 }
 0x31f   : > { %v1785_v21 = vadd.f32 %v1784_v52, %v3576_v37  ;;  %v910_v37 = vsub.f32 %v830_v34, %v900_v53  ;;  %v1672_v5 = vand.u32 2147483647, %v1522_v41  ;;  %v1050_v11 = vand.u32 2147483647, %v760_v42 }
 0x320   : > { %v1749_v49 = vmul.f32 0.33333334, %v1739_v25  ;;  %v1373_v50 = vadd.f32 %v1363_v23, %v1313_v8  ;;  %v1523_v51 = vsub.f32 %v1443_v6, %v1513_v56 }
 0x321   : > { %v1104_v33 = vpop.permute.xlu0 %1103  ;;  %v1717_v45 = vpop.permute.xlu1 %1716  ;;  %v1060_v48 = vand.u32 2147483647, %v910_v37  ;;  %v1682_v0 = vadd.f32 %v1672_v5, %v1662_v36  ;;  %v1764_v36 = vld [vmem:[%s2186_s17] sm:$0x1] }
 0x322   : > { %v1127_v61 = vadd.f32 %v1104_v33, %v3519_v7  ;;  %v1740_v46 = vadd.f32 %v1717_v45, %v3530_v58  ;;  %v1759_v43 = vsub.f32 %v1136_v55, %v1749_v49  ;;  %v1663_v7 = vand.u32 2147483647, %v1373_v50 }
 0x323   : > { %v1673_v14 = vand.u32 2147483647, %v1523_v51  ;;  %v1070_v1 = vadd.f32 %v1060_v48, %v1050_v11 }
 0x324   : > { %v1137_v57 = vmul.f32 0.33333334, %v1127_v61  ;;  %v1750_v17 = vmul.f32 0.33333334, %v1740_v46  ;;  %v1770_v32 = vmul.f32 %v1759_v43, %v1759_v43 }
 0x325   : > { %v1106_v62 = vpop.permute.xlu0 %1105  ;;  %v1719_v40 = vpop.permute.xlu1 %1718  ;;  %v1683_v31 = vadd.f32 %v1673_v14, %v1663_v7 }
 0x326   : > { %v1760_v16 = vsub.f32 %v1137_v57, %v1750_v17  ;;  %v1128_v38 = vadd.f32 %v1106_v62, %v1068_v63  ;;  %v1741_v24 = vadd.f32 %v1719_v40, %v1681_v4  ;;  %v1786_v58 = vsel %vm1777_vm12, %v1770_v32, 0.0 }
 0x327   : > { %v1787_v26 = vadd.f32 %v1786_v58, %v1785_v21 }
 0x328   : > { %v1771_v29 = vmul.f32 %v1760_v16, %v1760_v16  ;;  %v1138_v19 = vmul.f32 0.33333334, %v1128_v38  ;;  %v1751_v54 = vmul.f32 0.33333334, %v1741_v24 }
 0x329   : > { %v1108_v47 = vpop.permute.xlu0 %1107  ;;  %v1721_v2 = vpop.permute.xlu1 %1720 }
 0x32a   : > { %v1788_v20 = vsel %vm1775_vm11, %v1771_v29, 0.0  ;;  %v1761_v27 = vsub.f32 %v1138_v19, %v1751_v54  ;;  %v1129_v3 = vadd.f32 %v1108_v47, %v1069_v39  ;;  %v1742_v13 = vadd.f32 %v1721_v2, %v1682_v0 }
 0x32b   : > { %v1789_v9 = vadd.f32 %v1788_v20, %v1787_v26 }
 0x32c   : > { %v1772_v18 = vmul.f32 %v1761_v27, %v1761_v27  ;;  %v1139_v60 = vmul.f32 0.33333334, %v1129_v3  ;;  %v1752_v15 = vmul.f32 0.33333334, %v1742_v13 }
 0x32d   : > { %v1110_v12 = vpop.permute.xlu0 %1109  ;;  %v1723_v59 = vpop.permute.xlu1 %1722 }
 0x32e   : > { %v1790_v28 = vsel %vm1777_vm12, %v1772_v18, 0.0  ;;  %v1762_v35 = vsub.f32 %v1139_v60, %v1752_v15  ;;  %v1130_v30 = vadd.f32 %v1110_v12, %v1070_v1  ;;  %v1743_v10 = vadd.f32 %v1723_v59, %v1683_v31 }
 0x32f   : > { %v1791_v41 = vadd.f32 %v1790_v28, %v1789_v9 }
 0x330   : > { %v1773_v52 = vmul.f32 %v1762_v35, %v1762_v35  ;;  %v1140_v53 = vmul.f32 0.33333334, %v1130_v30  ;;  %v1753_v21 = vmul.f32 0.33333334, %v1743_v10 }
 0x332   : > { %v1792_v23 = vsel %vm1775_vm11, %v1773_v52, 0.0  ;;  %v1763_v56 = vsub.f32 %v1140_v53, %v1753_v21 }
 0x333   : > { %v1793_v22 = vadd.f32 %v1792_v23, %v1791_v41 }
 0x334   : > { %v1774_v25 = vmul.f32 %v1763_v56, %v1763_v56 }
 0x336   : > { %v1794_v44 = vsel %vm1777_vm12, %v1774_v25, 0.0 }
 0x337   : > { %v1795_v34 = vadd.f32 %v1794_v44, %v1793_v22 }
 0x339   : > { %1796 = vadd.xlane.f32.xlu0 %v1795_v34 }
 0x3c6   : > { %v1797_v8 = vpop.xlane.xlu0 %1796 }
 0x3c7   : > { %v1798_v6 = vrot.slane %v1797_v8, 4 }
 0x3c9   : > { %v1799_v42 = vadd.f32 %v1798_v6, %v1797_v8 }
 0x3cb   : > { %v1800_v55 = vrot.slane %v1799_v42, 2 }
 0x3cd   : > { %v1801_v49 = vadd.f32 %v1800_v55, %v1799_v42 }
 0x3cf   : > { %v1802_v33 = vrot.slane %v1801_v49, 1 }
 0x3d1   : > { %v1803_v45 = vadd.f32 %v1802_v33, %v1801_v49 }
 0x3d3   : > { %2001 = vpush %v1803_v45 }
 0x404   : > { %s2002_s28 = spop %2001 }
 0x405   : > { %v1805_v37 = vstv %s2002_s28 }
 0x406   : > { %v1806_v61 = vadd.f32 %v1805_v37, %v1764_v36 }
 0x408   : > { %1808 = vst.msk [vmem:[%s2186_s17] sm:$0x1] %vm1807_vm13, %v1806_v61 }
 0x409 PF: > { %s12_s11 = sadd.s32 1, %s2133_s11   ;;  %s3892_s9 = smov %s3895_s12 }
 0x40a   : > { %p9_p1 = scmp.ge.s32.totalorder %s12_s11, 5   ;;  %s3893_s10 = smov %s3899_s13 }
 0x40c   :  { %11 = sbr.rel (!%p9_p1) target bundleno = 2 (0x2), region = 73 }
 0x413   :  { %1826 = vsyncmov [#allocation6] }
 0x416   :  { %s1827_s29 = vpop.sfrf %1826 }
 0x417   :  { %p1978_p2 = scmp.ne.s32.totalorder %s1827_s29, 0 }
 0x419   :  { %1831 = shalt.err (%p1978_p2)  }
 0x41a   :  { %1833 = vsyncmov [#allocation6 + $0x1] }
 0x41d   :  { %s1834_s30 = vpop.sfrf %1833 }
 0x41e   :  { %p1979_p3 = scmp.ne.s32.totalorder %s1834_s30, 0 }
 0x420   :  { %1838 = shalt.err (%p1979_p3)  }

</bundles_post_ra>
